<compile_context>
chip_gen: v5e
topology: v5e:2x2
jax: 0.10.0
libtpu: 0.0.40
codegen_flags: <defaults>
</compile_context>

<pallas_src>
import math

import jax
import jax.numpy as jnp
from jax import lax
from jax.experimental import pallas as pl
from jax.experimental.pallas import tpu as pltpu

# ------------------------- small, module-consistent config -------------------------
IMG = 16          # img_size
PS = 4            # patch_size
CIN = 3           # channels
EMBED = 32        # embed_dim (d_model)
DEPTH = 2         # depth
NCLS = 10         # num_classes
D_STATE = 16      # Mamba d_state
D_CONV = 4        # Mamba d_conv
EXPAND = 2
D_INNER = EXPAND * EMBED
DT_RANK = math.ceil(EMBED / 16)
EPS = 1e-5        # norm_epsilon


# ===================================== fused kernel =====================================
def _layernorm(x, w, b):
    mu = jnp.mean(x, axis=-1, keepdims=True)
    xc = x - mu
    var = jnp.mean(xc * xc, axis=-1, keepdims=True)
    return xc * lax.rsqrt(var + EPS) * w + b


def _silu(x):
    return x * (1.0 / (1.0 + jnp.exp(-x)))


def _fused_forward_kernel(
        patches_ref,                 # (B*L, C*PS*PS)
        patch_w_ref, patch_b_ref,    # (C*PS*PS, D), (1, D)
        ln_w_ref, ln_b_ref,          # (DEPTH, D) each
        in_proj_w_ref,               # (DEPTH, D, 2*D_INNER)
        conv_w_ref, conv_b_ref,      # (DEPTH, D_CONV, D_INNER), (DEPTH, D_INNER)
        xdt_w_ref, dt_b_ref,         # (DEPTH, D_INNER, D_INNER+2*D_STATE), (DEPTH, D_INNER)
        out_proj_w_ref,              # (DEPTH, D_INNER, D)
        At_ref, Dv_ref,              # (DEPTH, D_STATE, D_INNER), (DEPTH, D_INNER)
        normf_w_ref, normf_b_ref,    # (1, D) each
        head_w_ref, head_b_ref,      # (D, NCLS), (1, NCLS)
        logits_ref,                  # (B, NCLS)
        hidden_ref,                  # (B, L, D)
):
    Bsz, L, D = hidden_ref.shape
    DI = D_INNER
    DS = D_STATE
    BDI = Bsz * DI

    # ---------------- patch embed (Conv2d k=ps, stride=ps as GEMM) ----------------
    hidden = (jnp.dot(patches_ref[...], patch_w_ref[...],
                      preferred_element_type=jnp.float32) + patch_b_ref[...])     # (B*L, D)
    residual = jnp.zeros_like(hidden)

    for l in range(DEPTH):
        # -------- add + LayerNorm (residual = hidden + residual ; normed = LN(residual)) --------
        res = hidden + residual
        normed = _layernorm(res, ln_w_ref[l:l + 1, :], ln_b_ref[l:l + 1, :])       # (B*L, D)

        # -------- in_proj --------
        xz = jnp.dot(normed, in_proj_w_ref[l], preferred_element_type=jnp.float32)  # (B*L, 2*DI)
        x = xz[:, :DI]                                                              # (B*L, DI)
        z = xz[:, DI:]                                                              # (B*L, DI)

        # pack batch into lanes: (L, B*DI) -> full 128-lane vregs, one L loop for all batches
        xl = jnp.concatenate([x[b * L:(b + 1) * L, :] for b in range(Bsz)], axis=1)  # (L, BDI)
        zl = jnp.concatenate([z[b * L:(b + 1) * L, :] for b in range(Bsz)], axis=1)  # (L, BDI)

        # -------- causal depthwise conv1d + SiLU (shifted slices, no host pad) --------
        cw = jnp.concatenate([conv_w_ref[l]] * Bsz, axis=1)                          # (D_CONV, BDI)
        cb = jnp.concatenate([conv_b_ref[l:l + 1, :]] * Bsz, axis=1)                 # (1, BDI)
        acc = jnp.zeros((L, BDI), jnp.float32) + cb
        for k in range(D_CONV):                                # static unroll over taps
            shift = D_CONV - 1 - k
            wk = cw[k:k + 1, :]
            if shift == 0:
                acc = acc + xl * wk
            else:
                xs = jnp.concatenate(
                    [jnp.zeros((shift, BDI), jnp.float32), xl[:L - shift, :]], axis=0)
                acc = acc + xs * wk
        xc = _silu(acc)                                                              # (L, BDI)

        # -------- fused x_proj + dt_proj GEMM (dt | B | C in one shot) --------
        xc_bm = jnp.concatenate([xc[:, b * DI:(b + 1) * DI] for b in range(Bsz)],
                                axis=0)                                              # (B*L, DI)
        xdbc = jnp.dot(xc_bm, xdt_w_ref[l], preferred_element_type=jnp.float32)      # (B*L, DI+2*DS)
        dt_raw = xdbc[:, :DI] + dt_b_ref[l:l + 1, :]                                 # (B*L, DI)
        Bm = xdbc[:, DI:DI + DS]                                                     # (B*L, DS)
        Cm = xdbc[:, DI + DS:DI + 2 * DS]                                            # (B*L, DS)

        # lane-pack dt, then one guarded softplus over full-width vregs
        dt_l = jnp.concatenate([dt_raw[b * L:(b + 1) * L, :] for b in range(Bsz)],
                               axis=1)                                               # (L, BDI)
        dt_l = jnp.where(dt_l > 20.0, dt_l,
                         jnp.log(1.0 + jnp.exp(jnp.minimum(dt_l, 20.0))))            # (L, BDI)

        # -------- L-parallel scan precomputation (dA, dB*x, C broadcast), lane-packed --------
        At_l = jnp.concatenate([At_ref[l]] * Bsz, axis=1)                            # (DS, BDI)
        dA = jnp.exp(At_l[None, :, :] * dt_l[:, None, :])                            # (L, DS, BDI)
        dtx = dt_l * xc                                                              # (L, BDI)
        B_parts, C_parts = [], []
        for b in range(Bsz):
            Bm_b = Bm[b * L:(b + 1) * L, :]                                          # (L, DS)
            Cm_b = Cm[b * L:(b + 1) * L, :]                                          # (L, DS)
            B_parts.append(jnp.broadcast_to(Bm_b[:, :, None], (L, DS, DI)))          # (L, DS, DI)
            C_parts.append(jnp.broadcast_to(Cm_b[:, :, None], (L, DS, DI)))          # (L, DS, DI)
        Bb = jnp.concatenate(B_parts, axis=2)                                        # (L, DS, BDI)
        Cb = jnp.concatenate(C_parts, axis=2)                                        # (L, DS, BDI)
        dBx = Bb * dtx[:, None, :]                                                   # (L, DS, BDI)

        # -------- serial recurrence, fully unrolled (critical path: 2 VPU ops / step) --------
        h = jnp.zeros((DS, BDI), jnp.float32)
        ys = []
        for t in range(L):
            h = dA[t] * h + dBx[t]                                                   # (DS, BDI)
            ys.append(jnp.sum(h * Cb[t], axis=0, keepdims=True))                     # (1, BDI)
        y = jnp.concatenate(ys, axis=0)                                              # (L, BDI)

        # -------- D skip + SiLU(z) gate --------
        Dv = jnp.concatenate([Dv_ref[l:l + 1, :]] * Bsz, axis=1)                     # (1, BDI)
        y = y + Dv * xc
        y = y * _silu(zl)

        # -------- out_proj --------
        y_bm = jnp.concatenate([y[:, b * DI:(b + 1) * DI] for b in range(Bsz)],
                               axis=0)                                               # (B*L, DI)
        hidden = jnp.dot(y_bm, out_proj_w_ref[l], preferred_element_type=jnp.float32)  # (B*L, D)
        residual = res

    # ---------------- final add + norm_f + mean-pool + head ----------------
    res = hidden + residual
    normed = _layernorm(res, normf_w_ref[...], normf_b_ref[...])                     # (B*L, D)
    pooled_rows = []
    for b in range(Bsz):
        nb = normed[b * L:(b + 1) * L, :]                                            # (L, D)
        hidden_ref[b, :, :] = nb
        pooled_rows.append(jnp.mean(nb, axis=0, keepdims=True))                      # (1, D)
    pooled = jnp.concatenate(pooled_rows, axis=0)                                    # (B, D)
    logits_ref[...] = (jnp.dot(pooled, head_w_ref[...], preferred_element_type=jnp.float32)
                       + head_b_ref[...])


def _zmap(n):
    return lambda i: (0,) * n


# ===================================== model glue =====================================
def init_params(key):
    keys = iter(jax.random.split(key, 6 + DEPTH * 6))

    def nrm(shape, std=0.02):
        return (std * jax.random.normal(next(keys), shape)).astype(jnp.float32)

    ln_w, ln_b, in_proj_w = [], [], []
    conv_w, conv_b = [], []
    xdt_w, dt_b = [], []
    out_proj_w, At, Dv = [], [], []
    for _ in range(DEPTH):
        ln_w.append(jnp.ones((EMBED,), jnp.float32))
        ln_b.append(jnp.zeros((EMBED,), jnp.float32))
        in_proj_w.append(nrm((EMBED, 2 * D_INNER)))
        conv_w.append(nrm((D_CONV, D_INNER), std=0.1))
        conv_b.append(jnp.zeros((D_INNER,), jnp.float32))
        x_proj = nrm((D_INNER, DT_RANK + 2 * D_STATE))
        dt_proj = nrm((DT_RANK, D_INNER), std=0.1)
        # fold dt_proj into x_proj: first D_INNER cols produce pre-bias dt, then B, C
        xdt_w.append(jnp.concatenate([x_proj[:, :DT_RANK] @ dt_proj,
                                      x_proj[:, DT_RANK:]], axis=1))
        dt_b.append(jnp.full((D_INNER,), math.log(math.expm1(0.01)), jnp.float32))
        A_log = jnp.log(jnp.broadcast_to(
            jnp.arange(1, D_STATE + 1, dtype=jnp.float32), (D_INNER, D_STATE)))
        At.append(-jnp.exp(A_log).T)                       # precompute -exp(A_log)^T at init
        Dv.append(jnp.ones((D_INNER,), jnp.float32))
        out_proj_w.append(nrm((D_INNER, EMBED)))

    return {
        "patch_w": nrm((CIN * PS * PS, EMBED)),
        "patch_b": jnp.zeros((1, EMBED), jnp.float32),
        "ln_w": jnp.stack(ln_w), "ln_b": jnp.stack(ln_b),
        "in_proj_w": jnp.stack(in_proj_w),
        "conv_w": jnp.stack(conv_w), "conv_b": jnp.stack(conv_b),
        "xdt_w": jnp.stack(xdt_w), "dt_b": jnp.stack(dt_b),
        "out_proj_w": jnp.stack(out_proj_w),
        "At": jnp.stack(At), "Dv": jnp.stack(Dv),
        "normf_w": jnp.ones((1, EMBED), jnp.float32),
        "normf_b": jnp.zeros((1, EMBED), jnp.float32),
        "head_w": nrm((EMBED, NCLS)),
        "head_b": jnp.zeros((1, NCLS), jnp.float32),
    }


def forward(params, x):
    # x: NCHW (B, C, H, W), same as the PyTorch module input.
    Bsz, C, H, W = x.shape
    gh, gw = H // PS, W // PS
    Np = gh * gw
    # PatchEmbed (Conv2d k=ps, stride=ps) as patchify (layout glue) -> rows are b-major tokens.
    patches = (x.reshape(Bsz, C, gh, PS, gw, PS)
                 .transpose(0, 2, 4, 1, 3, 5)
                 .reshape(Bsz * Np, C * PS * PS))

    args = (patches,
            params["patch_w"], params["patch_b"],
            params["ln_w"], params["ln_b"],
            params["in_proj_w"],
            params["conv_w"], params["conv_b"],
            params["xdt_w"], params["dt_b"],
            params["out_proj_w"],
            params["At"], params["Dv"],
            params["normf_w"], params["normf_b"],
            params["head_w"], params["head_b"])

    in_specs = [pl.BlockSpec(tuple(a.shape), _zmap(a.ndim)) for a in args]
    out_shapes = (jax.ShapeDtypeStruct((Bsz, NCLS), jnp.float32),
                  jax.ShapeDtypeStruct((Bsz, Np, EMBED), jnp.float32))
    out_specs = (pl.BlockSpec((Bsz, NCLS), lambda i: (0, 0)),
                 pl.BlockSpec((Bsz, Np, EMBED), lambda i: (0, 0, 0)))

    logits, hidden = pl.pallas_call(
        _fused_forward_kernel,
        out_shape=out_shapes,
        grid=(1,),
        in_specs=in_specs,
        out_specs=out_specs,
        compiler_params=pltpu.CompilerParams(dimension_semantics=("arbitrary",)),
    )(*args)
    return logits, hidden


# ===================================== main =====================================
if __name__ == "__main__":
    key = jax.random.PRNGKey(0)
    pkey, xkey = jax.random.split(key)
    params = init_params(pkey)
    x = jax.random.normal(xkey, (2, CIN, IMG, IMG), dtype=jnp.float32)

    logits, hidden = jax.jit(forward)(params, x)
    jax.block_until_ready((logits, hidden))

    assert logits.shape == (2, NCLS), logits.shape
    assert hidden.shape == (2, (IMG // PS) ** 2, EMBED), hidden.shape
    assert bool(jnp.all(jnp.isfinite(logits))) and bool(jnp.all(jnp.isfinite(hidden)))
    print("KERNEL_OK")
</pallas_src>

<mosaic_0001>
module attributes {stable_mosaic.version = 11 : i64} {
  func.func @_fused_forward_kernel(%arg0: i32, %arg1: memref<32x48xf32, #tpu.memory_space<vmem>>, %arg2: memref<48x32xf32, #tpu.memory_space<vmem>>, %arg3: memref<1x32xf32, #tpu.memory_space<vmem>>, %arg4: memref<2x32xf32, #tpu.memory_space<vmem>>, %arg5: memref<2x32xf32, #tpu.memory_space<vmem>>, %arg6: memref<2x32x128xf32, #tpu.memory_space<vmem>>, %arg7: memref<2x4x64xf32, #tpu.memory_space<vmem>>, %arg8: memref<2x64xf32, #tpu.memory_space<vmem>>, %arg9: memref<2x64x96xf32, #tpu.memory_space<vmem>>, %arg10: memref<2x64xf32, #tpu.memory_space<vmem>>, %arg11: memref<2x64x32xf32, #tpu.memory_space<vmem>>, %arg12: memref<2x16x64xf32, #tpu.memory_space<vmem>>, %arg13: memref<2x64xf32, #tpu.memory_space<vmem>>, %arg14: memref<1x32xf32, #tpu.memory_space<vmem>>, %arg15: memref<1x32xf32, #tpu.memory_space<vmem>>, %arg16: memref<32x10xf32, #tpu.memory_space<vmem>>, %arg17: memref<1x10xf32, #tpu.memory_space<vmem>>, %arg18: memref<2x10xf32, #tpu.memory_space<vmem>>, %arg19: memref<2x16x32xf32, #tpu.memory_space<vmem>>) attributes {dimension_semantics = [#tpu.dimension_semantics<arbitrary>], iteration_bounds = array<i64: 1>, scalar_prefetch = 0 : i64, scratch_operands = 0 : i64, tpu.core_type = #tpu.core_type<tc>, window_params = [{pipeline_mode = #tpu.pipeline_mode<synchronous>, transform_indices = @transform_0, window_bounds = array<i64: 32, 48>}, {pipeline_mode = #tpu.pipeline_mode<synchronous>, transform_indices = @transform_1, window_bounds = array<i64: 48, 32>}, {pipeline_mode = #tpu.pipeline_mode<synchronous>, transform_indices = @transform_2, window_bounds = array<i64: 1, 32>}, {pipeline_mode = #tpu.pipeline_mode<synchronous>, transform_indices = @transform_3, window_bounds = array<i64: 2, 32>}, {pipeline_mode = #tpu.pipeline_mode<synchronous>, transform_indices = @transform_4, window_bounds = array<i64: 2, 32>}, {pipeline_mode = #tpu.pipeline_mode<synchronous>, transform_indices = @transform_5, window_bounds = array<i64: 2, 32, 128>}, {pipeline_mode = #tpu.pipeline_mode<synchronous>, transform_indices = @transform_6, window_bounds = array<i64: 2, 4, 64>}, {pipeline_mode = #tpu.pipeline_mode<synchronous>, transform_indices = @transform_7, window_bounds = array<i64: 2, 64>}, {pipeline_mode = #tpu.pipeline_mode<synchronous>, transform_indices = @transform_8, window_bounds = array<i64: 2, 64, 96>}, {pipeline_mode = #tpu.pipeline_mode<synchronous>, transform_indices = @transform_9, window_bounds = array<i64: 2, 64>}, {pipeline_mode = #tpu.pipeline_mode<synchronous>, transform_indices = @transform_10, window_bounds = array<i64: 2, 64, 32>}, {pipeline_mode = #tpu.pipeline_mode<synchronous>, transform_indices = @transform_11, window_bounds = array<i64: 2, 16, 64>}, {pipeline_mode = #tpu.pipeline_mode<synchronous>, transform_indices = @transform_12, window_bounds = array<i64: 2, 64>}, {pipeline_mode = #tpu.pipeline_mode<synchronous>, transform_indices = @transform_13, window_bounds = array<i64: 1, 32>}, {pipeline_mode = #tpu.pipeline_mode<synchronous>, transform_indices = @transform_14, window_bounds = array<i64: 1, 32>}, {pipeline_mode = #tpu.pipeline_mode<synchronous>, transform_indices = @transform_15, window_bounds = array<i64: 32, 10>}, {pipeline_mode = #tpu.pipeline_mode<synchronous>, transform_indices = @transform_16, window_bounds = array<i64: 1, 10>}, {pipeline_mode = #tpu.pipeline_mode<synchronous>, transform_indices = @transform_17, window_bounds = array<i64: 2, 10>}, {pipeline_mode = #tpu.pipeline_mode<synchronous>, transform_indices = @transform_18, window_bounds = array<i64: 2, 16, 32>}]} {
    %c0 = arith.constant 0 : index
    %c0_0 = arith.constant 0 : index
    %0 = vector.load %arg1[%c0, %c0_0] : memref<32x48xf32, #tpu.memory_space<vmem>>, vector<32x48xf32>
    %c0_1 = arith.constant 0 : index
    %c0_2 = arith.constant 0 : index
    %1 = vector.load %arg2[%c0_1, %c0_2] : memref<48x32xf32, #tpu.memory_space<vmem>>, vector<48x32xf32>
    %cst = arith.constant dense<0.000000e+00> : vector<32x32xf32>
    %2 = tpu.matmul %0, %1, %cst {dimension_numbers = #tpu.dot_dimension_numbers<[1], [0], [0], [1], [0, 0, 1, 1], [], []>} : vector<32x48xf32>, vector<48x32xf32>, vector<32x32xf32> -> vector<32x32xf32>
    %c0_3 = arith.constant 0 : index
    %c0_4 = arith.constant 0 : index
    %3 = vector.load %arg3[%c0_3, %c0_4] : memref<1x32xf32, #tpu.memory_space<vmem>>, vector<1x32xf32>
    %4 = vector.broadcast %3 : vector<1x32xf32> to vector<32x32xf32>
    %5 = arith.addf %2, %4 : vector<32x32xf32>
    %cst_5 = arith.constant 0.000000e+00 : f32
    %6 = vector.broadcast %cst_5 : f32 to vector<32x32xf32>
    %7 = arith.addf %5, %6 : vector<32x32xf32>
    %c0_6 = arith.constant 0 : index
    %c0_7 = arith.constant 0 : index
    %8 = vector.load %arg4[%c0_6, %c0_7] : memref<2x32xf32, #tpu.memory_space<vmem>>, vector<1x32xf32>
    %c0_8 = arith.constant 0 : index
    %c0_9 = arith.constant 0 : index
    %9 = vector.load %arg5[%c0_8, %c0_9] : memref<2x32xf32, #tpu.memory_space<vmem>>, vector<1x32xf32>
    %cst_10 = arith.constant dense<0.000000e+00> : vector<32xf32>
    %10 = vector.multi_reduction <add>, %7, %cst_10 [1] : vector<32x32xf32> to vector<32xf32>
    %11 = vector.shape_cast %10 : vector<32xf32> to vector<32x1xf32>
    %cst_11 = arith.constant 3.200000e+01 : f32
    %12 = vector.broadcast %cst_11 : f32 to vector<32x1xf32>
    %13 = arith.divf %11, %12 : vector<32x1xf32>
    %14 = vector.broadcast %13 : vector<32x1xf32> to vector<32x32xf32>
    %15 = arith.subf %7, %14 : vector<32x32xf32>
    %16 = arith.mulf %15, %15 : vector<32x32xf32>
    %cst_12 = arith.constant dense<0.000000e+00> : vector<32xf32>
    %17 = vector.multi_reduction <add>, %16, %cst_12 [1] : vector<32x32xf32> to vector<32xf32>
    %18 = vector.shape_cast %17 : vector<32xf32> to vector<32x1xf32>
    %cst_13 = arith.constant 3.200000e+01 : f32
    %19 = vector.broadcast %cst_13 : f32 to vector<32x1xf32>
    %20 = arith.divf %18, %19 : vector<32x1xf32>
    %cst_14 = arith.constant 9.99999974E-6 : f32
    %21 = vector.broadcast %cst_14 : f32 to vector<32x1xf32>
    %22 = arith.addf %20, %21 : vector<32x1xf32>
    %23 = math.rsqrt %22 : vector<32x1xf32>
    %24 = vector.broadcast %23 : vector<32x1xf32> to vector<32x32xf32>
    %25 = arith.mulf %15, %24 : vector<32x32xf32>
    %26 = vector.broadcast %8 : vector<1x32xf32> to vector<32x32xf32>
    %27 = arith.mulf %25, %26 : vector<32x32xf32>
    %28 = vector.broadcast %9 : vector<1x32xf32> to vector<32x32xf32>
    %29 = arith.addf %27, %28 : vector<32x32xf32>
    %c0_15 = arith.constant 0 : index
    %c0_16 = arith.constant 0 : index
    %c0_17 = arith.constant 0 : index
    %30 = vector.load %arg6[%c0_15, %c0_16, %c0_17] : memref<2x32x128xf32, #tpu.memory_space<vmem>>, vector<1x32x128xf32>
    %31 = vector.shape_cast %30 : vector<1x32x128xf32> to vector<32x128xf32>
    %cst_18 = arith.constant dense<0.000000e+00> : vector<32x128xf32>
    %32 = tpu.matmul %29, %31, %cst_18 {dimension_numbers = #tpu.dot_dimension_numbers<[1], [0], [0], [1], [0, 0, 1, 1], [], []>} : vector<32x32xf32>, vector<32x128xf32>, vector<32x128xf32> -> vector<32x128xf32>
    %33 = vector.extract_strided_slice %32 {offsets = [0, 0], sizes = [32, 64], strides = [1, 1]} : vector<32x128xf32> to vector<32x64xf32>
    %34 = vector.extract_strided_slice %32 {offsets = [0, 64], sizes = [32, 64], strides = [1, 1]} : vector<32x128xf32> to vector<32x64xf32>
    %35 = vector.extract_strided_slice %33 {offsets = [0, 0], sizes = [16, 64], strides = [1, 1]} : vector<32x64xf32> to vector<16x64xf32>
    %36 = vector.extract_strided_slice %33 {offsets = [16, 0], sizes = [16, 64], strides = [1, 1]} : vector<32x64xf32> to vector<16x64xf32>
    %37 = tpu.concatenate %35, %36 in 1 : vector<16x64xf32>, vector<16x64xf32> -> vector<16x128xf32>
    %38 = vector.extract_strided_slice %34 {offsets = [0, 0], sizes = [16, 64], strides = [1, 1]} : vector<32x64xf32> to vector<16x64xf32>
    %39 = vector.extract_strided_slice %34 {offsets = [16, 0], sizes = [16, 64], strides = [1, 1]} : vector<32x64xf32> to vector<16x64xf32>
    %40 = tpu.concatenate %38, %39 in 1 : vector<16x64xf32>, vector<16x64xf32> -> vector<16x128xf32>
    %c0_19 = arith.constant 0 : index
    %c0_20 = arith.constant 0 : index
    %c0_21 = arith.constant 0 : index
    %41 = vector.load %arg7[%c0_19, %c0_20, %c0_21] : memref<2x4x64xf32, #tpu.memory_space<vmem>>, vector<1x4x64xf32>
    %42 = vector.shape_cast %41 : vector<1x4x64xf32> to vector<4x64xf32>
    %43 = tpu.concatenate %42, %42 in 1 : vector<4x64xf32>, vector<4x64xf32> -> vector<4x128xf32>
    %c0_22 = arith.constant 0 : index
    %c0_23 = arith.constant 0 : index
    %44 = vector.load %arg8[%c0_22, %c0_23] : memref<2x64xf32, #tpu.memory_space<vmem>>, vector<1x64xf32>
    %45 = tpu.concatenate %44, %44 in 1 : vector<1x64xf32>, vector<1x64xf32> -> vector<1x128xf32>
    %cst_24 = arith.constant 0.000000e+00 : f32
    %46 = vector.broadcast %cst_24 : f32 to vector<16x128xf32>
    %47 = vector.broadcast %45 : vector<1x128xf32> to vector<16x128xf32>
    %48 = arith.addf %46, %47 : vector<16x128xf32>
    %49 = vector.extract_strided_slice %43 {offsets = [0, 0], sizes = [1, 128], strides = [1, 1]} : vector<4x128xf32> to vector<1x128xf32>
    %cst_25 = arith.constant 0.000000e+00 : f32
    %50 = vector.broadcast %cst_25 : f32 to vector<3x128xf32>
    %51 = vector.extract_strided_slice %37 {offsets = [0, 0], sizes = [13, 128], strides = [1, 1]} : vector<16x128xf32> to vector<13x128xf32>
    %52 = tpu.concatenate %50, %51 in 0 : vector<3x128xf32>, vector<13x128xf32> -> vector<16x128xf32>
    %53 = vector.broadcast %49 : vector<1x128xf32> to vector<16x128xf32>
    %54 = arith.mulf %52, %53 : vector<16x128xf32>
    %55 = arith.addf %48, %54 : vector<16x128xf32>
    %56 = vector.extract_strided_slice %43 {offsets = [1, 0], sizes = [1, 128], strides = [1, 1]} : vector<4x128xf32> to vector<1x128xf32>
    %cst_26 = arith.constant 0.000000e+00 : f32
    %57 = vector.broadcast %cst_26 : f32 to vector<2x128xf32>
    %58 = vector.extract_strided_slice %37 {offsets = [0, 0], sizes = [14, 128], strides = [1, 1]} : vector<16x128xf32> to vector<14x128xf32>
    %59 = tpu.concatenate %57, %58 in 0 : vector<2x128xf32>, vector<14x128xf32> -> vector<16x128xf32>
    %60 = vector.broadcast %56 : vector<1x128xf32> to vector<16x128xf32>
    %61 = arith.mulf %59, %60 : vector<16x128xf32>
    %62 = arith.addf %55, %61 : vector<16x128xf32>
    %63 = vector.extract_strided_slice %43 {offsets = [2, 0], sizes = [1, 128], strides = [1, 1]} : vector<4x128xf32> to vector<1x128xf32>
    %cst_27 = arith.constant 0.000000e+00 : f32
    %64 = vector.broadcast %cst_27 : f32 to vector<1x128xf32>
    %65 = vector.extract_strided_slice %37 {offsets = [0, 0], sizes = [15, 128], strides = [1, 1]} : vector<16x128xf32> to vector<15x128xf32>
    %66 = tpu.concatenate %64, %65 in 0 : vector<1x128xf32>, vector<15x128xf32> -> vector<16x128xf32>
    %67 = vector.broadcast %63 : vector<1x128xf32> to vector<16x128xf32>
    %68 = arith.mulf %66, %67 : vector<16x128xf32>
    %69 = arith.addf %62, %68 : vector<16x128xf32>
    %70 = vector.extract_strided_slice %43 {offsets = [3, 0], sizes = [1, 128], strides = [1, 1]} : vector<4x128xf32> to vector<1x128xf32>
    %71 = vector.broadcast %70 : vector<1x128xf32> to vector<16x128xf32>
    %72 = arith.mulf %37, %71 : vector<16x128xf32>
    %73 = arith.addf %69, %72 : vector<16x128xf32>
    %cst_28 = arith.constant 0.000000e+00 : f32
    %74 = vector.broadcast %cst_28 : f32 to vector<16x128xf32>
    %75 = arith.subf %74, %73 : vector<16x128xf32>
    %76 = math.exp %75 : vector<16x128xf32>
    %cst_29 = arith.constant 1.000000e+00 : f32
    %77 = vector.broadcast %cst_29 : f32 to vector<16x128xf32>
    %78 = arith.addf %77, %76 : vector<16x128xf32>
    %cst_30 = arith.constant 1.000000e+00 : f32
    %79 = vector.broadcast %cst_30 : f32 to vector<16x128xf32>
    %80 = arith.divf %79, %78 : vector<16x128xf32>
    %81 = arith.mulf %73, %80 : vector<16x128xf32>
    %82 = vector.extract_strided_slice %81 {offsets = [0, 0], sizes = [16, 64], strides = [1, 1]} : vector<16x128xf32> to vector<16x64xf32>
    %83 = vector.extract_strided_slice %81 {offsets = [0, 64], sizes = [16, 64], strides = [1, 1]} : vector<16x128xf32> to vector<16x64xf32>
    %84 = tpu.concatenate %82, %83 in 0 : vector<16x64xf32>, vector<16x64xf32> -> vector<32x64xf32>
    %c0_31 = arith.constant 0 : index
    %c0_32 = arith.constant 0 : index
    %c0_33 = arith.constant 0 : index
    %85 = vector.load %arg9[%c0_31, %c0_32, %c0_33] : memref<2x64x96xf32, #tpu.memory_space<vmem>>, vector<1x64x96xf32>
    %86 = vector.shape_cast %85 : vector<1x64x96xf32> to vector<64x96xf32>
    %cst_34 = arith.constant dense<0.000000e+00> : vector<32x96xf32>
    %87 = tpu.matmul %84, %86, %cst_34 {dimension_numbers = #tpu.dot_dimension_numbers<[1], [0], [0], [1], [0, 0, 1, 1], [], []>} : vector<32x64xf32>, vector<64x96xf32>, vector<32x96xf32> -> vector<32x96xf32>
    %88 = vector.extract_strided_slice %87 {offsets = [0, 0], sizes = [32, 64], strides = [1, 1]} : vector<32x96xf32> to vector<32x64xf32>
    %c0_35 = arith.constant 0 : index
    %c0_36 = arith.constant 0 : index
    %89 = vector.load %arg10[%c0_35, %c0_36] : memref<2x64xf32, #tpu.memory_space<vmem>>, vector<1x64xf32>
    %90 = vector.broadcast %89 : vector<1x64xf32> to vector<32x64xf32>
    %91 = arith.addf %88, %90 : vector<32x64xf32>
    %92 = vector.extract_strided_slice %87 {offsets = [0, 64], sizes = [32, 16], strides = [1, 1]} : vector<32x96xf32> to vector<32x16xf32>
    %93 = vector.extract_strided_slice %87 {offsets = [0, 80], sizes = [32, 16], strides = [1, 1]} : vector<32x96xf32> to vector<32x16xf32>
    %94 = vector.extract_strided_slice %91 {offsets = [0, 0], sizes = [16, 64], strides = [1, 1]} : vector<32x64xf32> to vector<16x64xf32>
    %95 = vector.extract_strided_slice %91 {offsets = [16, 0], sizes = [16, 64], strides = [1, 1]} : vector<32x64xf32> to vector<16x64xf32>
    %96 = tpu.concatenate %94, %95 in 1 : vector<16x64xf32>, vector<16x64xf32> -> vector<16x128xf32>
    %cst_37 = arith.constant 2.000000e+01 : f32
    %97 = vector.broadcast %cst_37 : f32 to vector<16x128xf32>
    %98 = arith.cmpf ogt, %96, %97 : vector<16x128xf32>
    %cst_38 = arith.constant 2.000000e+01 : f32
    %99 = vector.broadcast %cst_38 : f32 to vector<16x128xf32>
    %100 = arith.minimumf %96, %99 : vector<16x128xf32>
    %101 = math.exp %100 : vector<16x128xf32>
    %cst_39 = arith.constant 1.000000e+00 : f32
    %102 = vector.broadcast %cst_39 : f32 to vector<16x128xf32>
    %103 = arith.addf %102, %101 : vector<16x128xf32>
    %104 = math.log %103 : vector<16x128xf32>
    %105 = arith.select %98, %96, %104 : vector<16x128xi1>, vector<16x128xf32>
    %c0_40 = arith.constant 0 : index
    %c0_41 = arith.constant 0 : index
    %c0_42 = arith.constant 0 : index
    %106 = vector.load %arg12[%c0_40, %c0_41, %c0_42] : memref<2x16x64xf32, #tpu.memory_space<vmem>>, vector<1x16x64xf32>
    %107 = vector.shape_cast %106 : vector<1x16x64xf32> to vector<16x64xf32>
    %108 = tpu.concatenate %107, %107 in 1 : vector<16x64xf32>, vector<16x64xf32> -> vector<16x128xf32>
    %109 = vector.shape_cast %108 : vector<16x128xf32> to vector<1x16x128xf32>
    %110 = vector.shape_cast %105 : vector<16x128xf32> to vector<16x1x128xf32>
    %111 = vector.broadcast %109 : vector<1x16x128xf32> to vector<16x16x128xf32>
    %112 = vector.broadcast %110 : vector<16x1x128xf32> to vector<16x16x128xf32>
    %113 = arith.mulf %111, %112 : vector<16x16x128xf32>
    %114 = math.exp %113 : vector<16x16x128xf32>
    %115 = arith.mulf %105, %81 : vector<16x128xf32>
    %116 = vector.extract_strided_slice %92 {offsets = [0, 0], sizes = [16, 16], strides = [1, 1]} : vector<32x16xf32> to vector<16x16xf32>
    %117 = vector.extract_strided_slice %93 {offsets = [0, 0], sizes = [16, 16], strides = [1, 1]} : vector<32x16xf32> to vector<16x16xf32>
    %118 = vector.shape_cast %116 : vector<16x16xf32> to vector<16x16x1xf32>
    %119 = vector.shape_cast %118 : vector<16x16x1xf32> to vector<16x16x1xf32>
    %120 = vector.broadcast %119 : vector<16x16x1xf32> to vector<16x16x64xf32>
    %121 = vector.shape_cast %117 : vector<16x16xf32> to vector<16x16x1xf32>
    %122 = vector.shape_cast %121 : vector<16x16x1xf32> to vector<16x16x1xf32>
    %123 = vector.broadcast %122 : vector<16x16x1xf32> to vector<16x16x64xf32>
    %124 = vector.extract_strided_slice %92 {offsets = [16, 0], sizes = [16, 16], strides = [1, 1]} : vector<32x16xf32> to vector<16x16xf32>
    %125 = vector.extract_strided_slice %93 {offsets = [16, 0], sizes = [16, 16], strides = [1, 1]} : vector<32x16xf32> to vector<16x16xf32>
    %126 = vector.shape_cast %124 : vector<16x16xf32> to vector<16x16x1xf32>
    %127 = vector.shape_cast %126 : vector<16x16x1xf32> to vector<16x16x1xf32>
    %128 = vector.broadcast %127 : vector<16x16x1xf32> to vector<16x16x64xf32>
    %129 = vector.shape_cast %125 : vector<16x16xf32> to vector<16x16x1xf32>
    %130 = vector.shape_cast %129 : vector<16x16x1xf32> to vector<16x16x1xf32>
    %131 = vector.broadcast %130 : vector<16x16x1xf32> to vector<16x16x64xf32>
    %132 = tpu.concatenate %120, %128 in 2 : vector<16x16x64xf32>, vector<16x16x64xf32> -> vector<16x16x128xf32>
    %133 = tpu.concatenate %123, %131 in 2 : vector<16x16x64xf32>, vector<16x16x64xf32> -> vector<16x16x128xf32>
    %134 = vector.shape_cast %115 : vector<16x128xf32> to vector<16x1x128xf32>
    %135 = vector.broadcast %134 : vector<16x1x128xf32> to vector<16x16x128xf32>
    %136 = arith.mulf %132, %135 : vector<16x16x128xf32>
    %cst_43 = arith.constant 0.000000e+00 : f32
    %137 = vector.broadcast %cst_43 : f32 to vector<16x128xf32>
    %138 = vector.extract_strided_slice %114 {offsets = [0, 0, 0], sizes = [1, 16, 128], strides = [1, 1, 1]} : vector<16x16x128xf32> to vector<1x16x128xf32>
    %139 = vector.shape_cast %138 : vector<1x16x128xf32> to vector<16x128xf32>
    %140 = arith.mulf %139, %137 : vector<16x128xf32>
    %141 = vector.extract_strided_slice %136 {offsets = [0, 0, 0], sizes = [1, 16, 128], strides = [1, 1, 1]} : vector<16x16x128xf32> to vector<1x16x128xf32>
    %142 = vector.shape_cast %141 : vector<1x16x128xf32> to vector<16x128xf32>
    %143 = arith.addf %140, %142 : vector<16x128xf32>
    %144 = vector.extract_strided_slice %133 {offsets = [0, 0, 0], sizes = [1, 16, 128], strides = [1, 1, 1]} : vector<16x16x128xf32> to vector<1x16x128xf32>
    %145 = vector.shape_cast %144 : vector<1x16x128xf32> to vector<16x128xf32>
    %146 = arith.mulf %143, %145 : vector<16x128xf32>
    %cst_44 = arith.constant dense<0.000000e+00> : vector<128xf32>
    %147 = vector.multi_reduction <add>, %146, %cst_44 [0] : vector<16x128xf32> to vector<128xf32>
    %148 = vector.shape_cast %147 : vector<128xf32> to vector<1x128xf32>
    %149 = vector.extract_strided_slice %114 {offsets = [1, 0, 0], sizes = [1, 16, 128], strides = [1, 1, 1]} : vector<16x16x128xf32> to vector<1x16x128xf32>
    %150 = vector.shape_cast %149 : vector<1x16x128xf32> to vector<16x128xf32>
    %151 = arith.mulf %150, %143 : vector<16x128xf32>
    %152 = vector.extract_strided_slice %136 {offsets = [1, 0, 0], sizes = [1, 16, 128], strides = [1, 1, 1]} : vector<16x16x128xf32> to vector<1x16x128xf32>
    %153 = vector.shape_cast %152 : vector<1x16x128xf32> to vector<16x128xf32>
    %154 = arith.addf %151, %153 : vector<16x128xf32>
    %155 = vector.extract_strided_slice %133 {offsets = [1, 0, 0], sizes = [1, 16, 128], strides = [1, 1, 1]} : vector<16x16x128xf32> to vector<1x16x128xf32>
    %156 = vector.shape_cast %155 : vector<1x16x128xf32> to vector<16x128xf32>
    %157 = arith.mulf %154, %156 : vector<16x128xf32>
    %cst_45 = arith.constant dense<0.000000e+00> : vector<128xf32>
    %158 = vector.multi_reduction <add>, %157, %cst_45 [0] : vector<16x128xf32> to vector<128xf32>
    %159 = vector.shape_cast %158 : vector<128xf32> to vector<1x128xf32>
    %160 = vector.extract_strided_slice %114 {offsets = [2, 0, 0], sizes = [1, 16, 128], strides = [1, 1, 1]} : vector<16x16x128xf32> to vector<1x16x128xf32>
    %161 = vector.shape_cast %160 : vector<1x16x128xf32> to vector<16x128xf32>
    %162 = arith.mulf %161, %154 : vector<16x128xf32>
    %163 = vector.extract_strided_slice %136 {offsets = [2, 0, 0], sizes = [1, 16, 128], strides = [1, 1, 1]} : vector<16x16x128xf32> to vector<1x16x128xf32>
    %164 = vector.shape_cast %163 : vector<1x16x128xf32> to vector<16x128xf32>
    %165 = arith.addf %162, %164 : vector<16x128xf32>
    %166 = vector.extract_strided_slice %133 {offsets = [2, 0, 0], sizes = [1, 16, 128], strides = [1, 1, 1]} : vector<16x16x128xf32> to vector<1x16x128xf32>
    %167 = vector.shape_cast %166 : vector<1x16x128xf32> to vector<16x128xf32>
    %168 = arith.mulf %165, %167 : vector<16x128xf32>
    %cst_46 = arith.constant dense<0.000000e+00> : vector<128xf32>
    %169 = vector.multi_reduction <add>, %168, %cst_46 [0] : vector<16x128xf32> to vector<128xf32>
    %170 = vector.shape_cast %169 : vector<128xf32> to vector<1x128xf32>
    %171 = vector.extract_strided_slice %114 {offsets = [3, 0, 0], sizes = [1, 16, 128], strides = [1, 1, 1]} : vector<16x16x128xf32> to vector<1x16x128xf32>
    %172 = vector.shape_cast %171 : vector<1x16x128xf32> to vector<16x128xf32>
    %173 = arith.mulf %172, %165 : vector<16x128xf32>
    %174 = vector.extract_strided_slice %136 {offsets = [3, 0, 0], sizes = [1, 16, 128], strides = [1, 1, 1]} : vector<16x16x128xf32> to vector<1x16x128xf32>
    %175 = vector.shape_cast %174 : vector<1x16x128xf32> to vector<16x128xf32>
    %176 = arith.addf %173, %175 : vector<16x128xf32>
    %177 = vector.extract_strided_slice %133 {offsets = [3, 0, 0], sizes = [1, 16, 128], strides = [1, 1, 1]} : vector<16x16x128xf32> to vector<1x16x128xf32>
    %178 = vector.shape_cast %177 : vector<1x16x128xf32> to vector<16x128xf32>
    %179 = arith.mulf %176, %178 : vector<16x128xf32>
    %cst_47 = arith.constant dense<0.000000e+00> : vector<128xf32>
    %180 = vector.multi_reduction <add>, %179, %cst_47 [0] : vector<16x128xf32> to vector<128xf32>
    %181 = vector.shape_cast %180 : vector<128xf32> to vector<1x128xf32>
    %182 = vector.extract_strided_slice %114 {offsets = [4, 0, 0], sizes = [1, 16, 128], strides = [1, 1, 1]} : vector<16x16x128xf32> to vector<1x16x128xf32>
    %183 = vector.shape_cast %182 : vector<1x16x128xf32> to vector<16x128xf32>
    %184 = arith.mulf %183, %176 : vector<16x128xf32>
    %185 = vector.extract_strided_slice %136 {offsets = [4, 0, 0], sizes = [1, 16, 128], strides = [1, 1, 1]} : vector<16x16x128xf32> to vector<1x16x128xf32>
    %186 = vector.shape_cast %185 : vector<1x16x128xf32> to vector<16x128xf32>
    %187 = arith.addf %184, %186 : vector<16x128xf32>
    %188 = vector.extract_strided_slice %133 {offsets = [4, 0, 0], sizes = [1, 16, 128], strides = [1, 1, 1]} : vector<16x16x128xf32> to vector<1x16x128xf32>
    %189 = vector.shape_cast %188 : vector<1x16x128xf32> to vector<16x128xf32>
    %190 = arith.mulf %187, %189 : vector<16x128xf32>
    %cst_48 = arith.constant dense<0.000000e+00> : vector<128xf32>
    %191 = vector.multi_reduction <add>, %190, %cst_48 [0] : vector<16x128xf32> to vector<128xf32>
    %192 = vector.shape_cast %191 : vector<128xf32> to vector<1x128xf32>
    %193 = vector.extract_strided_slice %114 {offsets = [5, 0, 0], sizes = [1, 16, 128], strides = [1, 1, 1]} : vector<16x16x128xf32> to vector<1x16x128xf32>
    %194 = vector.shape_cast %193 : vector<1x16x128xf32> to vector<16x128xf32>
    %195 = arith.mulf %194, %187 : vector<16x128xf32>
    %196 = vector.extract_strided_slice %136 {offsets = [5, 0, 0], sizes = [1, 16, 128], strides = [1, 1, 1]} : vector<16x16x128xf32> to vector<1x16x128xf32>
    %197 = vector.shape_cast %196 : vector<1x16x128xf32> to vector<16x128xf32>
    %198 = arith.addf %195, %197 : vector<16x128xf32>
    %199 = vector.extract_strided_slice %133 {offsets = [5, 0, 0], sizes = [1, 16, 128], strides = [1, 1, 1]} : vector<16x16x128xf32> to vector<1x16x128xf32>
    %200 = vector.shape_cast %199 : vector<1x16x128xf32> to vector<16x128xf32>
    %201 = arith.mulf %198, %200 : vector<16x128xf32>
    %cst_49 = arith.constant dense<0.000000e+00> : vector<128xf32>
    %202 = vector.multi_reduction <add>, %201, %cst_49 [0] : vector<16x128xf32> to vector<128xf32>
    %203 = vector.shape_cast %202 : vector<128xf32> to vector<1x128xf32>
    %204 = vector.extract_strided_slice %114 {offsets = [6, 0, 0], sizes = [1, 16, 128], strides = [1, 1, 1]} : vector<16x16x128xf32> to vector<1x16x128xf32>
    %205 = vector.shape_cast %204 : vector<1x16x128xf32> to vector<16x128xf32>
    %206 = arith.mulf %205, %198 : vector<16x128xf32>
    %207 = vector.extract_strided_slice %136 {offsets = [6, 0, 0], sizes = [1, 16, 128], strides = [1, 1, 1]} : vector<16x16x128xf32> to vector<1x16x128xf32>
    %208 = vector.shape_cast %207 : vector<1x16x128xf32> to vector<16x128xf32>
    %209 = arith.addf %206, %208 : vector<16x128xf32>
    %210 = vector.extract_strided_slice %133 {offsets = [6, 0, 0], sizes = [1, 16, 128], strides = [1, 1, 1]} : vector<16x16x128xf32> to vector<1x16x128xf32>
    %211 = vector.shape_cast %210 : vector<1x16x128xf32> to vector<16x128xf32>
    %212 = arith.mulf %209, %211 : vector<16x128xf32>
    %cst_50 = arith.constant dense<0.000000e+00> : vector<128xf32>
    %213 = vector.multi_reduction <add>, %212, %cst_50 [0] : vector<16x128xf32> to vector<128xf32>
    %214 = vector.shape_cast %213 : vector<128xf32> to vector<1x128xf32>
    %215 = vector.extract_strided_slice %114 {offsets = [7, 0, 0], sizes = [1, 16, 128], strides = [1, 1, 1]} : vector<16x16x128xf32> to vector<1x16x128xf32>
    %216 = vector.shape_cast %215 : vector<1x16x128xf32> to vector<16x128xf32>
    %217 = arith.mulf %216, %209 : vector<16x128xf32>
    %218 = vector.extract_strided_slice %136 {offsets = [7, 0, 0], sizes = [1, 16, 128], strides = [1, 1, 1]} : vector<16x16x128xf32> to vector<1x16x128xf32>
    %219 = vector.shape_cast %218 : vector<1x16x128xf32> to vector<16x128xf32>
    %220 = arith.addf %217, %219 : vector<16x128xf32>
    %221 = vector.extract_strided_slice %133 {offsets = [7, 0, 0], sizes = [1, 16, 128], strides = [1, 1, 1]} : vector<16x16x128xf32> to vector<1x16x128xf32>
    %222 = vector.shape_cast %221 : vector<1x16x128xf32> to vector<16x128xf32>
    %223 = arith.mulf %220, %222 : vector<16x128xf32>
    %cst_51 = arith.constant dense<0.000000e+00> : vector<128xf32>
    %224 = vector.multi_reduction <add>, %223, %cst_51 [0] : vector<16x128xf32> to vector<128xf32>
    %225 = vector.shape_cast %224 : vector<128xf32> to vector<1x128xf32>
    %226 = vector.extract_strided_slice %114 {offsets = [8, 0, 0], sizes = [1, 16, 128], strides = [1, 1, 1]} : vector<16x16x128xf32> to vector<1x16x128xf32>
    %227 = vector.shape_cast %226 : vector<1x16x128xf32> to vector<16x128xf32>
    %228 = arith.mulf %227, %220 : vector<16x128xf32>
    %229 = vector.extract_strided_slice %136 {offsets = [8, 0, 0], sizes = [1, 16, 128], strides = [1, 1, 1]} : vector<16x16x128xf32> to vector<1x16x128xf32>
    %230 = vector.shape_cast %229 : vector<1x16x128xf32> to vector<16x128xf32>
    %231 = arith.addf %228, %230 : vector<16x128xf32>
    %232 = vector.extract_strided_slice %133 {offsets = [8, 0, 0], sizes = [1, 16, 128], strides = [1, 1, 1]} : vector<16x16x128xf32> to vector<1x16x128xf32>
    %233 = vector.shape_cast %232 : vector<1x16x128xf32> to vector<16x128xf32>
    %234 = arith.mulf %231, %233 : vector<16x128xf32>
    %cst_52 = arith.constant dense<0.000000e+00> : vector<128xf32>
    %235 = vector.multi_reduction <add>, %234, %cst_52 [0] : vector<16x128xf32> to vector<128xf32>
    %236 = vector.shape_cast %235 : vector<128xf32> to vector<1x128xf32>
    %237 = vector.extract_strided_slice %114 {offsets = [9, 0, 0], sizes = [1, 16, 128], strides = [1, 1, 1]} : vector<16x16x128xf32> to vector<1x16x128xf32>
    %238 = vector.shape_cast %237 : vector<1x16x128xf32> to vector<16x128xf32>
    %239 = arith.mulf %238, %231 : vector<16x128xf32>
    %240 = vector.extract_strided_slice %136 {offsets = [9, 0, 0], sizes = [1, 16, 128], strides = [1, 1, 1]} : vector<16x16x128xf32> to vector<1x16x128xf32>
    %241 = vector.shape_cast %240 : vector<1x16x128xf32> to vector<16x128xf32>
    %242 = arith.addf %239, %241 : vector<16x128xf32>
    %243 = vector.extract_strided_slice %133 {offsets = [9, 0, 0], sizes = [1, 16, 128], strides = [1, 1, 1]} : vector<16x16x128xf32> to vector<1x16x128xf32>
    %244 = vector.shape_cast %243 : vector<1x16x128xf32> to vector<16x128xf32>
    %245 = arith.mulf %242, %244 : vector<16x128xf32>
    %cst_53 = arith.constant dense<0.000000e+00> : vector<128xf32>
    %246 = vector.multi_reduction <add>, %245, %cst_53 [0] : vector<16x128xf32> to vector<128xf32>
    %247 = vector.shape_cast %246 : vector<128xf32> to vector<1x128xf32>
    %248 = vector.extract_strided_slice %114 {offsets = [10, 0, 0], sizes = [1, 16, 128], strides = [1, 1, 1]} : vector<16x16x128xf32> to vector<1x16x128xf32>
    %249 = vector.shape_cast %248 : vector<1x16x128xf32> to vector<16x128xf32>
    %250 = arith.mulf %249, %242 : vector<16x128xf32>
    %251 = vector.extract_strided_slice %136 {offsets = [10, 0, 0], sizes = [1, 16, 128], strides = [1, 1, 1]} : vector<16x16x128xf32> to vector<1x16x128xf32>
    %252 = vector.shape_cast %251 : vector<1x16x128xf32> to vector<16x128xf32>
    %253 = arith.addf %250, %252 : vector<16x128xf32>
    %254 = vector.extract_strided_slice %133 {offsets = [10, 0, 0], sizes = [1, 16, 128], strides = [1, 1, 1]} : vector<16x16x128xf32> to vector<1x16x128xf32>
    %255 = vector.shape_cast %254 : vector<1x16x128xf32> to vector<16x128xf32>
    %256 = arith.mulf %253, %255 : vector<16x128xf32>
    %cst_54 = arith.constant dense<0.000000e+00> : vector<128xf32>
    %257 = vector.multi_reduction <add>, %256, %cst_54 [0] : vector<16x128xf32> to vector<128xf32>
    %258 = vector.shape_cast %257 : vector<128xf32> to vector<1x128xf32>
    %259 = vector.extract_strided_slice %114 {offsets = [11, 0, 0], sizes = [1, 16, 128], strides = [1, 1, 1]} : vector<16x16x128xf32> to vector<1x16x128xf32>
    %260 = vector.shape_cast %259 : vector<1x16x128xf32> to vector<16x128xf32>
    %261 = arith.mulf %260, %253 : vector<16x128xf32>
    %262 = vector.extract_strided_slice %136 {offsets = [11, 0, 0], sizes = [1, 16, 128], strides = [1, 1, 1]} : vector<16x16x128xf32> to vector<1x16x128xf32>
    %263 = vector.shape_cast %262 : vector<1x16x128xf32> to vector<16x128xf32>
    %264 = arith.addf %261, %263 : vector<16x128xf32>
    %265 = vector.extract_strided_slice %133 {offsets = [11, 0, 0], sizes = [1, 16, 128], strides = [1, 1, 1]} : vector<16x16x128xf32> to vector<1x16x128xf32>
    %266 = vector.shape_cast %265 : vector<1x16x128xf32> to vector<16x128xf32>
    %267 = arith.mulf %264, %266 : vector<16x128xf32>
    %cst_55 = arith.constant dense<0.000000e+00> : vector<128xf32>
    %268 = vector.multi_reduction <add>, %267, %cst_55 [0] : vector<16x128xf32> to vector<128xf32>
    %269 = vector.shape_cast %268 : vector<128xf32> to vector<1x128xf32>
    %270 = vector.extract_strided_slice %114 {offsets = [12, 0, 0], sizes = [1, 16, 128], strides = [1, 1, 1]} : vector<16x16x128xf32> to vector<1x16x128xf32>
    %271 = vector.shape_cast %270 : vector<1x16x128xf32> to vector<16x128xf32>
    %272 = arith.mulf %271, %264 : vector<16x128xf32>
    %273 = vector.extract_strided_slice %136 {offsets = [12, 0, 0], sizes = [1, 16, 128], strides = [1, 1, 1]} : vector<16x16x128xf32> to vector<1x16x128xf32>
    %274 = vector.shape_cast %273 : vector<1x16x128xf32> to vector<16x128xf32>
    %275 = arith.addf %272, %274 : vector<16x128xf32>
    %276 = vector.extract_strided_slice %133 {offsets = [12, 0, 0], sizes = [1, 16, 128], strides = [1, 1, 1]} : vector<16x16x128xf32> to vector<1x16x128xf32>
    %277 = vector.shape_cast %276 : vector<1x16x128xf32> to vector<16x128xf32>
    %278 = arith.mulf %275, %277 : vector<16x128xf32>
    %cst_56 = arith.constant dense<0.000000e+00> : vector<128xf32>
    %279 = vector.multi_reduction <add>, %278, %cst_56 [0] : vector<16x128xf32> to vector<128xf32>
    %280 = vector.shape_cast %279 : vector<128xf32> to vector<1x128xf32>
    %281 = vector.extract_strided_slice %114 {offsets = [13, 0, 0], sizes = [1, 16, 128], strides = [1, 1, 1]} : vector<16x16x128xf32> to vector<1x16x128xf32>
    %282 = vector.shape_cast %281 : vector<1x16x128xf32> to vector<16x128xf32>
    %283 = arith.mulf %282, %275 : vector<16x128xf32>
    %284 = vector.extract_strided_slice %136 {offsets = [13, 0, 0], sizes = [1, 16, 128], strides = [1, 1, 1]} : vector<16x16x128xf32> to vector<1x16x128xf32>
    %285 = vector.shape_cast %284 : vector<1x16x128xf32> to vector<16x128xf32>
    %286 = arith.addf %283, %285 : vector<16x128xf32>
    %287 = vector.extract_strided_slice %133 {offsets = [13, 0, 0], sizes = [1, 16, 128], strides = [1, 1, 1]} : vector<16x16x128xf32> to vector<1x16x128xf32>
    %288 = vector.shape_cast %287 : vector<1x16x128xf32> to vector<16x128xf32>
    %289 = arith.mulf %286, %288 : vector<16x128xf32>
    %cst_57 = arith.constant dense<0.000000e+00> : vector<128xf32>
    %290 = vector.multi_reduction <add>, %289, %cst_57 [0] : vector<16x128xf32> to vector<128xf32>
    %291 = vector.shape_cast %290 : vector<128xf32> to vector<1x128xf32>
    %292 = vector.extract_strided_slice %114 {offsets = [14, 0, 0], sizes = [1, 16, 128], strides = [1, 1, 1]} : vector<16x16x128xf32> to vector<1x16x128xf32>
    %293 = vector.shape_cast %292 : vector<1x16x128xf32> to vector<16x128xf32>
    %294 = arith.mulf %293, %286 : vector<16x128xf32>
    %295 = vector.extract_strided_slice %136 {offsets = [14, 0, 0], sizes = [1, 16, 128], strides = [1, 1, 1]} : vector<16x16x128xf32> to vector<1x16x128xf32>
    %296 = vector.shape_cast %295 : vector<1x16x128xf32> to vector<16x128xf32>
    %297 = arith.addf %294, %296 : vector<16x128xf32>
    %298 = vector.extract_strided_slice %133 {offsets = [14, 0, 0], sizes = [1, 16, 128], strides = [1, 1, 1]} : vector<16x16x128xf32> to vector<1x16x128xf32>
    %299 = vector.shape_cast %298 : vector<1x16x128xf32> to vector<16x128xf32>
    %300 = arith.mulf %297, %299 : vector<16x128xf32>
    %cst_58 = arith.constant dense<0.000000e+00> : vector<128xf32>
    %301 = vector.multi_reduction <add>, %300, %cst_58 [0] : vector<16x128xf32> to vector<128xf32>
    %302 = vector.shape_cast %301 : vector<128xf32> to vector<1x128xf32>
    %303 = vector.extract_strided_slice %114 {offsets = [15, 0, 0], sizes = [1, 16, 128], strides = [1, 1, 1]} : vector<16x16x128xf32> to vector<1x16x128xf32>
    %304 = vector.shape_cast %303 : vector<1x16x128xf32> to vector<16x128xf32>
    %305 = arith.mulf %304, %297 : vector<16x128xf32>
    %306 = vector.extract_strided_slice %136 {offsets = [15, 0, 0], sizes = [1, 16, 128], strides = [1, 1, 1]} : vector<16x16x128xf32> to vector<1x16x128xf32>
    %307 = vector.shape_cast %306 : vector<1x16x128xf32> to vector<16x128xf32>
    %308 = arith.addf %305, %307 : vector<16x128xf32>
    %309 = vector.extract_strided_slice %133 {offsets = [15, 0, 0], sizes = [1, 16, 128], strides = [1, 1, 1]} : vector<16x16x128xf32> to vector<1x16x128xf32>
    %310 = vector.shape_cast %309 : vector<1x16x128xf32> to vector<16x128xf32>
    %311 = arith.mulf %308, %310 : vector<16x128xf32>
    %cst_59 = arith.constant dense<0.000000e+00> : vector<128xf32>
    %312 = vector.multi_reduction <add>, %311, %cst_59 [0] : vector<16x128xf32> to vector<128xf32>
    %313 = vector.shape_cast %312 : vector<128xf32> to vector<1x128xf32>
    %314 = tpu.concatenate %148, %159, %170, %181, %192, %203, %214, %225, %236, %247, %258, %269, %280, %291, %302, %313 in 0 : vector<1x128xf32>, vector<1x128xf32>, vector<1x128xf32>, vector<1x128xf32>, vector<1x128xf32>, vector<1x128xf32>, vector<1x128xf32>, vector<1x128xf32>, vector<1x128xf32>, vector<1x128xf32>, vector<1x128xf32>, vector<1x128xf32>, vector<1x128xf32>, vector<1x128xf32>, vector<1x128xf32>, vector<1x128xf32> -> vector<16x128xf32>
    %c0_60 = arith.constant 0 : index
    %c0_61 = arith.constant 0 : index
    %315 = vector.load %arg13[%c0_60, %c0_61] : memref<2x64xf32, #tpu.memory_space<vmem>>, vector<1x64xf32>
    %316 = tpu.concatenate %315, %315 in 1 : vector<1x64xf32>, vector<1x64xf32> -> vector<1x128xf32>
    %317 = vector.broadcast %316 : vector<1x128xf32> to vector<16x128xf32>
    %318 = arith.mulf %317, %81 : vector<16x128xf32>
    %319 = arith.addf %314, %318 : vector<16x128xf32>
    %cst_62 = arith.constant 0.000000e+00 : f32
    %320 = vector.broadcast %cst_62 : f32 to vector<16x128xf32>
    %321 = arith.subf %320, %40 : vector<16x128xf32>
    %322 = math.exp %321 : vector<16x128xf32>
    %cst_63 = arith.constant 1.000000e+00 : f32
    %323 = vector.broadcast %cst_63 : f32 to vector<16x128xf32>
    %324 = arith.addf %323, %322 : vector<16x128xf32>
    %cst_64 = arith.constant 1.000000e+00 : f32
    %325 = vector.broadcast %cst_64 : f32 to vector<16x128xf32>
    %326 = arith.divf %325, %324 : vector<16x128xf32>
    %327 = arith.mulf %40, %326 : vector<16x128xf32>
    %328 = arith.mulf %319, %327 : vector<16x128xf32>
    %329 = vector.extract_strided_slice %328 {offsets = [0, 0], sizes = [16, 64], strides = [1, 1]} : vector<16x128xf32> to vector<16x64xf32>
    %330 = vector.extract_strided_slice %328 {offsets = [0, 64], sizes = [16, 64], strides = [1, 1]} : vector<16x128xf32> to vector<16x64xf32>
    %331 = tpu.concatenate %329, %330 in 0 : vector<16x64xf32>, vector<16x64xf32> -> vector<32x64xf32>
    %c0_65 = arith.constant 0 : index
    %c0_66 = arith.constant 0 : index
    %c0_67 = arith.constant 0 : index
    %332 = vector.load %arg11[%c0_65, %c0_66, %c0_67] : memref<2x64x32xf32, #tpu.memory_space<vmem>>, vector<1x64x32xf32>
    %333 = vector.shape_cast %332 : vector<1x64x32xf32> to vector<64x32xf32>
    %cst_68 = arith.constant dense<0.000000e+00> : vector<32x32xf32>
    %334 = tpu.matmul %331, %333, %cst_68 {dimension_numbers = #tpu.dot_dimension_numbers<[1], [0], [0], [1], [0, 0, 1, 1], [], []>} : vector<32x64xf32>, vector<64x32xf32>, vector<32x32xf32> -> vector<32x32xf32>
    %335 = arith.addf %334, %7 : vector<32x32xf32>
    %c1 = arith.constant 1 : index
    %c0_69 = arith.constant 0 : index
    %336 = vector.load %arg4[%c1, %c0_69] : memref<2x32xf32, #tpu.memory_space<vmem>>, vector<1x32xf32>
    %c1_70 = arith.constant 1 : index
    %c0_71 = arith.constant 0 : index
    %337 = vector.load %arg5[%c1_70, %c0_71] : memref<2x32xf32, #tpu.memory_space<vmem>>, vector<1x32xf32>
    %cst_72 = arith.constant dense<0.000000e+00> : vector<32xf32>
    %338 = vector.multi_reduction <add>, %335, %cst_72 [1] : vector<32x32xf32> to vector<32xf32>
    %339 = vector.shape_cast %338 : vector<32xf32> to vector<32x1xf32>
    %cst_73 = arith.constant 3.200000e+01 : f32
    %340 = vector.broadcast %cst_73 : f32 to vector<32x1xf32>
    %341 = arith.divf %339, %340 : vector<32x1xf32>
    %342 = vector.broadcast %341 : vector<32x1xf32> to vector<32x32xf32>
    %343 = arith.subf %335, %342 : vector<32x32xf32>
    %344 = arith.mulf %343, %343 : vector<32x32xf32>
    %cst_74 = arith.constant dense<0.000000e+00> : vector<32xf32>
    %345 = vector.multi_reduction <add>, %344, %cst_74 [1] : vector<32x32xf32> to vector<32xf32>
    %346 = vector.shape_cast %345 : vector<32xf32> to vector<32x1xf32>
    %cst_75 = arith.constant 3.200000e+01 : f32
    %347 = vector.broadcast %cst_75 : f32 to vector<32x1xf32>
    %348 = arith.divf %346, %347 : vector<32x1xf32>
    %cst_76 = arith.constant 9.99999974E-6 : f32
    %349 = vector.broadcast %cst_76 : f32 to vector<32x1xf32>
    %350 = arith.addf %348, %349 : vector<32x1xf32>
    %351 = math.rsqrt %350 : vector<32x1xf32>
    %352 = vector.broadcast %351 : vector<32x1xf32> to vector<32x32xf32>
    %353 = arith.mulf %343, %352 : vector<32x32xf32>
    %354 = vector.broadcast %336 : vector<1x32xf32> to vector<32x32xf32>
    %355 = arith.mulf %353, %354 : vector<32x32xf32>
    %356 = vector.broadcast %337 : vector<1x32xf32> to vector<32x32xf32>
    %357 = arith.addf %355, %356 : vector<32x32xf32>
    %c1_77 = arith.constant 1 : index
    %c0_78 = arith.constant 0 : index
    %c0_79 = arith.constant 0 : index
    %358 = vector.load %arg6[%c1_77, %c0_78, %c0_79] : memref<2x32x128xf32, #tpu.memory_space<vmem>>, vector<1x32x128xf32>
    %359 = vector.shape_cast %358 : vector<1x32x128xf32> to vector<32x128xf32>
    %cst_80 = arith.constant dense<0.000000e+00> : vector<32x128xf32>
    %360 = tpu.matmul %357, %359, %cst_80 {dimension_numbers = #tpu.dot_dimension_numbers<[1], [0], [0], [1], [0, 0, 1, 1], [], []>} : vector<32x32xf32>, vector<32x128xf32>, vector<32x128xf32> -> vector<32x128xf32>
    %361 = vector.extract_strided_slice %360 {offsets = [0, 0], sizes = [32, 64], strides = [1, 1]} : vector<32x128xf32> to vector<32x64xf32>
    %362 = vector.extract_strided_slice %360 {offsets = [0, 64], sizes = [32, 64], strides = [1, 1]} : vector<32x128xf32> to vector<32x64xf32>
    %363 = vector.extract_strided_slice %361 {offsets = [0, 0], sizes = [16, 64], strides = [1, 1]} : vector<32x64xf32> to vector<16x64xf32>
    %364 = vector.extract_strided_slice %361 {offsets = [16, 0], sizes = [16, 64], strides = [1, 1]} : vector<32x64xf32> to vector<16x64xf32>
    %365 = tpu.concatenate %363, %364 in 1 : vector<16x64xf32>, vector<16x64xf32> -> vector<16x128xf32>
    %366 = vector.extract_strided_slice %362 {offsets = [0, 0], sizes = [16, 64], strides = [1, 1]} : vector<32x64xf32> to vector<16x64xf32>
    %367 = vector.extract_strided_slice %362 {offsets = [16, 0], sizes = [16, 64], strides = [1, 1]} : vector<32x64xf32> to vector<16x64xf32>
    %368 = tpu.concatenate %366, %367 in 1 : vector<16x64xf32>, vector<16x64xf32> -> vector<16x128xf32>
    %c1_81 = arith.constant 1 : index
    %c0_82 = arith.constant 0 : index
    %c0_83 = arith.constant 0 : index
    %369 = vector.load %arg7[%c1_81, %c0_82, %c0_83] : memref<2x4x64xf32, #tpu.memory_space<vmem>>, vector<1x4x64xf32>
    %370 = vector.shape_cast %369 : vector<1x4x64xf32> to vector<4x64xf32>
    %371 = tpu.concatenate %370, %370 in 1 : vector<4x64xf32>, vector<4x64xf32> -> vector<4x128xf32>
    %c1_84 = arith.constant 1 : index
    %c0_85 = arith.constant 0 : index
    %372 = vector.load %arg8[%c1_84, %c0_85] : memref<2x64xf32, #tpu.memory_space<vmem>>, vector<1x64xf32>
    %373 = tpu.concatenate %372, %372 in 1 : vector<1x64xf32>, vector<1x64xf32> -> vector<1x128xf32>
    %cst_86 = arith.constant 0.000000e+00 : f32
    %374 = vector.broadcast %cst_86 : f32 to vector<16x128xf32>
    %375 = vector.broadcast %373 : vector<1x128xf32> to vector<16x128xf32>
    %376 = arith.addf %374, %375 : vector<16x128xf32>
    %377 = vector.extract_strided_slice %371 {offsets = [0, 0], sizes = [1, 128], strides = [1, 1]} : vector<4x128xf32> to vector<1x128xf32>
    %cst_87 = arith.constant 0.000000e+00 : f32
    %378 = vector.broadcast %cst_87 : f32 to vector<3x128xf32>
    %379 = vector.extract_strided_slice %365 {offsets = [0, 0], sizes = [13, 128], strides = [1, 1]} : vector<16x128xf32> to vector<13x128xf32>
    %380 = tpu.concatenate %378, %379 in 0 : vector<3x128xf32>, vector<13x128xf32> -> vector<16x128xf32>
    %381 = vector.broadcast %377 : vector<1x128xf32> to vector<16x128xf32>
    %382 = arith.mulf %380, %381 : vector<16x128xf32>
    %383 = arith.addf %376, %382 : vector<16x128xf32>
    %384 = vector.extract_strided_slice %371 {offsets = [1, 0], sizes = [1, 128], strides = [1, 1]} : vector<4x128xf32> to vector<1x128xf32>
    %cst_88 = arith.constant 0.000000e+00 : f32
    %385 = vector.broadcast %cst_88 : f32 to vector<2x128xf32>
    %386 = vector.extract_strided_slice %365 {offsets = [0, 0], sizes = [14, 128], strides = [1, 1]} : vector<16x128xf32> to vector<14x128xf32>
    %387 = tpu.concatenate %385, %386 in 0 : vector<2x128xf32>, vector<14x128xf32> -> vector<16x128xf32>
    %388 = vector.broadcast %384 : vector<1x128xf32> to vector<16x128xf32>
    %389 = arith.mulf %387, %388 : vector<16x128xf32>
    %390 = arith.addf %383, %389 : vector<16x128xf32>
    %391 = vector.extract_strided_slice %371 {offsets = [2, 0], sizes = [1, 128], strides = [1, 1]} : vector<4x128xf32> to vector<1x128xf32>
    %cst_89 = arith.constant 0.000000e+00 : f32
    %392 = vector.broadcast %cst_89 : f32 to vector<1x128xf32>
    %393 = vector.extract_strided_slice %365 {offsets = [0, 0], sizes = [15, 128], strides = [1, 1]} : vector<16x128xf32> to vector<15x128xf32>
    %394 = tpu.concatenate %392, %393 in 0 : vector<1x128xf32>, vector<15x128xf32> -> vector<16x128xf32>
    %395 = vector.broadcast %391 : vector<1x128xf32> to vector<16x128xf32>
    %396 = arith.mulf %394, %395 : vector<16x128xf32>
    %397 = arith.addf %390, %396 : vector<16x128xf32>
    %398 = vector.extract_strided_slice %371 {offsets = [3, 0], sizes = [1, 128], strides = [1, 1]} : vector<4x128xf32> to vector<1x128xf32>
    %399 = vector.broadcast %398 : vector<1x128xf32> to vector<16x128xf32>
    %400 = arith.mulf %365, %399 : vector<16x128xf32>
    %401 = arith.addf %397, %400 : vector<16x128xf32>
    %cst_90 = arith.constant 0.000000e+00 : f32
    %402 = vector.broadcast %cst_90 : f32 to vector<16x128xf32>
    %403 = arith.subf %402, %401 : vector<16x128xf32>
    %404 = math.exp %403 : vector<16x128xf32>
    %cst_91 = arith.constant 1.000000e+00 : f32
    %405 = vector.broadcast %cst_91 : f32 to vector<16x128xf32>
    %406 = arith.addf %405, %404 : vector<16x128xf32>
    %cst_92 = arith.constant 1.000000e+00 : f32
    %407 = vector.broadcast %cst_92 : f32 to vector<16x128xf32>
    %408 = arith.divf %407, %406 : vector<16x128xf32>
    %409 = arith.mulf %401, %408 : vector<16x128xf32>
    %410 = vector.extract_strided_slice %409 {offsets = [0, 0], sizes = [16, 64], strides = [1, 1]} : vector<16x128xf32> to vector<16x64xf32>
    %411 = vector.extract_strided_slice %409 {offsets = [0, 64], sizes = [16, 64], strides = [1, 1]} : vector<16x128xf32> to vector<16x64xf32>
    %412 = tpu.concatenate %410, %411 in 0 : vector<16x64xf32>, vector<16x64xf32> -> vector<32x64xf32>
    %c1_93 = arith.constant 1 : index
    %c0_94 = arith.constant 0 : index
    %c0_95 = arith.constant 0 : index
    %413 = vector.load %arg9[%c1_93, %c0_94, %c0_95] : memref<2x64x96xf32, #tpu.memory_space<vmem>>, vector<1x64x96xf32>
    %414 = vector.shape_cast %413 : vector<1x64x96xf32> to vector<64x96xf32>
    %cst_96 = arith.constant dense<0.000000e+00> : vector<32x96xf32>
    %415 = tpu.matmul %412, %414, %cst_96 {dimension_numbers = #tpu.dot_dimension_numbers<[1], [0], [0], [1], [0, 0, 1, 1], [], []>} : vector<32x64xf32>, vector<64x96xf32>, vector<32x96xf32> -> vector<32x96xf32>
    %416 = vector.extract_strided_slice %415 {offsets = [0, 0], sizes = [32, 64], strides = [1, 1]} : vector<32x96xf32> to vector<32x64xf32>
    %c1_97 = arith.constant 1 : index
    %c0_98 = arith.constant 0 : index
    %417 = vector.load %arg10[%c1_97, %c0_98] : memref<2x64xf32, #tpu.memory_space<vmem>>, vector<1x64xf32>
    %418 = vector.broadcast %417 : vector<1x64xf32> to vector<32x64xf32>
    %419 = arith.addf %416, %418 : vector<32x64xf32>
    %420 = vector.extract_strided_slice %415 {offsets = [0, 64], sizes = [32, 16], strides = [1, 1]} : vector<32x96xf32> to vector<32x16xf32>
    %421 = vector.extract_strided_slice %415 {offsets = [0, 80], sizes = [32, 16], strides = [1, 1]} : vector<32x96xf32> to vector<32x16xf32>
    %422 = vector.extract_strided_slice %419 {offsets = [0, 0], sizes = [16, 64], strides = [1, 1]} : vector<32x64xf32> to vector<16x64xf32>
    %423 = vector.extract_strided_slice %419 {offsets = [16, 0], sizes = [16, 64], strides = [1, 1]} : vector<32x64xf32> to vector<16x64xf32>
    %424 = tpu.concatenate %422, %423 in 1 : vector<16x64xf32>, vector<16x64xf32> -> vector<16x128xf32>
    %cst_99 = arith.constant 2.000000e+01 : f32
    %425 = vector.broadcast %cst_99 : f32 to vector<16x128xf32>
    %426 = arith.cmpf ogt, %424, %425 : vector<16x128xf32>
    %cst_100 = arith.constant 2.000000e+01 : f32
    %427 = vector.broadcast %cst_100 : f32 to vector<16x128xf32>
    %428 = arith.minimumf %424, %427 : vector<16x128xf32>
    %429 = math.exp %428 : vector<16x128xf32>
    %cst_101 = arith.constant 1.000000e+00 : f32
    %430 = vector.broadcast %cst_101 : f32 to vector<16x128xf32>
    %431 = arith.addf %430, %429 : vector<16x128xf32>
    %432 = math.log %431 : vector<16x128xf32>
    %433 = arith.select %426, %424, %432 : vector<16x128xi1>, vector<16x128xf32>
    %c1_102 = arith.constant 1 : index
    %c0_103 = arith.constant 0 : index
    %c0_104 = arith.constant 0 : index
    %434 = vector.load %arg12[%c1_102, %c0_103, %c0_104] : memref<2x16x64xf32, #tpu.memory_space<vmem>>, vector<1x16x64xf32>
    %435 = vector.shape_cast %434 : vector<1x16x64xf32> to vector<16x64xf32>
    %436 = tpu.concatenate %435, %435 in 1 : vector<16x64xf32>, vector<16x64xf32> -> vector<16x128xf32>
    %437 = vector.shape_cast %436 : vector<16x128xf32> to vector<1x16x128xf32>
    %438 = vector.shape_cast %433 : vector<16x128xf32> to vector<16x1x128xf32>
    %439 = vector.broadcast %437 : vector<1x16x128xf32> to vector<16x16x128xf32>
    %440 = vector.broadcast %438 : vector<16x1x128xf32> to vector<16x16x128xf32>
    %441 = arith.mulf %439, %440 : vector<16x16x128xf32>
    %442 = math.exp %441 : vector<16x16x128xf32>
    %443 = arith.mulf %433, %409 : vector<16x128xf32>
    %444 = vector.extract_strided_slice %420 {offsets = [0, 0], sizes = [16, 16], strides = [1, 1]} : vector<32x16xf32> to vector<16x16xf32>
    %445 = vector.extract_strided_slice %421 {offsets = [0, 0], sizes = [16, 16], strides = [1, 1]} : vector<32x16xf32> to vector<16x16xf32>
    %446 = vector.shape_cast %444 : vector<16x16xf32> to vector<16x16x1xf32>
    %447 = vector.shape_cast %446 : vector<16x16x1xf32> to vector<16x16x1xf32>
    %448 = vector.broadcast %447 : vector<16x16x1xf32> to vector<16x16x64xf32>
    %449 = vector.shape_cast %445 : vector<16x16xf32> to vector<16x16x1xf32>
    %450 = vector.shape_cast %449 : vector<16x16x1xf32> to vector<16x16x1xf32>
    %451 = vector.broadcast %450 : vector<16x16x1xf32> to vector<16x16x64xf32>
    %452 = vector.extract_strided_slice %420 {offsets = [16, 0], sizes = [16, 16], strides = [1, 1]} : vector<32x16xf32> to vector<16x16xf32>
    %453 = vector.extract_strided_slice %421 {offsets = [16, 0], sizes = [16, 16], strides = [1, 1]} : vector<32x16xf32> to vector<16x16xf32>
    %454 = vector.shape_cast %452 : vector<16x16xf32> to vector<16x16x1xf32>
    %455 = vector.shape_cast %454 : vector<16x16x1xf32> to vector<16x16x1xf32>
    %456 = vector.broadcast %455 : vector<16x16x1xf32> to vector<16x16x64xf32>
    %457 = vector.shape_cast %453 : vector<16x16xf32> to vector<16x16x1xf32>
    %458 = vector.shape_cast %457 : vector<16x16x1xf32> to vector<16x16x1xf32>
    %459 = vector.broadcast %458 : vector<16x16x1xf32> to vector<16x16x64xf32>
    %460 = tpu.concatenate %448, %456 in 2 : vector<16x16x64xf32>, vector<16x16x64xf32> -> vector<16x16x128xf32>
    %461 = tpu.concatenate %451, %459 in 2 : vector<16x16x64xf32>, vector<16x16x64xf32> -> vector<16x16x128xf32>
    %462 = vector.shape_cast %443 : vector<16x128xf32> to vector<16x1x128xf32>
    %463 = vector.broadcast %462 : vector<16x1x128xf32> to vector<16x16x128xf32>
    %464 = arith.mulf %460, %463 : vector<16x16x128xf32>
    %cst_105 = arith.constant 0.000000e+00 : f32
    %465 = vector.broadcast %cst_105 : f32 to vector<16x128xf32>
    %466 = vector.extract_strided_slice %442 {offsets = [0, 0, 0], sizes = [1, 16, 128], strides = [1, 1, 1]} : vector<16x16x128xf32> to vector<1x16x128xf32>
    %467 = vector.shape_cast %466 : vector<1x16x128xf32> to vector<16x128xf32>
    %468 = arith.mulf %467, %465 : vector<16x128xf32>
    %469 = vector.extract_strided_slice %464 {offsets = [0, 0, 0], sizes = [1, 16, 128], strides = [1, 1, 1]} : vector<16x16x128xf32> to vector<1x16x128xf32>
    %470 = vector.shape_cast %469 : vector<1x16x128xf32> to vector<16x128xf32>
    %471 = arith.addf %468, %470 : vector<16x128xf32>
    %472 = vector.extract_strided_slice %461 {offsets = [0, 0, 0], sizes = [1, 16, 128], strides = [1, 1, 1]} : vector<16x16x128xf32> to vector<1x16x128xf32>
    %473 = vector.shape_cast %472 : vector<1x16x128xf32> to vector<16x128xf32>
    %474 = arith.mulf %471, %473 : vector<16x128xf32>
    %cst_106 = arith.constant dense<0.000000e+00> : vector<128xf32>
    %475 = vector.multi_reduction <add>, %474, %cst_106 [0] : vector<16x128xf32> to vector<128xf32>
    %476 = vector.shape_cast %475 : vector<128xf32> to vector<1x128xf32>
    %477 = vector.extract_strided_slice %442 {offsets = [1, 0, 0], sizes = [1, 16, 128], strides = [1, 1, 1]} : vector<16x16x128xf32> to vector<1x16x128xf32>
    %478 = vector.shape_cast %477 : vector<1x16x128xf32> to vector<16x128xf32>
    %479 = arith.mulf %478, %471 : vector<16x128xf32>
    %480 = vector.extract_strided_slice %464 {offsets = [1, 0, 0], sizes = [1, 16, 128], strides = [1, 1, 1]} : vector<16x16x128xf32> to vector<1x16x128xf32>
    %481 = vector.shape_cast %480 : vector<1x16x128xf32> to vector<16x128xf32>
    %482 = arith.addf %479, %481 : vector<16x128xf32>
    %483 = vector.extract_strided_slice %461 {offsets = [1, 0, 0], sizes = [1, 16, 128], strides = [1, 1, 1]} : vector<16x16x128xf32> to vector<1x16x128xf32>
    %484 = vector.shape_cast %483 : vector<1x16x128xf32> to vector<16x128xf32>
    %485 = arith.mulf %482, %484 : vector<16x128xf32>
    %cst_107 = arith.constant dense<0.000000e+00> : vector<128xf32>
    %486 = vector.multi_reduction <add>, %485, %cst_107 [0] : vector<16x128xf32> to vector<128xf32>
    %487 = vector.shape_cast %486 : vector<128xf32> to vector<1x128xf32>
    %488 = vector.extract_strided_slice %442 {offsets = [2, 0, 0], sizes = [1, 16, 128], strides = [1, 1, 1]} : vector<16x16x128xf32> to vector<1x16x128xf32>
    %489 = vector.shape_cast %488 : vector<1x16x128xf32> to vector<16x128xf32>
    %490 = arith.mulf %489, %482 : vector<16x128xf32>
    %491 = vector.extract_strided_slice %464 {offsets = [2, 0, 0], sizes = [1, 16, 128], strides = [1, 1, 1]} : vector<16x16x128xf32> to vector<1x16x128xf32>
    %492 = vector.shape_cast %491 : vector<1x16x128xf32> to vector<16x128xf32>
    %493 = arith.addf %490, %492 : vector<16x128xf32>
    %494 = vector.extract_strided_slice %461 {offsets = [2, 0, 0], sizes = [1, 16, 128], strides = [1, 1, 1]} : vector<16x16x128xf32> to vector<1x16x128xf32>
    %495 = vector.shape_cast %494 : vector<1x16x128xf32> to vector<16x128xf32>
    %496 = arith.mulf %493, %495 : vector<16x128xf32>
    %cst_108 = arith.constant dense<0.000000e+00> : vector<128xf32>
    %497 = vector.multi_reduction <add>, %496, %cst_108 [0] : vector<16x128xf32> to vector<128xf32>
    %498 = vector.shape_cast %497 : vector<128xf32> to vector<1x128xf32>
    %499 = vector.extract_strided_slice %442 {offsets = [3, 0, 0], sizes = [1, 16, 128], strides = [1, 1, 1]} : vector<16x16x128xf32> to vector<1x16x128xf32>
    %500 = vector.shape_cast %499 : vector<1x16x128xf32> to vector<16x128xf32>
    %501 = arith.mulf %500, %493 : vector<16x128xf32>
    %502 = vector.extract_strided_slice %464 {offsets = [3, 0, 0], sizes = [1, 16, 128], strides = [1, 1, 1]} : vector<16x16x128xf32> to vector<1x16x128xf32>
    %503 = vector.shape_cast %502 : vector<1x16x128xf32> to vector<16x128xf32>
    %504 = arith.addf %501, %503 : vector<16x128xf32>
    %505 = vector.extract_strided_slice %461 {offsets = [3, 0, 0], sizes = [1, 16, 128], strides = [1, 1, 1]} : vector<16x16x128xf32> to vector<1x16x128xf32>
    %506 = vector.shape_cast %505 : vector<1x16x128xf32> to vector<16x128xf32>
    %507 = arith.mulf %504, %506 : vector<16x128xf32>
    %cst_109 = arith.constant dense<0.000000e+00> : vector<128xf32>
    %508 = vector.multi_reduction <add>, %507, %cst_109 [0] : vector<16x128xf32> to vector<128xf32>
    %509 = vector.shape_cast %508 : vector<128xf32> to vector<1x128xf32>
    %510 = vector.extract_strided_slice %442 {offsets = [4, 0, 0], sizes = [1, 16, 128], strides = [1, 1, 1]} : vector<16x16x128xf32> to vector<1x16x128xf32>
    %511 = vector.shape_cast %510 : vector<1x16x128xf32> to vector<16x128xf32>
    %512 = arith.mulf %511, %504 : vector<16x128xf32>
    %513 = vector.extract_strided_slice %464 {offsets = [4, 0, 0], sizes = [1, 16, 128], strides = [1, 1, 1]} : vector<16x16x128xf32> to vector<1x16x128xf32>
    %514 = vector.shape_cast %513 : vector<1x16x128xf32> to vector<16x128xf32>
    %515 = arith.addf %512, %514 : vector<16x128xf32>
    %516 = vector.extract_strided_slice %461 {offsets = [4, 0, 0], sizes = [1, 16, 128], strides = [1, 1, 1]} : vector<16x16x128xf32> to vector<1x16x128xf32>
    %517 = vector.shape_cast %516 : vector<1x16x128xf32> to vector<16x128xf32>
    %518 = arith.mulf %515, %517 : vector<16x128xf32>
    %cst_110 = arith.constant dense<0.000000e+00> : vector<128xf32>
    %519 = vector.multi_reduction <add>, %518, %cst_110 [0] : vector<16x128xf32> to vector<128xf32>
    %520 = vector.shape_cast %519 : vector<128xf32> to vector<1x128xf32>
    %521 = vector.extract_strided_slice %442 {offsets = [5, 0, 0], sizes = [1, 16, 128], strides = [1, 1, 1]} : vector<16x16x128xf32> to vector<1x16x128xf32>
    %522 = vector.shape_cast %521 : vector<1x16x128xf32> to vector<16x128xf32>
    %523 = arith.mulf %522, %515 : vector<16x128xf32>
    %524 = vector.extract_strided_slice %464 {offsets = [5, 0, 0], sizes = [1, 16, 128], strides = [1, 1, 1]} : vector<16x16x128xf32> to vector<1x16x128xf32>
    %525 = vector.shape_cast %524 : vector<1x16x128xf32> to vector<16x128xf32>
    %526 = arith.addf %523, %525 : vector<16x128xf32>
    %527 = vector.extract_strided_slice %461 {offsets = [5, 0, 0], sizes = [1, 16, 128], strides = [1, 1, 1]} : vector<16x16x128xf32> to vector<1x16x128xf32>
    %528 = vector.shape_cast %527 : vector<1x16x128xf32> to vector<16x128xf32>
    %529 = arith.mulf %526, %528 : vector<16x128xf32>
    %cst_111 = arith.constant dense<0.000000e+00> : vector<128xf32>
    %530 = vector.multi_reduction <add>, %529, %cst_111 [0] : vector<16x128xf32> to vector<128xf32>
    %531 = vector.shape_cast %530 : vector<128xf32> to vector<1x128xf32>
    %532 = vector.extract_strided_slice %442 {offsets = [6, 0, 0], sizes = [1, 16, 128], strides = [1, 1, 1]} : vector<16x16x128xf32> to vector<1x16x128xf32>
    %533 = vector.shape_cast %532 : vector<1x16x128xf32> to vector<16x128xf32>
    %534 = arith.mulf %533, %526 : vector<16x128xf32>
    %535 = vector.extract_strided_slice %464 {offsets = [6, 0, 0], sizes = [1, 16, 128], strides = [1, 1, 1]} : vector<16x16x128xf32> to vector<1x16x128xf32>
    %536 = vector.shape_cast %535 : vector<1x16x128xf32> to vector<16x128xf32>
    %537 = arith.addf %534, %536 : vector<16x128xf32>
    %538 = vector.extract_strided_slice %461 {offsets = [6, 0, 0], sizes = [1, 16, 128], strides = [1, 1, 1]} : vector<16x16x128xf32> to vector<1x16x128xf32>
    %539 = vector.shape_cast %538 : vector<1x16x128xf32> to vector<16x128xf32>
    %540 = arith.mulf %537, %539 : vector<16x128xf32>
    %cst_112 = arith.constant dense<0.000000e+00> : vector<128xf32>
    %541 = vector.multi_reduction <add>, %540, %cst_112 [0] : vector<16x128xf32> to vector<128xf32>
    %542 = vector.shape_cast %541 : vector<128xf32> to vector<1x128xf32>
    %543 = vector.extract_strided_slice %442 {offsets = [7, 0, 0], sizes = [1, 16, 128], strides = [1, 1, 1]} : vector<16x16x128xf32> to vector<1x16x128xf32>
    %544 = vector.shape_cast %543 : vector<1x16x128xf32> to vector<16x128xf32>
    %545 = arith.mulf %544, %537 : vector<16x128xf32>
    %546 = vector.extract_strided_slice %464 {offsets = [7, 0, 0], sizes = [1, 16, 128], strides = [1, 1, 1]} : vector<16x16x128xf32> to vector<1x16x128xf32>
    %547 = vector.shape_cast %546 : vector<1x16x128xf32> to vector<16x128xf32>
    %548 = arith.addf %545, %547 : vector<16x128xf32>
    %549 = vector.extract_strided_slice %461 {offsets = [7, 0, 0], sizes = [1, 16, 128], strides = [1, 1, 1]} : vector<16x16x128xf32> to vector<1x16x128xf32>
    %550 = vector.shape_cast %549 : vector<1x16x128xf32> to vector<16x128xf32>
    %551 = arith.mulf %548, %550 : vector<16x128xf32>
    %cst_113 = arith.constant dense<0.000000e+00> : vector<128xf32>
    %552 = vector.multi_reduction <add>, %551, %cst_113 [0] : vector<16x128xf32> to vector<128xf32>
    %553 = vector.shape_cast %552 : vector<128xf32> to vector<1x128xf32>
    %554 = vector.extract_strided_slice %442 {offsets = [8, 0, 0], sizes = [1, 16, 128], strides = [1, 1, 1]} : vector<16x16x128xf32> to vector<1x16x128xf32>
    %555 = vector.shape_cast %554 : vector<1x16x128xf32> to vector<16x128xf32>
    %556 = arith.mulf %555, %548 : vector<16x128xf32>
    %557 = vector.extract_strided_slice %464 {offsets = [8, 0, 0], sizes = [1, 16, 128], strides = [1, 1, 1]} : vector<16x16x128xf32> to vector<1x16x128xf32>
    %558 = vector.shape_cast %557 : vector<1x16x128xf32> to vector<16x128xf32>
    %559 = arith.addf %556, %558 : vector<16x128xf32>
    %560 = vector.extract_strided_slice %461 {offsets = [8, 0, 0], sizes = [1, 16, 128], strides = [1, 1, 1]} : vector<16x16x128xf32> to vector<1x16x128xf32>
    %561 = vector.shape_cast %560 : vector<1x16x128xf32> to vector<16x128xf32>
    %562 = arith.mulf %559, %561 : vector<16x128xf32>
    %cst_114 = arith.constant dense<0.000000e+00> : vector<128xf32>
    %563 = vector.multi_reduction <add>, %562, %cst_114 [0] : vector<16x128xf32> to vector<128xf32>
    %564 = vector.shape_cast %563 : vector<128xf32> to vector<1x128xf32>
    %565 = vector.extract_strided_slice %442 {offsets = [9, 0, 0], sizes = [1, 16, 128], strides = [1, 1, 1]} : vector<16x16x128xf32> to vector<1x16x128xf32>
    %566 = vector.shape_cast %565 : vector<1x16x128xf32> to vector<16x128xf32>
    %567 = arith.mulf %566, %559 : vector<16x128xf32>
    %568 = vector.extract_strided_slice %464 {offsets = [9, 0, 0], sizes = [1, 16, 128], strides = [1, 1, 1]} : vector<16x16x128xf32> to vector<1x16x128xf32>
    %569 = vector.shape_cast %568 : vector<1x16x128xf32> to vector<16x128xf32>
    %570 = arith.addf %567, %569 : vector<16x128xf32>
    %571 = vector.extract_strided_slice %461 {offsets = [9, 0, 0], sizes = [1, 16, 128], strides = [1, 1, 1]} : vector<16x16x128xf32> to vector<1x16x128xf32>
    %572 = vector.shape_cast %571 : vector<1x16x128xf32> to vector<16x128xf32>
    %573 = arith.mulf %570, %572 : vector<16x128xf32>
    %cst_115 = arith.constant dense<0.000000e+00> : vector<128xf32>
    %574 = vector.multi_reduction <add>, %573, %cst_115 [0] : vector<16x128xf32> to vector<128xf32>
    %575 = vector.shape_cast %574 : vector<128xf32> to vector<1x128xf32>
    %576 = vector.extract_strided_slice %442 {offsets = [10, 0, 0], sizes = [1, 16, 128], strides = [1, 1, 1]} : vector<16x16x128xf32> to vector<1x16x128xf32>
    %577 = vector.shape_cast %576 : vector<1x16x128xf32> to vector<16x128xf32>
    %578 = arith.mulf %577, %570 : vector<16x128xf32>
    %579 = vector.extract_strided_slice %464 {offsets = [10, 0, 0], sizes = [1, 16, 128], strides = [1, 1, 1]} : vector<16x16x128xf32> to vector<1x16x128xf32>
    %580 = vector.shape_cast %579 : vector<1x16x128xf32> to vector<16x128xf32>
    %581 = arith.addf %578, %580 : vector<16x128xf32>
    %582 = vector.extract_strided_slice %461 {offsets = [10, 0, 0], sizes = [1, 16, 128], strides = [1, 1, 1]} : vector<16x16x128xf32> to vector<1x16x128xf32>
    %583 = vector.shape_cast %582 : vector<1x16x128xf32> to vector<16x128xf32>
    %584 = arith.mulf %581, %583 : vector<16x128xf32>
    %cst_116 = arith.constant dense<0.000000e+00> : vector<128xf32>
    %585 = vector.multi_reduction <add>, %584, %cst_116 [0] : vector<16x128xf32> to vector<128xf32>
    %586 = vector.shape_cast %585 : vector<128xf32> to vector<1x128xf32>
    %587 = vector.extract_strided_slice %442 {offsets = [11, 0, 0], sizes = [1, 16, 128], strides = [1, 1, 1]} : vector<16x16x128xf32> to vector<1x16x128xf32>
    %588 = vector.shape_cast %587 : vector<1x16x128xf32> to vector<16x128xf32>
    %589 = arith.mulf %588, %581 : vector<16x128xf32>
    %590 = vector.extract_strided_slice %464 {offsets = [11, 0, 0], sizes = [1, 16, 128], strides = [1, 1, 1]} : vector<16x16x128xf32> to vector<1x16x128xf32>
    %591 = vector.shape_cast %590 : vector<1x16x128xf32> to vector<16x128xf32>
    %592 = arith.addf %589, %591 : vector<16x128xf32>
    %593 = vector.extract_strided_slice %461 {offsets = [11, 0, 0], sizes = [1, 16, 128], strides = [1, 1, 1]} : vector<16x16x128xf32> to vector<1x16x128xf32>
    %594 = vector.shape_cast %593 : vector<1x16x128xf32> to vector<16x128xf32>
    %595 = arith.mulf %592, %594 : vector<16x128xf32>
    %cst_117 = arith.constant dense<0.000000e+00> : vector<128xf32>
    %596 = vector.multi_reduction <add>, %595, %cst_117 [0] : vector<16x128xf32> to vector<128xf32>
    %597 = vector.shape_cast %596 : vector<128xf32> to vector<1x128xf32>
    %598 = vector.extract_strided_slice %442 {offsets = [12, 0, 0], sizes = [1, 16, 128], strides = [1, 1, 1]} : vector<16x16x128xf32> to vector<1x16x128xf32>
    %599 = vector.shape_cast %598 : vector<1x16x128xf32> to vector<16x128xf32>
    %600 = arith.mulf %599, %592 : vector<16x128xf32>
    %601 = vector.extract_strided_slice %464 {offsets = [12, 0, 0], sizes = [1, 16, 128], strides = [1, 1, 1]} : vector<16x16x128xf32> to vector<1x16x128xf32>
    %602 = vector.shape_cast %601 : vector<1x16x128xf32> to vector<16x128xf32>
    %603 = arith.addf %600, %602 : vector<16x128xf32>
    %604 = vector.extract_strided_slice %461 {offsets = [12, 0, 0], sizes = [1, 16, 128], strides = [1, 1, 1]} : vector<16x16x128xf32> to vector<1x16x128xf32>
    %605 = vector.shape_cast %604 : vector<1x16x128xf32> to vector<16x128xf32>
    %606 = arith.mulf %603, %605 : vector<16x128xf32>
    %cst_118 = arith.constant dense<0.000000e+00> : vector<128xf32>
    %607 = vector.multi_reduction <add>, %606, %cst_118 [0] : vector<16x128xf32> to vector<128xf32>
    %608 = vector.shape_cast %607 : vector<128xf32> to vector<1x128xf32>
    %609 = vector.extract_strided_slice %442 {offsets = [13, 0, 0], sizes = [1, 16, 128], strides = [1, 1, 1]} : vector<16x16x128xf32> to vector<1x16x128xf32>
    %610 = vector.shape_cast %609 : vector<1x16x128xf32> to vector<16x128xf32>
    %611 = arith.mulf %610, %603 : vector<16x128xf32>
    %612 = vector.extract_strided_slice %464 {offsets = [13, 0, 0], sizes = [1, 16, 128], strides = [1, 1, 1]} : vector<16x16x128xf32> to vector<1x16x128xf32>
    %613 = vector.shape_cast %612 : vector<1x16x128xf32> to vector<16x128xf32>
    %614 = arith.addf %611, %613 : vector<16x128xf32>
    %615 = vector.extract_strided_slice %461 {offsets = [13, 0, 0], sizes = [1, 16, 128], strides = [1, 1, 1]} : vector<16x16x128xf32> to vector<1x16x128xf32>
    %616 = vector.shape_cast %615 : vector<1x16x128xf32> to vector<16x128xf32>
    %617 = arith.mulf %614, %616 : vector<16x128xf32>
    %cst_119 = arith.constant dense<0.000000e+00> : vector<128xf32>
    %618 = vector.multi_reduction <add>, %617, %cst_119 [0] : vector<16x128xf32> to vector<128xf32>
    %619 = vector.shape_cast %618 : vector<128xf32> to vector<1x128xf32>
    %620 = vector.extract_strided_slice %442 {offsets = [14, 0, 0], sizes = [1, 16, 128], strides = [1, 1, 1]} : vector<16x16x128xf32> to vector<1x16x128xf32>
    %621 = vector.shape_cast %620 : vector<1x16x128xf32> to vector<16x128xf32>
    %622 = arith.mulf %621, %614 : vector<16x128xf32>
    %623 = vector.extract_strided_slice %464 {offsets = [14, 0, 0], sizes = [1, 16, 128], strides = [1, 1, 1]} : vector<16x16x128xf32> to vector<1x16x128xf32>
    %624 = vector.shape_cast %623 : vector<1x16x128xf32> to vector<16x128xf32>
    %625 = arith.addf %622, %624 : vector<16x128xf32>
    %626 = vector.extract_strided_slice %461 {offsets = [14, 0, 0], sizes = [1, 16, 128], strides = [1, 1, 1]} : vector<16x16x128xf32> to vector<1x16x128xf32>
    %627 = vector.shape_cast %626 : vector<1x16x128xf32> to vector<16x128xf32>
    %628 = arith.mulf %625, %627 : vector<16x128xf32>
    %cst_120 = arith.constant dense<0.000000e+00> : vector<128xf32>
    %629 = vector.multi_reduction <add>, %628, %cst_120 [0] : vector<16x128xf32> to vector<128xf32>
    %630 = vector.shape_cast %629 : vector<128xf32> to vector<1x128xf32>
    %631 = vector.extract_strided_slice %442 {offsets = [15, 0, 0], sizes = [1, 16, 128], strides = [1, 1, 1]} : vector<16x16x128xf32> to vector<1x16x128xf32>
    %632 = vector.shape_cast %631 : vector<1x16x128xf32> to vector<16x128xf32>
    %633 = arith.mulf %632, %625 : vector<16x128xf32>
    %634 = vector.extract_strided_slice %464 {offsets = [15, 0, 0], sizes = [1, 16, 128], strides = [1, 1, 1]} : vector<16x16x128xf32> to vector<1x16x128xf32>
    %635 = vector.shape_cast %634 : vector<1x16x128xf32> to vector<16x128xf32>
    %636 = arith.addf %633, %635 : vector<16x128xf32>
    %637 = vector.extract_strided_slice %461 {offsets = [15, 0, 0], sizes = [1, 16, 128], strides = [1, 1, 1]} : vector<16x16x128xf32> to vector<1x16x128xf32>
    %638 = vector.shape_cast %637 : vector<1x16x128xf32> to vector<16x128xf32>
    %639 = arith.mulf %636, %638 : vector<16x128xf32>
    %cst_121 = arith.constant dense<0.000000e+00> : vector<128xf32>
    %640 = vector.multi_reduction <add>, %639, %cst_121 [0] : vector<16x128xf32> to vector<128xf32>
    %641 = vector.shape_cast %640 : vector<128xf32> to vector<1x128xf32>
    %642 = tpu.concatenate %476, %487, %498, %509, %520, %531, %542, %553, %564, %575, %586, %597, %608, %619, %630, %641 in 0 : vector<1x128xf32>, vector<1x128xf32>, vector<1x128xf32>, vector<1x128xf32>, vector<1x128xf32>, vector<1x128xf32>, vector<1x128xf32>, vector<1x128xf32>, vector<1x128xf32>, vector<1x128xf32>, vector<1x128xf32>, vector<1x128xf32>, vector<1x128xf32>, vector<1x128xf32>, vector<1x128xf32>, vector<1x128xf32> -> vector<16x128xf32>
    %c1_122 = arith.constant 1 : index
    %c0_123 = arith.constant 0 : index
    %643 = vector.load %arg13[%c1_122, %c0_123] : memref<2x64xf32, #tpu.memory_space<vmem>>, vector<1x64xf32>
    %644 = tpu.concatenate %643, %643 in 1 : vector<1x64xf32>, vector<1x64xf32> -> vector<1x128xf32>
    %645 = vector.broadcast %644 : vector<1x128xf32> to vector<16x128xf32>
    %646 = arith.mulf %645, %409 : vector<16x128xf32>
    %647 = arith.addf %642, %646 : vector<16x128xf32>
    %cst_124 = arith.constant 0.000000e+00 : f32
    %648 = vector.broadcast %cst_124 : f32 to vector<16x128xf32>
    %649 = arith.subf %648, %368 : vector<16x128xf32>
    %650 = math.exp %649 : vector<16x128xf32>
    %cst_125 = arith.constant 1.000000e+00 : f32
    %651 = vector.broadcast %cst_125 : f32 to vector<16x128xf32>
    %652 = arith.addf %651, %650 : vector<16x128xf32>
    %cst_126 = arith.constant 1.000000e+00 : f32
    %653 = vector.broadcast %cst_126 : f32 to vector<16x128xf32>
    %654 = arith.divf %653, %652 : vector<16x128xf32>
    %655 = arith.mulf %368, %654 : vector<16x128xf32>
    %656 = arith.mulf %647, %655 : vector<16x128xf32>
    %657 = vector.extract_strided_slice %656 {offsets = [0, 0], sizes = [16, 64], strides = [1, 1]} : vector<16x128xf32> to vector<16x64xf32>
    %658 = vector.extract_strided_slice %656 {offsets = [0, 64], sizes = [16, 64], strides = [1, 1]} : vector<16x128xf32> to vector<16x64xf32>
    %659 = tpu.concatenate %657, %658 in 0 : vector<16x64xf32>, vector<16x64xf32> -> vector<32x64xf32>
    %c1_127 = arith.constant 1 : index
    %c0_128 = arith.constant 0 : index
    %c0_129 = arith.constant 0 : index
    %660 = vector.load %arg11[%c1_127, %c0_128, %c0_129] : memref<2x64x32xf32, #tpu.memory_space<vmem>>, vector<1x64x32xf32>
    %661 = vector.shape_cast %660 : vector<1x64x32xf32> to vector<64x32xf32>
    %cst_130 = arith.constant dense<0.000000e+00> : vector<32x32xf32>
    %662 = tpu.matmul %659, %661, %cst_130 {dimension_numbers = #tpu.dot_dimension_numbers<[1], [0], [0], [1], [0, 0, 1, 1], [], []>} : vector<32x64xf32>, vector<64x32xf32>, vector<32x32xf32> -> vector<32x32xf32>
    %663 = arith.addf %662, %335 : vector<32x32xf32>
    %c0_131 = arith.constant 0 : index
    %c0_132 = arith.constant 0 : index
    %664 = vector.load %arg14[%c0_131, %c0_132] : memref<1x32xf32, #tpu.memory_space<vmem>>, vector<1x32xf32>
    %c0_133 = arith.constant 0 : index
    %c0_134 = arith.constant 0 : index
    %665 = vector.load %arg15[%c0_133, %c0_134] : memref<1x32xf32, #tpu.memory_space<vmem>>, vector<1x32xf32>
    %cst_135 = arith.constant dense<0.000000e+00> : vector<32xf32>
    %666 = vector.multi_reduction <add>, %663, %cst_135 [1] : vector<32x32xf32> to vector<32xf32>
    %667 = vector.shape_cast %666 : vector<32xf32> to vector<32x1xf32>
    %cst_136 = arith.constant 3.200000e+01 : f32
    %668 = vector.broadcast %cst_136 : f32 to vector<32x1xf32>
    %669 = arith.divf %667, %668 : vector<32x1xf32>
    %670 = vector.broadcast %669 : vector<32x1xf32> to vector<32x32xf32>
    %671 = arith.subf %663, %670 : vector<32x32xf32>
    %672 = arith.mulf %671, %671 : vector<32x32xf32>
    %cst_137 = arith.constant dense<0.000000e+00> : vector<32xf32>
    %673 = vector.multi_reduction <add>, %672, %cst_137 [1] : vector<32x32xf32> to vector<32xf32>
    %674 = vector.shape_cast %673 : vector<32xf32> to vector<32x1xf32>
    %cst_138 = arith.constant 3.200000e+01 : f32
    %675 = vector.broadcast %cst_138 : f32 to vector<32x1xf32>
    %676 = arith.divf %674, %675 : vector<32x1xf32>
    %cst_139 = arith.constant 9.99999974E-6 : f32
    %677 = vector.broadcast %cst_139 : f32 to vector<32x1xf32>
    %678 = arith.addf %676, %677 : vector<32x1xf32>
    %679 = math.rsqrt %678 : vector<32x1xf32>
    %680 = vector.broadcast %679 : vector<32x1xf32> to vector<32x32xf32>
    %681 = arith.mulf %671, %680 : vector<32x32xf32>
    %682 = vector.broadcast %664 : vector<1x32xf32> to vector<32x32xf32>
    %683 = arith.mulf %681, %682 : vector<32x32xf32>
    %684 = vector.broadcast %665 : vector<1x32xf32> to vector<32x32xf32>
    %685 = arith.addf %683, %684 : vector<32x32xf32>
    %686 = vector.extract_strided_slice %685 {offsets = [0, 0], sizes = [16, 32], strides = [1, 1]} : vector<32x32xf32> to vector<16x32xf32>
    %c0_140 = arith.constant 0 : index
    %c0_141 = arith.constant 0 : index
    %c0_142 = arith.constant 0 : index
    %687 = vector.load %arg19[%c0_140, %c0_141, %c0_142] : memref<2x16x32xf32, #tpu.memory_space<vmem>>, vector<1x16x32xf32>
    %688 = vector.shape_cast %687 : vector<1x16x32xf32> to vector<16x32xf32>
    %689 = vector.shape_cast %686 : vector<16x32xf32> to vector<1x16x32xf32>
    tpu.vector_store %arg19[%c0_140, %c0_141, %c0_142], %689 {strides = array<i32>} : memref<2x16x32xf32, #tpu.memory_space<vmem>>, vector<1x16x32xf32>,
    %cst_143 = arith.constant dense<0.000000e+00> : vector<32xf32>
    %690 = vector.multi_reduction <add>, %686, %cst_143 [0] : vector<16x32xf32> to vector<32xf32>
    %691 = vector.shape_cast %690 : vector<32xf32> to vector<1x32xf32>
    %cst_144 = arith.constant 1.600000e+01 : f32
    %692 = vector.broadcast %cst_144 : f32 to vector<1x32xf32>
    %693 = arith.divf %691, %692 : vector<1x32xf32>
    %694 = vector.extract_strided_slice %685 {offsets = [16, 0], sizes = [16, 32], strides = [1, 1]} : vector<32x32xf32> to vector<16x32xf32>
    %c1_145 = arith.constant 1 : index
    %c0_146 = arith.constant 0 : index
    %c0_147 = arith.constant 0 : index
    %695 = vector.load %arg19[%c1_145, %c0_146, %c0_147] : memref<2x16x32xf32, #tpu.memory_space<vmem>>, vector<1x16x32xf32>
    %696 = vector.shape_cast %695 : vector<1x16x32xf32> to vector<16x32xf32>
    %697 = vector.shape_cast %694 : vector<16x32xf32> to vector<1x16x32xf32>
    tpu.vector_store %arg19[%c1_145, %c0_146, %c0_147], %697 {strides = array<i32>} : memref<2x16x32xf32, #tpu.memory_space<vmem>>, vector<1x16x32xf32>,
    %cst_148 = arith.constant dense<0.000000e+00> : vector<32xf32>
    %698 = vector.multi_reduction <add>, %694, %cst_148 [0] : vector<16x32xf32> to vector<32xf32>
    %699 = vector.shape_cast %698 : vector<32xf32> to vector<1x32xf32>
    %cst_149 = arith.constant 1.600000e+01 : f32
    %700 = vector.broadcast %cst_149 : f32 to vector<1x32xf32>
    %701 = arith.divf %699, %700 : vector<1x32xf32>
    %702 = tpu.concatenate %693, %701 in 0 : vector<1x32xf32>, vector<1x32xf32> -> vector<2x32xf32>
    %c0_150 = arith.constant 0 : index
    %c0_151 = arith.constant 0 : index
    %703 = vector.load %arg16[%c0_150, %c0_151] : memref<32x10xf32, #tpu.memory_space<vmem>>, vector<32x10xf32>
    %cst_152 = arith.constant dense<0.000000e+00> : vector<2x10xf32>
    %704 = tpu.matmul %702, %703, %cst_152 {dimension_numbers = #tpu.dot_dimension_numbers<[1], [0], [0], [1], [0, 0, 1, 1], [], []>} : vector<2x32xf32>, vector<32x10xf32>, vector<2x10xf32> -> vector<2x10xf32>
    %c0_153 = arith.constant 0 : index
    %c0_154 = arith.constant 0 : index
    %705 = vector.load %arg17[%c0_153, %c0_154] : memref<1x10xf32, #tpu.memory_space<vmem>>, vector<1x10xf32>
    %706 = vector.broadcast %705 : vector<1x10xf32> to vector<2x10xf32>
    %707 = arith.addf %704, %706 : vector<2x10xf32>
    %c0_155 = arith.constant 0 : index
    %c0_156 = arith.constant 0 : index
    %708 = vector.load %arg18[%c0_155, %c0_156] : memref<2x10xf32, #tpu.memory_space<vmem>>, vector<2x10xf32>
    tpu.vector_store %arg18[%c0_155, %c0_156], %707 {strides = array<i32>} : memref<2x10xf32, #tpu.memory_space<vmem>>, vector<2x10xf32>,
    return
  }
  func.func @transform_0(%arg0: i32) -> (i32, i32) {
    %c0_i32 = arith.constant 0 : i32
    %c0_i32_0 = arith.constant 0 : i32
    %c0_i32_1 = arith.constant 0 : i32
    return %c0_i32, %c0_i32_0 : i32, i32
  }
  func.func @transform_1(%arg0: i32) -> (i32, i32) {
    %c0_i32 = arith.constant 0 : i32
    %c0_i32_0 = arith.constant 0 : i32
    %c0_i32_1 = arith.constant 0 : i32
    return %c0_i32, %c0_i32_0 : i32, i32
  }
  func.func @transform_2(%arg0: i32) -> (i32, i32) {
    %c0_i32 = arith.constant 0 : i32
    %c0_i32_0 = arith.constant 0 : i32
    %c0_i32_1 = arith.constant 0 : i32
    return %c0_i32, %c0_i32_0 : i32, i32
  }
  func.func @transform_3(%arg0: i32) -> (i32, i32) {
    %c0_i32 = arith.constant 0 : i32
    %c0_i32_0 = arith.constant 0 : i32
    %c0_i32_1 = arith.constant 0 : i32
    return %c0_i32, %c0_i32_0 : i32, i32
  }
  func.func @transform_4(%arg0: i32) -> (i32, i32) {
    %c0_i32 = arith.constant 0 : i32
    %c0_i32_0 = arith.constant 0 : i32
    %c0_i32_1 = arith.constant 0 : i32
    return %c0_i32, %c0_i32_0 : i32, i32
  }
  func.func @transform_5(%arg0: i32) -> (i32, i32, i32) {
    %c0_i32 = arith.constant 0 : i32
    %c0_i32_0 = arith.constant 0 : i32
    %c0_i32_1 = arith.constant 0 : i32
    %c0_i32_2 = arith.constant 0 : i32
    return %c0_i32, %c0_i32_0, %c0_i32_1 : i32, i32, i32
  }
  func.func @transform_6(%arg0: i32) -> (i32, i32, i32) {
    %c0_i32 = arith.constant 0 : i32
    %c0_i32_0 = arith.constant 0 : i32
    %c0_i32_1 = arith.constant 0 : i32
    %c0_i32_2 = arith.constant 0 : i32
    return %c0_i32, %c0_i32_0, %c0_i32_1 : i32, i32, i32
  }
  func.func @transform_7(%arg0: i32) -> (i32, i32) {
    %c0_i32 = arith.constant 0 : i32
    %c0_i32_0 = arith.constant 0 : i32
    %c0_i32_1 = arith.constant 0 : i32
    return %c0_i32, %c0_i32_0 : i32, i32
  }
  func.func @transform_8(%arg0: i32) -> (i32, i32, i32) {
    %c0_i32 = arith.constant 0 : i32
    %c0_i32_0 = arith.constant 0 : i32
    %c0_i32_1 = arith.constant 0 : i32
    %c0_i32_2 = arith.constant 0 : i32
    return %c0_i32, %c0_i32_0, %c0_i32_1 : i32, i32, i32
  }
  func.func @transform_9(%arg0: i32) -> (i32, i32) {
    %c0_i32 = arith.constant 0 : i32
    %c0_i32_0 = arith.constant 0 : i32
    %c0_i32_1 = arith.constant 0 : i32
    return %c0_i32, %c0_i32_0 : i32, i32
  }
  func.func @transform_10(%arg0: i32) -> (i32, i32, i32) {
    %c0_i32 = arith.constant 0 : i32
    %c0_i32_0 = arith.constant 0 : i32
    %c0_i32_1 = arith.constant 0 : i32
    %c0_i32_2 = arith.constant 0 : i32
    return %c0_i32, %c0_i32_0, %c0_i32_1 : i32, i32, i32
  }
  func.func @transform_11(%arg0: i32) -> (i32, i32, i32) {
    %c0_i32 = arith.constant 0 : i32
    %c0_i32_0 = arith.constant 0 : i32
    %c0_i32_1 = arith.constant 0 : i32
    %c0_i32_2 = arith.constant 0 : i32
    return %c0_i32, %c0_i32_0, %c0_i32_1 : i32, i32, i32
  }
  func.func @transform_12(%arg0: i32) -> (i32, i32) {
    %c0_i32 = arith.constant 0 : i32
    %c0_i32_0 = arith.constant 0 : i32
    %c0_i32_1 = arith.constant 0 : i32
    return %c0_i32, %c0_i32_0 : i32, i32
  }
  func.func @transform_13(%arg0: i32) -> (i32, i32) {
    %c0_i32 = arith.constant 0 : i32
    %c0_i32_0 = arith.constant 0 : i32
    %c0_i32_1 = arith.constant 0 : i32
    return %c0_i32, %c0_i32_0 : i32, i32
  }
  func.func @transform_14(%arg0: i32) -> (i32, i32) {
    %c0_i32 = arith.constant 0 : i32
    %c0_i32_0 = arith.constant 0 : i32
    %c0_i32_1 = arith.constant 0 : i32
    return %c0_i32, %c0_i32_0 : i32, i32
  }
  func.func @transform_15(%arg0: i32) -> (i32, i32) {
    %c0_i32 = arith.constant 0 : i32
    %c0_i32_0 = arith.constant 0 : i32
    %c0_i32_1 = arith.constant 0 : i32
    return %c0_i32, %c0_i32_0 : i32, i32
  }
  func.func @transform_16(%arg0: i32) -> (i32, i32) {
    %c0_i32 = arith.constant 0 : i32
    %c0_i32_0 = arith.constant 0 : i32
    %c0_i32_1 = arith.constant 0 : i32
    return %c0_i32, %c0_i32_0 : i32, i32
  }
  func.func @transform_17(%arg0: i32) -> (i32, i32) {
    %c0_i32 = arith.constant 0 : i32
    %c0_i32_0 = arith.constant 0 : i32
    %c0_i32_1 = arith.constant 0 : i32
    return %c0_i32, %c0_i32_0 : i32, i32
  }
  func.func @transform_18(%arg0: i32) -> (i32, i32, i32) {
    %c0_i32 = arith.constant 0 : i32
    %c0_i32_0 = arith.constant 0 : i32
    %c0_i32_1 = arith.constant 0 : i32
    %c0_i32_2 = arith.constant 0 : i32
    return %c0_i32, %c0_i32_0, %c0_i32_1 : i32, i32, i32
  }
}

</mosaic_0001>

<bundles_post_ra>
// kernel: forward.1
= control target key start
LH: loop header
LB: loop body
LE: loop exit
PB: predicated region body
PF: predicated region fallthrough
CT: control target
= control target key end

     0   :  { %s6795_s0 = inlined_call_operand.vmem [shape: f32[32,48], index: 0, kind: input, shape index: {}]   ;;  %s6796_s1 = inlined_call_operand.vmem [shape: f32[48,32], index: 1, kind: input, shape index: {}]   ;;  %s6797_s2 = inlined_call_operand.vmem [shape: f32[1,32], index: 2, kind: input, shape index: {}]   ;;  %s6798_s3 = inlined_call_operand.vmem [shape: f32[2,32], index: 3, kind: input, shape index: {}]   ;;  %s6799_s4 = inlined_call_operand.vmem [shape: f32[2,32], index: 4, kind: input, shape index: {}]   ;;  %s6800_s5 = inlined_call_operand.vmem [shape: f32[2,32,128], index: 5, kind: input, shape index: {}]   ;;  %s6801_s6 = inlined_call_operand.vmem [shape: f32[2,4,64], index: 6, kind: input, shape index: {}]   ;;  %s6802_s7 = inlined_call_operand.vmem [shape: f32[2,64], index: 7, kind: input, shape index: {}]   ;;  %s6803_s8 = inlined_call_operand.vmem [shape: f32[2,64,96], index: 8, kind: input, shape index: {}]   ;;  %s6804_s9 = inlined_call_operand.vmem [shape: f32[2,64], index: 9, kind: input, shape index: {}]   ;;  %s6805_s10 = inlined_call_operand.vmem [shape: f32[2,64,32], index: 10, kind: input, shape index: {}]   ;;  %s6806_s11 = inlined_call_operand.vmem [shape: f32[2,16,64], index: 11, kind: input, shape index: {}]   ;;  %s6807_s12 = inlined_call_operand.vmem [shape: f32[2,64], index: 12, kind: input, shape index: {}]   ;;  %s6808_s13 = inlined_call_operand.vmem [shape: f32[1,32], index: 13, kind: input, shape index: {}]   ;;  %s6809_s14 = inlined_call_operand.vmem [shape: f32[1,32], index: 14, kind: input, shape index: {}]   ;;  %s6810_s15 = inlined_call_operand.vmem [shape: f32[32,10], index: 15, kind: input, shape index: {}]   ;;  %s6811_s16 = inlined_call_operand.vmem [shape: f32[1,10], index: 16, kind: input, shape index: {}]   ;;  %s6812_s17 = inlined_call_operand.hbm [shape: f32[2,10], index: 17, kind: output, shape index: {0}]   ;;  %s6813_s18 = inlined_call_operand.hbm [shape: f32[2,16,32], index: 18, kind: output, shape index: {1}]  }
   0x1   :  { %6853 = sst [smem:[#allocation68_spill]] %s6795_s0 }
   0x2   :  { %6854 = sst [smem:[#allocation69_spill]] %s6796_s1 }
   0x3   :  { %6855 = sst [smem:[#allocation70_spill]] %s6797_s2 }
   0x4   :  { %24 = vsyncpa [#allocation3], 0  ;;  %s6856_s29 = sld [smem:[#allocation69_spill]] }
   0xa   :  { %v69_v0 = vld [vmem:[%s6856_s29 + $0x28] sm:$0xff]  ;;  %v68_v1 = vld [vmem:[%s6856_s29 + $0x20] sm:$0xff]  ;;  %v67_v2 = vld [vmem:[%s6856_s29 + $0x18] sm:$0xff] }
   0xb   :  { %97 = vmatpush.msra.mxu0 %v69_v0  ;;  %v66_v3 = vld [vmem:[%s6856_s29 + $0x10] sm:$0xff]  ;;  %v65_v4 = vld [vmem:[%s6856_s29 + $0x8] sm:$0xff] }
   0xd   :  { %98 = vmatpush.msra.mxu0 %v68_v1 }
   0xf   :  { %99 = vmatpush.msra.mxu0 %v67_v2 }
  0x11   :  { %100 = vmatpush.msra.mxu0 %v66_v3 }
  0x12   :  { %25 = vsyncpa [#allocation5], 0  ;;  %v64_v5 = vld [vmem:[%s6856_s29] sm:$0xff]  ;;  %s6857_s27 = sld [smem:[#allocation68_spill]]  ;;  %vm74_vm0 = vcmask 392192   ;;  %vm122_vm1 = vcmask 261120  }
  0x13   :  { %101 = vmatpush.msra.mxu0 %v65_v4  ;;  %s6858_s22 = sld [smem:[#allocation70_spill]]  ;;  %v4405_v23 = vmov 32.0   ;;  %v231_v50 = vld [vmem:[%s6800_s5 + $0x18] sm:$0xff]  ;;  %v230_v51 = vld [vmem:[%s6800_s5 + $0x10] sm:$0xff]  ;;  %v229_v52 = vld [vmem:[%s6800_s5 + $0x8] sm:$0xff]  ;;  %vm281_vm15 = vcmask 523264  }
  0x14   :  { %4147 = vrcp.f32 %v4405_v23  ;;  %256 = vmatpush.msra.mxu1 %v231_v50  ;;  %v228_v53 = vld [vmem:[%s6800_s5] sm:$0xff]  ;;  %s4409_s28 = smov 128   ;;  %s4410_s30 = smov 8  }
  0x15   :  { %102 = vmatpush.msra.mxu0 %v64_v5  ;;  %s4411_s1 = smov [#allocation2]   ;;  %s3858_s21 = sshll.u32 %s6812_s17, 4  ;;  %s3859_s21 = int_to_ptr.hbm [resolvable:$true] %s3858_s21 }
  0x16   :  { %257 = vmatpush.msra.mxu1 %v230_v51  ;;  %s3856_s29 = sshll.u32 %s4411_s1, 4  ;;  %s3857_s29 = int_to_ptr.vmem [resolvable:$true] %s3856_s29 }
  0x18   :  { %v60_v6 = vld [vmem:[%s6857_s27] sm:$0xff]  ;;  %v61_v7 = vld [vmem:[%s6857_s27 + $0x8] sm:$0xff]  ;;  %v62_v8 = vld [vmem:[%s6857_s27 + $0x10] sm:$0xff]  ;;  %258 = vmatpush.msra.mxu1 %v229_v52 }
  0x19   :  { %3885 = vmatmul.msk.f32.vlgmr.msra.gmra.mxu0 %vm74_vm0, %v60_v6  ;;  %v63_v9 = vld [vmem:[%s6857_s27 + $0x18] sm:$0xff]  ;;  %v4137_v10 = vld [vmem:[%s6858_s22] ss:$0 sm:$0xff]  ;;  %s4406_s22 = smov 64  }
  0x1a   :  { %v4148_v24 = vpop.eup %4147  ;;  %259 = vmatpush.msra.mxu1 %v228_v53 }
  0x1b   :  { %v136_v25 = vmul.f32 32.0, %v4148_v24  ;;  %vm140_vm2 = vweird.f32 %v4148_v24 }
  0x1d   :  { %v137_v26 = vsub.f32 1.0, %v136_v25 }
  0x1f   :  { %v138_v27 = vmul.f32 %v4148_v24, %v137_v26 }
  0x21   :  { %3886 = vmatmul.msk.f32.gmra.mxu0 %vm74_vm0, %v61_v7  ;;  %v139_v28 = vadd.f32 %v4148_v24, %v138_v27  ;;  %v4138_v7 = vld [vmem:[%s6798_s3] ss:$0 sm:$0xff] }
  0x23   :  { %v4556_v29 = vsel %vm140_vm2, %v4148_v24, %v139_v28  ;;  %vm322_vm2 = vcmask 1041408  }
  0x24   :  { %6863 = vst [vmem:[#allocation12_spill] sm:$0xff] %v4556_v29 }
  0x29   :  { %3887 = vmatmul.msk.f32.gmra.mxu0 %vm74_vm0, %v62_v8  ;;  %v4603_v8 = vld [vmem:[%s6801_s6] sm:$0xf] }
  0x31   :  { %3888 = vmatmul.msk.f32.gmra.mxu0 %vm74_vm0, %v63_v9  ;;  %v1802_v9 = vld [vmem:[%s6807_s12] sm:$0x1]  ;;  %vm310_vm0 = vcmask 1042432  }
  0x96   :  { %v104_v11 = vpop.f32.mrf.mxu0 }
  0x97   :  { %v4540_v12 = vadd.f32 %v4137_v10, %v104_v11 }
  0x99   :  { %6859 = vst [vmem:[#allocation8_spill] sm:$0xff] %v4540_v12  ;;  %v123_v13 = vsel %vm122_vm1, %v4540_v12, 0.0 }
  0x9a   :  { %124 = vadd.xlane.f32.xlu0 %v123_v13  ;;  %v4614_v13 = vld [vmem:[%s6802_s7] sm:$0x1] }
  0x9e   :  { %v107_v14 = vpop.f32.mrf.mxu0 }
  0x9f   :  { %v4544_v15 = vadd.f32 %v4137_v10, %v107_v14 }
  0xa1   :  { %6860 = vst [vmem:[#allocation9_spill] sm:$0xff] %v4544_v15  ;;  %v126_v16 = vsel %vm122_vm1, %v4544_v15, 0.0 }
  0xa2   :  { %127 = vadd.xlane.f32.xlu0 %v126_v16  ;;  %v4139_v16 = vld [vmem:[%s6799_s4] ss:$0 sm:$0xff] }
  0xa6   :  { %v110_v17 = vpop.f32.mrf.mxu0 }
  0xa7   :  { %v4548_v18 = vadd.f32 %v4137_v10, %v110_v17 }
  0xa9   :  { %6861 = vst [vmem:[#allocation10_spill] sm:$0xff] %v4548_v18  ;;  %v129_v19 = vsel %vm122_vm1, %v4548_v18, 0.0 }
  0xaa   :  { %130 = vadd.xlane.f32.xlu1 %v129_v19 }
  0xae   :  { %v113_v20 = vpop.f32.mrf.mxu0 }
  0xaf   :  { %v4552_v21 = vadd.f32 %v4137_v10, %v113_v20 }
  0xb1   :  { %6862 = vst [vmem:[#allocation11_spill] sm:$0xff] %v4552_v21  ;;  %v132_v22 = vsel %vm122_vm1, %v4552_v21, 0.0 }
  0xb2   :  { %133 = vadd.xlane.f32.xlu2 %v132_v22 }
 0x10d   :  { %v125_v30 = vpop.xlane.xlu0 %124 }
 0x10e   :  { %v142_v31 = vmul.f32 %v4556_v29, %v125_v30 }
 0x110   :  { %v146_v32 = vsub.f32 %v4540_v12, %v142_v31 }
 0x112   :  { %v150_v33 = vmul.f32 %v146_v32, %v146_v32 }
 0x114   :  { %v154_v34 = vsel %vm122_vm1, %v150_v33, 0.0 }
 0x115   :  { %155 = vadd.xlane.f32.xlu1 %v154_v34  ;;  %v128_v35 = vpop.xlane.xlu0 %127 }
 0x116   :  { %v143_v36 = vmul.f32 %v4556_v29, %v128_v35 }
 0x118   :  { %v4563_v37 = vsub.f32 %v4544_v15, %v143_v36 }
 0x11a   :  { %v151_v38 = vmul.f32 %v4563_v37, %v4563_v37 }
 0x11c   :  { %v157_v39 = vsel %vm122_vm1, %v151_v38, 0.0 }
 0x11d   :  { %v131_v40 = vpop.xlane.xlu1 %130  ;;  %158 = vadd.xlane.f32.xlu2 %v157_v39 }
 0x11e   :  { %v144_v41 = vmul.f32 %v4556_v29, %v131_v40 }
 0x120   :  { %v4570_v42 = vsub.f32 %v4548_v18, %v144_v41 }
 0x122   :  { %v152_v43 = vmul.f32 %v4570_v42, %v4570_v42 }
 0x124   :  { %v160_v44 = vsel %vm122_vm1, %v152_v43, 0.0 }
 0x125   :  { %v134_v45 = vpop.xlane.xlu2 %133  ;;  %161 = vadd.xlane.f32.xlu0 %v160_v44 }
 0x126   :  { %v145_v46 = vmul.f32 %v4556_v29, %v134_v45 }
 0x128   :  { %v4577_v47 = vsub.f32 %v4552_v21, %v145_v46 }
 0x12a   :  { %v153_v48 = vmul.f32 %v4577_v47, %v4577_v47 }
 0x12c   :  { %v163_v49 = vsel %vm122_vm1, %v153_v48, 0.0 }
 0x12d   :  { %164 = vadd.xlane.f32.xlu1 %v163_v49 }
 0x135   :  { %302 = vrot.lane.b32.xlu2 %v4614_v13, %s4406_s22 }
 0x139   :  { %296 = vrot.lane.b32.xlu0 %v4603_v8, %s4406_s22 }
 0x146   :  { %1804 = vrot.lane.b32.xlu1 %v1802_v9, %s4406_s22 }
 0x188   :  { %v156_v54 = vpop.xlane.xlu1 %155 }
 0x189   :  { %v166_v55 = vmul.f32 %v156_v54, %v4556_v29  ;;  %v4639_v54 = vld [vmem:[%s6806_s11] sm:$0xff] }
 0x18a   :  { %478 = vrot.lane.b32.xlu0 %v4639_v54, %s4406_s22 }
 0x18b   :  { %v170_v56 = vadd.f32 1e-05, %v166_v55 }
 0x18d   :  { %4149 = vrsqrt.f32 %v170_v56  ;;  %vm180_vm4 = vweird.f32 %v170_v56 }
 0x190   :  { %v159_v57 = vpop.xlane.xlu2 %158 }
 0x191   :  { %v167_v58 = vmul.f32 %v159_v57, %v4556_v29 }
 0x193   :  { %v4150_v59 = vpop.eup %4149  ;;  %v171_v60 = vadd.f32 1e-05, %v167_v58 }
 0x194   :  { %v175_v61 = vmul.f32 %v4150_v59, %v170_v56  ;;  %vm181_vm3 = vweird.f32 %v4150_v59 }
 0x195   :  { %4151 = vrsqrt.f32 %v171_v60  ;;  %vm182_vm5 = vmor %vm180_vm4, %vm181_vm3  ;;  %vm190_vm7 = vweird.f32 %v171_v60  ;;  %vm334_vm3 = vcmask 1040384  }
 0x196   :  { %v176_v62 = vmul.f32 %v4150_v59, %v175_v61 }
 0x198   :  { %v177_v63 = vmul.f32 0.5, %v176_v62  ;;  %v162_v0 = vpop.xlane.xlu0 %161  ;;  %v303_v58 = vpop.permute.xlu2 %302 }
 0x199   :  { %v168_v1 = vmul.f32 %v162_v0, %v4556_v29  ;;  %v404_v0 = vld [vmem:[%s6803_s8 + $0x38] sm:$0xff] }
 0x19a   :  { %v178_v2 = vsub.f32 1.5, %v177_v63  ;;  %421 = vmatpush.msra.mxu2 %v404_v0  ;;  %3937 = vmatpush.msra.mxu3 %v404_v0 }
 0x19b   :  { %v4152_v3 = vpop.eup %4151  ;;  %v172_v4 = vadd.f32 1e-05, %v168_v1 }
 0x19c   :  { %v179_v5 = vmul.f32 %v4150_v59, %v178_v2  ;;  %v185_v6 = vmul.f32 %v4152_v3, %v171_v60  ;;  %vm191_vm6 = vweird.f32 %v4152_v3 }
 0x19d   :  { %4153 = vrsqrt.f32 %v172_v4  ;;  %vm192_vm8 = vmor %vm190_vm7, %vm191_vm6  ;;  %vm200_vm10 = vweird.f32 %v172_v4 }
 0x19e   :  { %v186_v10 = vmul.f32 %v4152_v3, %v185_v6  ;;  %v183_v11 = vsel %vm182_vm5, %v4150_v59, %v179_v5  ;;  %v403_v5 = vld [vmem:[%s6803_s8 + $0x30] sm:$0xff]  ;;  %v305_v6 = vsel %vm281_vm15, %v4614_v13, %v303_v58 }
 0x19f   :  { %v214_v14 = vmul.f32 %v183_v11, %v146_v32  ;;  %422 = vmatpush.msra.mxu2 %v403_v5  ;;  %3938 = vmatpush.msra.mxu3 %v403_v5  ;;  %v306_v13 = vperm.slane %v305_v6, 0 }
 0x1a0   :  { %v187_v17 = vmul.f32 0.5, %v186_v10  ;;  %v165_v19 = vpop.xlane.xlu1 %164  ;;  %v402_v10 = vld [vmem:[%s6803_s8 + $0x28] sm:$0xff] }
 0x1a1   :  { %v169_v20 = vmul.f32 %v165_v19, %v4556_v29  ;;  %v219_v22 = vmul.f32 %v4138_v7, %v214_v14  ;;  %423 = vmatpush.msra.mxu2 %v402_v10  ;;  %3939 = vmatpush.msra.mxu3 %v402_v10 }
 0x1a2   :  { %v188_v23 = vsub.f32 1.5, %v187_v17  ;;  %v401_v17 = vld [vmem:[%s6803_s8 + $0x20] sm:$0xff] }
 0x1a3   :  { %v4154_v24 = vpop.eup %4153  ;;  %v173_v25 = vadd.f32 1e-05, %v169_v20  ;;  %v224_v26 = vadd.f32 %v4139_v16, %v219_v22  ;;  %424 = vmatpush.msra.mxu2 %v401_v17  ;;  %3940 = vmatpush.msra.mxu3 %v401_v17 }
 0x1a4   :  { %v189_v27 = vmul.f32 %v4152_v3, %v188_v23  ;;  %v195_v28 = vmul.f32 %v4154_v24, %v172_v4  ;;  %vm201_vm9 = vweird.f32 %v4154_v24 }
 0x1a5   :  { %4155 = vrsqrt.f32 %v173_v25  ;;  %3889 = vmatmul.msk.f32.vlgmr.msra.gmra.mxu1 %vm122_vm1, %v224_v26  ;;  %vm202_vm11 = vmor %vm200_vm10, %vm201_vm9  ;;  %vm210_vm13 = vweird.f32 %v173_v25 }
 0x1a6   :  { %v196_v30 = vmul.f32 %v4154_v24, %v195_v28  ;;  %v193_v31 = vsel %vm192_vm8, %v4152_v3, %v189_v27  ;;  %v399_v27 = vld [vmem:[%s6803_s8 + $0x10] sm:$0xff] }
 0x1a7   :  { %v215_v32 = vmul.f32 %v193_v31, %v4563_v37  ;;  %v398_v31 = vld [vmem:[%s6803_s8 + $0x8] sm:$0xff] }
 0x1a8   :  { %v197_v33 = vmul.f32 0.5, %v196_v30 }
 0x1a9   :  { %v220_v34 = vmul.f32 %v4138_v7, %v215_v32 }
 0x1aa   :  { %v198_v35 = vsub.f32 1.5, %v197_v33  ;;  %v397_v33 = vld [vmem:[%s6803_s8] sm:$0xff] }
 0x1ab   :  { %v4156_v36 = vpop.eup %4155  ;;  %v225_v38 = vadd.f32 %v4139_v16, %v220_v34  ;;  %v297_v61 = vpop.permute.xlu0 %296 }
 0x1ac   :  { %v199_v39 = vmul.f32 %v4154_v24, %v198_v35  ;;  %v205_v40 = vmul.f32 %v4156_v36, %v173_v25  ;;  %vm211_vm12 = vweird.f32 %v4156_v36  ;;  %v4662_v62 = vsel %vm281_vm15, %v4603_v8, %v297_v61 }
 0x1ad   :  { %3890 = vmatmul.msk.f32.gmra.mxu1 %vm122_vm1, %v225_v38  ;;  %vm212_vm14 = vmor %vm210_vm13, %vm211_vm12  ;;  %v317_v1 = vperm.slane %v4662_v62, 0  ;;  %v329_v8 = vperm.slane %v4662_v62, 1  ;;  %v346_v20 = vperm.slane %v4662_v62, 3 }
 0x1ae   :  { %v206_v41 = vmul.f32 %v4156_v36, %v205_v40  ;;  %v203_v43 = vsel %vm202_vm11, %v4154_v24, %v199_v39  ;;  %v400_v24 = vld [vmem:[%s6803_s8 + $0x18] sm:$0xff] }
 0x1af   :  { %v216_v44 = vmul.f32 %v203_v43, %v4570_v42  ;;  %v4632_v42 = vld [vmem:[%s6806_s11 + $0x8] sm:$0xff]  ;;  %425 = vmatpush.msra.mxu2 %v400_v24  ;;  %3941 = vmatpush.msra.mxu3 %v400_v24 }
 0x1b0   :  { %v207_v45 = vmul.f32 0.5, %v206_v41  ;;  %480 = vrot.lane.b32.xlu2 %v4632_v42, %s4406_s22 }
 0x1b1   :  { %v221_v46 = vmul.f32 %v4138_v7, %v216_v44  ;;  %426 = vmatpush.msra.mxu2 %v399_v27  ;;  %3942 = vmatpush.msra.mxu3 %v399_v27  ;;  %v633_v27 = vlaneseq }
 0x1b2   :  { %v208_v48 = vsub.f32 1.5, %v207_v45 }
 0x1b3   :  { %v226_v37 = vadd.f32 %v4139_v16, %v221_v46  ;;  %427 = vmatpush.msra.mxu2 %v398_v31  ;;  %3943 = vmatpush.msra.mxu3 %v398_v31 }
 0x1b4   :  { %v209_v49 = vmul.f32 %v4156_v36, %v208_v48 }
 0x1b5   :  { %3891 = vmatmul.msk.f32.gmra.mxu1 %vm122_vm1, %v226_v37  ;;  %428 = vmatpush.msra.mxu2 %v397_v33 }
 0x1b6   :  { %v213_v50 = vsel %vm212_vm14, %v4156_v36, %v209_v49  ;;  %3944 = vmatpush.msra.mxu3 %v397_v33  ;;  %vm1787_vm14 = vcmask 1043456  }
 0x1b7   :  { %v217_v51 = vmul.f32 %v213_v50, %v4577_v47 }
 0x1b9   :  { %v222_v52 = vmul.f32 %v4138_v7, %v217_v51 }
 0x1bb   :  { %v227_v53 = vadd.f32 %v4139_v16, %v222_v52  ;;  %v341_v16 = vperm.slane %v4662_v62, 2 }
 0x1bd   :  { %3892 = vmatmul.msk.f32.gmra.mxu1 %vm122_vm1, %v227_v53 }
 0x1fc   :  { %v4706_v36 = vpop.permute.xlu0 %478 }
 0x20a   :  { %v4656_v59 = vpop.permute.xlu2 %480 }
 0x222   :  { %v261_v47 = vpop.f32.mrf.mxu1 }
 0x223   :  { %286 = vrot.lane.b32.xlu1 %v261_v47, %s4406_s22 }
 0x22a   :  { %v4644_v55 = vpop.f32.mrf.mxu1 }
 0x22b   :  { %288 = vrot.lane.b32.xlu2 %v4644_v55, %s4406_s22 }
 0x232   :  { %v4648_v56 = vpop.f32.mrf.mxu1 }
 0x233   :  { %275 = vrot.lane.b32.xlu2 %v4648_v56, %s4406_s22 }
 0x23a   :  { %v4652_v57 = vpop.f32.mrf.mxu1 }
 0x23b   :  { %6864 = vst [vmem:[#allocation13_spill] sm:$0xff] %v4652_v57  ;;  %277 = vrot.lane.b32.xlu0 %v4652_v57, %s4406_s22 }
 0x285   :  { %v4658_v60 = vpop.permute.xlu2 %288 }
 0x286   :  { %6865 = vst [vmem:[#allocation14_spill] sm:$0xff] %v4658_v60 }
 0x28d   :  { %v276_v63 = vpop.permute.xlu2 %275 }
 0x28e   :  { %v4669_v2 = vsel %vm281_vm15, %v261_v47, %v276_v63 }
 0x28f   :  { %v311_v3 = vrot.slane %v4669_v2, 5  ;;  %v323_v4 = vrot.slane %v4669_v2, 6  ;;  %v335_v7 = vrot.slane %v4669_v2, 7  ;;  %v347_v30 = vmul.f32 %v346_v20, %v4669_v2 }
 0x291   :  { %v316_v9 = vsel %vm310_vm0, 0.0, %v311_v3  ;;  %v328_v14 = vsel %vm322_vm2, 0.0, %v323_v4  ;;  %v340_v19 = vsel %vm334_vm3, 0.0, %v335_v7 }
 0x292   :  { %v318_v11 = vmul.f32 %v317_v1, %v316_v9  ;;  %v330_v23 = vmul.f32 %v329_v8, %v328_v14  ;;  %v342_v26 = vmul.f32 %v341_v16, %v340_v19 }
 0x294   :  { %v320_v22 = vadd.f32 %v318_v11, %v306_v13 }
 0x296   :  { %v332_v25 = vadd.f32 %v330_v23, %v320_v22 }
 0x298   :  { %v344_v28 = vadd.f32 %v342_v26, %v332_v25 }
 0x29a   :  { %v349_v32 = vadd.f32 %v347_v30, %v344_v28  ;;  %v634_v28 = vshrl.u32 %v633_v27, 7 }
 0x29c   :  { %v351_v34 = vsub.f32 0.0, %v349_v32  ;;  %v4727_v30 = vadd.s32 72, %v634_v28  ;;  %v4729_v31 = vadd.s32 64, %v634_v28 }
 0x29e   :  { %v353_v35 = vmul.f32 1.442695, %v351_v34  ;;  %6868 = vst [vmem:[#allocation17_spill] sm:$0xff] %v4727_v30  ;;  %3953 = vset.pattern.permute.xlu0 %v4727_v30  ;;  %3954 = vset.pattern.permute.xlu2 %v4729_v31 }
 0x29f   :  { %6869 = vst [vmem:[#allocation18_spill] sm:$0xff] %v4729_v31  ;;  %3952 = vset.pattern.permute.xlu1 %v4729_v31 }
 0x2a0   :  { %4157 = vpow2.f32 %v353_v35 }
 0x2a6   :  { %v4158_v38 = vpop.eup %4157 }
 0x2a7   :  { %v357_v39 = vadd.f32 1.0, %v4158_v38 }
 0x2a9   :  { %4159 = vrcp.f32 %v357_v39  ;;  %v368_v58 = vand.u32 2147483647, %v357_v39  ;;  %v370_v61 = vand.u32 2147483648, %v357_v39  ;;  %vm364_vm5 = vweird.f32 %v357_v39 }
 0x2ab   :  { %vm369_vm7 = vcmp.eq.f32.partialorder %v368_v58, 8.507059e+37 }
 0x2ad   :  { %v278_v40 = vpop.permute.xlu0 %277 }
 0x2ae   :  { %v283_v41 = vsel %vm281_vm15, %v4644_v55, %v278_v40 }
 0x2af   :  { %v312_v43 = vrot.slane %v283_v41, 5  ;;  %v324_v44 = vrot.slane %v283_v41, 6  ;;  %v336_v45 = vrot.slane %v283_v41, 7  ;;  %v4160_v46 = vpop.eup %4159  ;;  %v348_v5 = vmul.f32 %v346_v20, %v283_v41 }
 0x2b0   :  { %v360_v50 = vmul.f32 %v4160_v46, %v357_v39  ;;  %vm365_vm4 = vweird.f32 %v4160_v46 }
 0x2b1   :  { %v313_v48 = vsel %vm310_vm0, %v311_v3, %v312_v43  ;;  %v325_v37 = vsel %vm322_vm2, %v323_v4, %v324_v44  ;;  %v337_v51 = vsel %vm334_vm3, %v335_v7, %v336_v45  ;;  %vm366_vm6 = vmor %vm364_vm5, %vm365_vm4  ;;  %v371_v4 = vor.u32 1.1754944e-38, %v370_v61 }
 0x2b2   :  { %v319_v49 = vmul.f32 %v317_v1, %v313_v48  ;;  %v331_v53 = vmul.f32 %v329_v8, %v325_v37  ;;  %v361_v47 = vsub.f32 1.0, %v360_v50  ;;  %v343_v63 = vmul.f32 %v341_v16, %v337_v51 }
 0x2b3   :  { %v4758_v37 = vadd.s32 88, %v634_v28 }
 0x2b4   :  { %v321_v52 = vadd.f32 %v319_v49, %v306_v13  ;;  %v362_v0 = vmul.f32 %v4160_v46, %v361_v47 }
 0x2b6   :  { %v333_v55 = vadd.f32 %v331_v53, %v321_v52  ;;  %v363_v3 = vadd.f32 %v4160_v46, %v362_v0 }
 0x2b8   :  { %v345_v2 = vadd.f32 %v343_v63, %v333_v55  ;;  %v367_v1 = vsel %vm366_vm6, %v4160_v46, %v363_v3  ;;  %v4753_v46 = vadd.s32 80, %v634_v28  ;;  %vm1789_vm6 = vcmask 1044480  }
 0x2b9   :  { %v372_v6 = vsel %vm369_vm7, %v371_v4, %v367_v1  ;;  %vm1791_vm7 = vcmask 1045504  }
 0x2ba   :  { %v350_v62 = vadd.f32 %v348_v5, %v345_v2  ;;  %v4715_v9 = vmul.f32 %v372_v6, %v349_v32  ;;  %v4734_v32 = vpop.permute.xlu1 %1804 }
 0x2bb   :  { %6870 = vst [vmem:[#allocation19_spill] sm:$0xff] %v4734_v32 }
 0x2bc   :  { %v352_v7 = vsub.f32 0.0, %v350_v62  ;;  %6866 = vst [vmem:[#allocation15_spill] sm:$0xff] %v4715_v9  ;;  %393 = vrot.lane.b32.xlu1 %v4715_v9, %s4406_s22  ;;  %3893 = vmatmul.msk.f32.vlgmr.msra.gmra.mxu2 %vm281_vm15, %v4715_v9 }
 0x2be   :  { %v355_v8 = vmul.f32 1.442695, %v352_v7  ;;  %v4869_v7 = vld [vmem:[%s6804_s9] ss:$0 sm:$0xff] }
 0x2c0   :  { %4161 = vpow2.f32 %v355_v8 }
 0x2c2   :  { %v4736_v33 = vpop.permute.xlu1 %286 }
 0x2c6   :  { %v4162_v10 = vpop.eup %4161 }
 0x2c7   :  { %v358_v11 = vadd.f32 1.0, %v4162_v10 }
 0x2c9   :  { %4163 = vrcp.f32 %v358_v11  ;;  %v385_v17 = vand.u32 2147483648, %v358_v11  ;;  %v383_v20 = vand.u32 2147483647, %v358_v11  ;;  %vm379_vm9 = vweird.f32 %v358_v11 }
 0x2cb   :  { %v386_v23 = vor.u32 1.1754944e-38, %v385_v17  ;;  %vm384_vm11 = vcmp.eq.f32.partialorder %v383_v20, 8.507059e+37 }
 0x2cf   :  { %v4164_v14 = vpop.eup %4163 }
 0x2d0   :  { %v375_v13 = vmul.f32 %v4164_v14, %v358_v11  ;;  %vm380_vm8 = vweird.f32 %v4164_v14 }
 0x2d1   :  { %vm381_vm10 = vmor %vm379_vm9, %vm380_vm8  ;;  %vm1793_vm9 = vcmask 1046528  }
 0x2d2   :  { %v376_v16 = vsub.f32 1.0, %v375_v13 }
 0x2d4   :  { %v377_v19 = vmul.f32 %v4164_v14, %v376_v16 }
 0x2d6   :  { %v378_v22 = vadd.f32 %v4164_v14, %v377_v19 }
 0x2d8   :  { %v382_v24 = vsel %vm381_vm10, %v4164_v14, %v378_v22 }
 0x2d9   :  { %v387_v25 = vsel %vm384_vm11, %v386_v23, %v382_v24 }
 0x2da   :  { %v4721_v26 = vmul.f32 %v387_v25, %v350_v62 }
 0x2dc   :  { %6867 = vst [vmem:[#allocation16_spill] sm:$0xff] %v4721_v26  ;;  %395 = vrot.lane.b32.xlu0 %v4721_v26, %s4406_s22  ;;  %3894 = vmatmul.msk.f32.gmra.mxu2 %vm281_vm15, %v4721_v26 }
 0x32e   :  { %v394_v34 = vpop.permute.xlu1 %393 }
 0x32f   :  { %3895 = vmatmul.msk.f32.vlgmr.msra.gmra.mxu3 %vm281_vm15, %v394_v34 }
 0x33f   :  { %v4739_v35 = vpop.f32.mrf.mxu2 }
 0x340   :  { %v645_v38 = vperm.slane %v4739_v35, 1  ;;  %v632_v39 = vperm.slane %v4739_v35, 0  ;;  %v658_v40 = vperm.slane %v4739_v35, 2  ;;  %v671_v43 = vperm.slane %v4739_v35, 3 }
 0x341   :  { %v684_v44 = vperm.slane %v4739_v35, 4  ;;  %v697_v45 = vperm.slane %v4739_v35, 5  ;;  %v710_v48 = vperm.slane %v4739_v35, 6  ;;  %v723_v49 = vperm.slane %v4739_v35, 7 }
 0x342   :  { %650 = vperm.xlu2 %3954, %v645_v38   ;;  %637 = vperm.xlu1 %3952, %v632_v39  }
 0x343   :  { %643 = vperm.xlu0 %3953, %v632_v39  }
 0x34a   :  { %663 = vperm.xlu2 %3954, %v658_v40   ;;  %3955 = vset.pattern.permute.xlu1 %v4727_v30 }
 0x34b   :  { %3956 = vset.pattern.permute.xlu0 %v4729_v31 }
 0x34e   :  { %v396_v41 = vpop.permute.xlu0 %395 }
 0x34f   :  { %3896 = vmatmul.msk.f32.gmra.mxu3 %vm281_vm15, %v396_v41 }
 0x352   :  { %3957 = vset.pattern.permute.xlu2 %v4727_v30  ;;  %656 = vperm.xlu1 %3955, %v645_v38  }
 0x353   :  { %676 = vperm.xlu0 %3956, %v671_v43  }
 0x35a   :  { %682 = vperm.xlu2 %3957, %v671_v43   ;;  %669 = vperm.xlu1 %3955, %v658_v40  }
 0x35b   :  { %3959 = vset.pattern.permute.xlu0 %v4727_v30 }
 0x35f   :  { %v4768_v50 = vpop.f32.mrf.mxu2 }
 0x360   :  { %6871 = vst [vmem:[#allocation20_spill] sm:$0xff] %v4768_v50  ;;  %v4771_v51 = vperm.slane %v4768_v50, 0  ;;  %v4777_v52 = vperm.slane %v4768_v50, 2  ;;  %v4783_v53 = vperm.slane %v4768_v50, 5  ;;  %v4790_v47 = vperm.slane %v4768_v50, 7 }
 0x361   :  { %v749_v58 = vperm.slane %v4768_v50, 1  ;;  %v4800_v61 = vperm.slane %v4768_v50, 4  ;;  %v775_v63 = vperm.slane %v4768_v50, 3  ;;  %v4824_v5 = vperm.slane %v4768_v50, 6 }
 0x362   :  { %695 = vperm.xlu2 %3957, %v684_v44   ;;  %3958 = vset.pattern.permute.xlu1 %v4729_v31  ;;  %6872 = vst [vmem:[#allocation21_spill] sm:$0xff] %v4790_v47 }
 0x363   :  { %708 = vperm.xlu0 %3959, %v697_v45  }
 0x36a   :  { %3960 = vset.pattern.permute.xlu2 %v4729_v31  ;;  %689 = vperm.xlu1 %3958, %v684_v44  }
 0x36b   :  { %3964 = vset.pattern.permute.xlu0 %v4753_v46 }
 0x372   :  { %715 = vperm.xlu2 %3960, %v710_v48   ;;  %702 = vperm.xlu1 %3958, %v697_v45  }
 0x373   :  { %868 = vperm.xlu0 %3964, %v658_v40  }
 0x37a   :  { %728 = vperm.xlu2 %3960, %v723_v49   ;;  %3961 = vset.pattern.permute.xlu1 %v4727_v30 }
 0x37b   :  { %3967 = vset.pattern.permute.xlu0 %v4758_v37 }
 0x382   :  { %3962 = vset.pattern.permute.xlu2 %v4753_v46  ;;  %721 = vperm.xlu1 %3961, %v710_v48  }
 0x383   :  { %898 = vperm.xlu0 %3967, %v684_v44  }
 0x38a   :  { %844 = vperm.xlu2 %3962, %v632_v39   ;;  %734 = vperm.xlu1 %3961, %v723_v49  }
 0x38b   :  { %3970 = vset.pattern.permute.xlu0 %v4753_v46 }
 0x392   :  { %856 = vperm.xlu2 %3962, %v645_v38   ;;  %3963 = vset.pattern.permute.xlu1 %v4758_v37 }
 0x393   :  { %928 = vperm.xlu0 %3970, %v723_v49  }
 0x39a   :  { %3965 = vset.pattern.permute.xlu2 %v4758_v37  ;;  %850 = vperm.xlu1 %3963, %v632_v39  }
 0x39b   :  { %3972 = vset.pattern.permute.xlu0 %v4729_v31 }
 0x39c   :  { %v4864_v6 = vpop.permute.xlu2 %650 }
 0x3a2   :  { %874 = vperm.xlu2 %3965, %v658_v40   ;;  %862 = vperm.xlu1 %3963, %v645_v38  }
 0x3a3   :  { %741 = vperm.xlu0 %3972, %v4771_v51  }
 0x3a4   :  { %v4881_v14 = vpop.permute.xlu2 %663 }
 0x3aa   :  { %886 = vperm.xlu2 %3965, %v671_v43   ;;  %3966 = vset.pattern.permute.xlu1 %v4753_v46 }
 0x3ab   :  { %3975 = vset.pattern.permute.xlu0 %v4727_v30 }
 0x3b2   :  { %3968 = vset.pattern.permute.xlu2 %v4753_v46  ;;  %880 = vperm.xlu1 %3966, %v671_v43   ;;  %v4807_v55 = vpop.f32.mrf.mxu3 }
 0x3b3   :  { %773 = vperm.xlu0 %3975, %v4777_v52   ;;  %v4811_v0 = vperm.slane %v4807_v55, 0  ;;  %v4818_v2 = vperm.slane %v4807_v55, 3  ;;  %v4830_v3 = vperm.slane %v4807_v55, 5  ;;  %v4839_v4 = vperm.slane %v4807_v55, 1 }
 0x3b4   :  { %v4848_v62 = vperm.slane %v4807_v55, 2  ;;  %v4860_v1 = vperm.slane %v4807_v55, 6  ;;  %v446_v8 = vadd.f32 %v4869_v7, %v4807_v55  ;;  %v4875_v10 = vpop.permute.xlu1 %637  ;;  %v4891_v17 = vpop.permute.xlu2 %682  ;;  %v4919_v28 = vperm.slane %v4807_v55, 4 }
 0x3ba   :  { %904 = vperm.xlu2 %3968, %v697_v45   ;;  %892 = vperm.xlu1 %3966, %v684_v44  }
 0x3bb   :  { %3978 = vset.pattern.permute.xlu0 %v4729_v31 }
 0x3bc   :  { %v4901_v22 = vpop.permute.xlu2 %695 }
 0x3c2   :  { %916 = vperm.xlu2 %3968, %v710_v48   ;;  %3969 = vset.pattern.permute.xlu1 %v4758_v37 }
 0x3c3   :  { %806 = vperm.xlu0 %3978, %v4783_v53  }
 0x3c4   :  { %v4887_v16 = vpop.permute.xlu1 %656 }
 0x3ca   :  { %3971 = vset.pattern.permute.xlu2 %v4758_v37  ;;  %910 = vperm.xlu1 %3969, %v697_v45  }
 0x3cb   :  { %3981 = vset.pattern.permute.xlu0 %v4727_v30 }
 0x3cc   :  { %v4899_v20 = vpop.permute.xlu1 %669  ;;  %v4908_v24 = vpop.permute.xlu2 %715 }
 0x3d2   :  { %934 = vperm.xlu2 %3971, %v723_v49   ;;  %922 = vperm.xlu1 %3969, %v710_v48   ;;  %v4879_v11 = vpop.f32.mrf.mxu3 }
 0x3d3   :  { %838 = vperm.xlu0 %3981, %v4790_v47   ;;  %v4884_v13 = vperm.slane %v4879_v11, 2  ;;  %v4894_v19 = vperm.slane %v4879_v11, 4  ;;  %v4911_v25 = vperm.slane %v4879_v11, 5  ;;  %v4929_v39 = vperm.slane %v4879_v11, 0 }
 0x3d4   :  { %v4922_v34 = vpop.permute.xlu2 %728  ;;  %v4946_v45 = vperm.slane %v4879_v11, 7 }
 0x3d5   :  { %6873 = vst [vmem:[#allocation22_spill] sm:$0xff] %v4894_v19 }
 0x3d6   :  { %6874 = vst [vmem:[#allocation23_spill] sm:$0xff] %v4922_v34 }
 0x3da   :  { %3973 = vset.pattern.permute.xlu2 %v4727_v30  ;;  %3974 = vset.pattern.permute.xlu1 %v4729_v31 }
 0x3db   :  { %3987 = vset.pattern.permute.xlu0 %v4758_v37 }
 0x3dc   :  { %v4906_v23 = vpop.permute.xlu1 %689 }
 0x3e2   :  { %754 = vperm.xlu1 %3974, %v749_v58   ;;  %747 = vperm.xlu2 %3973, %v4771_v51  }
 0x3e3   :  { %970 = vperm.xlu0 %3987, %v4777_v52  }
 0x3e4   :  { %v4916_v27 = vpop.permute.xlu1 %702  ;;  %v4932_v40 = vpop.permute.xlu2 %844 }
 0x3e5   :  { %6875 = vst [vmem:[#allocation24_spill] sm:$0xff] %v4932_v40 }
 0x3ea   :  { %767 = vperm.xlu1 %3974, %v4777_v52   ;;  %760 = vperm.xlu2 %3973, %v749_v58  }
 0x3eb   :  { %994 = vperm.xlu0 %3987, %v4800_v61  }
 0x3ec   :  { %v4941_v43 = vpop.permute.xlu2 %856 }
 0x3f2   :  { %3977 = vset.pattern.permute.xlu1 %v4727_v30  ;;  %3976 = vset.pattern.permute.xlu2 %v4729_v31 }
 0x3f3   :  { %3994 = vset.pattern.permute.xlu0 %v4727_v30 }
 0x3f4   :  { %v4926_v38 = vpop.permute.xlu1 %721 }
 0x3fa   :  { %786 = vperm.xlu1 %3977, %v775_v63   ;;  %780 = vperm.xlu2 %3976, %v775_v63  }
 0x3fb   :  { %1043 = vperm.xlu0 %3994, %v4811_v0  }
 0x3fc   :  { %v4936_v41 = vpop.permute.xlu1 %734  ;;  %v4951_v48 = vpop.permute.xlu2 %874 }
 0x3fd   :  { %6876 = vst [vmem:[#allocation25_spill] sm:$0xff] %v4936_v41 }
 0x402   :  { %799 = vperm.xlu1 %3977, %v4800_v61   ;;  %793 = vperm.xlu2 %3976, %v4800_v61  }
 0x403   :  { %3997 = vset.pattern.permute.xlu0 %v4729_v31 }
 0x40a   :  { %3980 = vset.pattern.permute.xlu1 %v4729_v31  ;;  %3979 = vset.pattern.permute.xlu2 %v4727_v30 }
 0x40b   :  { %1076 = vperm.xlu0 %3997, %v4818_v2  }
 0x40c   :  { %v4943_v44 = vpop.permute.xlu1 %850 }
 0x412   :  { %819 = vperm.xlu1 %3980, %v4824_v5   ;;  %812 = vperm.xlu2 %3979, %v4783_v53  }
 0x413   :  { %4000 = vset.pattern.permute.xlu0 %v4727_v30 }
 0x414   :  { %v4954_v49 = vpop.permute.xlu1 %862 }
 0x415   :  { %6877 = vst [vmem:[#allocation26_spill] sm:$0xff] %v4954_v49 }
 0x41a   :  { %832 = vperm.xlu1 %3980, %v4790_v47   ;;  %825 = vperm.xlu2 %3979, %v4824_v5  }
 0x41b   :  { %1108 = vperm.xlu0 %4000, %v4830_v3  }
 0x422   :  { %3982 = vset.pattern.permute.xlu1 %v4753_v46  ;;  %3983 = vset.pattern.permute.xlu2 %v4758_v37 }
 0x423   :  { %4005 = vset.pattern.permute.xlu0 %v4753_v46 }
 0x42a   :  { %940 = vperm.xlu1 %3982, %v4771_v51   ;;  %946 = vperm.xlu2 %3983, %v4771_v51   ;;  %v4958_v51 = vpop.permute.xlu2 %886 }
 0x42b   :  { %1256 = vperm.xlu0 %4005, %v4839_v4   ;;  %6878 = vst [vmem:[#allocation27_spill] sm:$0xff] %v4958_v51 }
 0x432   :  { %3985 = vset.pattern.permute.xlu1 %v4758_v37  ;;  %3984 = vset.pattern.permute.xlu2 %v4753_v46 }
 0x433   :  { %4010 = vset.pattern.permute.xlu0 %v4758_v37 }
 0x43a   :  { %958 = vperm.xlu1 %3985, %v749_v58   ;;  %952 = vperm.xlu2 %3984, %v749_v58  }
 0x43b   :  { %1274 = vperm.xlu0 %4010, %v4848_v62  }
 0x442   :  { %3986 = vset.pattern.permute.xlu1 %v4753_v46  ;;  %976 = vperm.xlu2 %3984, %v775_v63  }
 0x443   :  { %4013 = vset.pattern.permute.xlu0 %v4753_v46 }
 0x44a   :  { %964 = vperm.xlu1 %3986, %v4777_v52   ;;  %1000 = vperm.xlu2 %3984, %v4783_v53   ;;  %v4961_v52 = vpop.permute.xlu1 %880 }
 0x44b   :  { %1304 = vperm.xlu0 %4013, %v4830_v3   ;;  %6879 = vst [vmem:[#allocation28_spill] sm:$0xff] %v4961_v52 }
 0x452   :  { %3988 = vset.pattern.permute.xlu1 %v4758_v37  ;;  %3992 = vset.pattern.permute.xlu2 %v4758_v37  ;;  %v4970_v58 = vpop.permute.xlu1 %892 }
 0x453   :  { %4016 = vset.pattern.permute.xlu0 %v4758_v37  ;;  %6881 = vst [vmem:[#allocation30_spill] sm:$0xff] %v4970_v58 }
 0x45a   :  { %982 = vperm.xlu1 %3988, %v775_v63   ;;  %1018 = vperm.xlu2 %3992, %v4824_v5   ;;  %v4975_v63 = vperm.slane %v4879_v11, 6 }
 0x45b   :  { %1322 = vperm.xlu0 %4016, %v4860_v1  }
 0x45c   :  { %6883 = vst [vmem:[#allocation32_spill] sm:$0xff] %v4975_v63 }
 0x462   :  { %3989 = vset.pattern.permute.xlu1 %v4753_v46  ;;  %3995 = vset.pattern.permute.xlu2 %v4729_v31 }
 0x463   :  { %450 = vrot.lane.b32.xlu2 %v446_v8, %s4406_s22  ;;  %4023 = vset.pattern.permute.xlu0 %v4729_v31 }
 0x46a   :  { %988 = vperm.xlu1 %3989, %v4800_v61  }
 0x46b   :  { %1050 = vperm.xlu2 %3995, %v4839_v4   ;;  %1167 = vperm.xlu0 %4023, %v4884_v13  }
 0x472   :  { %3990 = vset.pattern.permute.xlu1 %v4758_v37 }
 0x473   :  { %1063 = vperm.xlu2 %3995, %v4848_v62   ;;  %1193 = vperm.xlu0 %4023, %v4894_v19  }
 0x47a   :  { %1006 = vperm.xlu1 %3990, %v4783_v53   ;;  %v4965_v53 = vpop.permute.xlu2 %904 }
 0x47b   :  { %3998 = vset.pattern.permute.xlu2 %v4727_v30  ;;  %4026 = vset.pattern.permute.xlu0 %v4727_v30  ;;  %6880 = vst [vmem:[#allocation29_spill] sm:$0xff] %v4965_v53 }
 0x482   :  { %3991 = vset.pattern.permute.xlu1 %v4753_v46  ;;  %v4972_v61 = vpop.permute.xlu2 %916 }
 0x483   :  { %1082 = vperm.xlu2 %3998, %v4818_v2   ;;  %1212 = vperm.xlu0 %4026, %v4911_v25   ;;  %6882 = vst [vmem:[#allocation31_spill] sm:$0xff] %v4972_v61 }
 0x48a   :  { %1012 = vperm.xlu1 %3991, %v4824_v5   ;;  %v4980_v5 = vpop.permute.xlu1 %910  ;;  %v4982_v8 = vpop.permute.xlu2 %934 }
 0x48b   :  { %1095 = vperm.xlu2 %3998, %v4919_v28   ;;  %4029 = vset.pattern.permute.xlu0 %v4753_v46  ;;  %6884 = vst [vmem:[#allocation33_spill] sm:$0xff] %v4980_v5 }
 0x48c   :  { %6885 = vst [vmem:[#allocation34_spill] sm:$0xff] %v4982_v8 }
 0x492   :  { %3993 = vset.pattern.permute.xlu1 %v4729_v31  ;;  %v4990_v21 = vpop.permute.xlu1 %922  ;;  %v4992_v18 = vpop.permute.xlu2 %747 }
 0x493   :  { %4001 = vset.pattern.permute.xlu2 %v4729_v31  ;;  %1340 = vperm.xlu0 %4029, %v4929_v39   ;;  %6886 = vst [vmem:[#allocation35_spill] sm:$0xff] %v4990_v21 }
 0x494   :  { %6887 = vst [vmem:[#allocation36_spill] sm:$0xff] %v4992_v18 }
 0x49a   :  { %1037 = vperm.xlu1 %3993, %v4811_v0   ;;  %v4996_v15 = vpop.permute.xlu1 %754 }
 0x49b   :  { %1115 = vperm.xlu2 %4001, %v4860_v1   ;;  %4034 = vset.pattern.permute.xlu0 %v4729_v31  ;;  %6888 = vst [vmem:[#allocation37_spill] sm:$0xff] %v4996_v15 }
 0x4a2   :  { %3996 = vset.pattern.permute.xlu1 %v4727_v30  ;;  %v5002_v29 = vpop.permute.xlu1 %767 }
 0x4a3   :  { %4003 = vset.pattern.permute.xlu2 %v4753_v46  ;;  %1232 = vperm.xlu0 %4034, %v4946_v45   ;;  %6890 = vst [vmem:[#allocation39_spill] sm:$0xff] %v5002_v29 }
 0x4aa   :  { %1056 = vperm.xlu1 %3996, %v4839_v4   ;;  %v5008_v60 = vpop.permute.xlu1 %786 }
 0x4ab   :  { %1244 = vperm.xlu2 %4003, %v4811_v0   ;;  %4040 = vset.pattern.permute.xlu0 %v4753_v46  ;;  %6892 = vst [vmem:[#allocation41_spill] sm:$0xff] %v5008_v60 }
 0x4b2   :  { %1069 = vperm.xlu1 %3996, %v4848_v62  }
 0x4b3   :  { %4006 = vset.pattern.permute.xlu2 %v4758_v37  ;;  %1400 = vperm.xlu0 %4040, %v4911_v25  }
 0x4ba   :  { %3999 = vset.pattern.permute.xlu1 %v4729_v31 }
 0x4bb   :  { %1262 = vperm.xlu2 %4006, %v4839_v4   ;;  %4043 = vset.pattern.permute.xlu0 %v4758_v37  ;;  %v4985_v4 = vperm.slane %v4807_v55, 7  ;;  %v4999_v55 = vpop.permute.xlu2 %760 }
 0x4bc   :  { %6889 = vst [vmem:[#allocation38_spill] sm:$0xff] %v4999_v55  ;;  %v5015_v55 = vpop.permute.xlu1 %799 }
 0x4bd   :  { %6894 = vst [vmem:[#allocation43_spill] sm:$0xff] %v5015_v55 }
 0x4c2   :  { %1089 = vperm.xlu1 %3999, %v4919_v28  }
 0x4c3   :  { %4008 = vset.pattern.permute.xlu2 %v4727_v30  ;;  %1418 = vperm.xlu0 %4043, %v4975_v63   ;;  %v5005_v12 = vpop.permute.xlu2 %780 }
 0x4c4   :  { %6891 = vst [vmem:[#allocation40_spill] sm:$0xff] %v5005_v12  ;;  %v5021_v12 = vpop.permute.xlu1 %819 }
 0x4c5   :  { %6896 = vst [vmem:[#allocation45_spill] sm:$0xff] %v5021_v12  ;;  %v5038_v12 = vpop.permute.xlu0 %643 }
 0x4ca   :  { %1102 = vperm.xlu1 %3999, %v4830_v3  }
 0x4cb   :  { %1134 = vperm.xlu2 %4008, %v4985_v4   ;;  %4047 = vset.pattern.permute.xlu0 %v4727_v30  ;;  %v5012_v57 = vpop.permute.xlu2 %793 }
 0x4cc   :  { %6893 = vst [vmem:[#allocation42_spill] sm:$0xff] %v5012_v57 }
 0x4cd   :  { %v5044_v55 = vpop.permute.xlu0 %676 }
 0x4d2   :  { %4002 = vset.pattern.permute.xlu1 %v4727_v30 }
 0x4d3   :  { %4011 = vset.pattern.permute.xlu2 %v4753_v46  ;;  %v5018_v29 = vpop.permute.xlu2 %812 }
 0x4d4   :  { %6895 = vst [vmem:[#allocation44_spill] sm:$0xff] %v5018_v29 }
 0x4da   :  { %1121 = vperm.xlu1 %4002, %v4860_v1  }
 0x4db   :  { %1280 = vperm.xlu2 %4011, %v4818_v2   ;;  %v5024_v60 = vpop.permute.xlu2 %825 }
 0x4dc   :  { %6897 = vst [vmem:[#allocation46_spill] sm:$0xff] %v5024_v60 }
 0x4e2   :  { %4004 = vset.pattern.permute.xlu1 %v4758_v37 }
 0x4e3   :  { %1292 = vperm.xlu2 %4011, %v4919_v28   ;;  %v5030_v57 = vpop.permute.xlu2 %946 }
 0x4e4   :  { %6899 = vst [vmem:[#allocation48_spill] sm:$0xff] %v5030_v57  ;;  %v5052_v57 = vpop.permute.xlu0 %708 }
 0x4ea   :  { %1250 = vperm.xlu1 %4004, %v4811_v0   ;;  %v5028_v0 = vpop.permute.xlu1 %832 }
 0x4eb   :  { %4014 = vset.pattern.permute.xlu2 %v4758_v37  ;;  %6898 = vst [vmem:[#allocation47_spill] sm:$0xff] %v5028_v0  ;;  %v5036_v29 = vpop.permute.xlu2 %952 }
 0x4ec   :  { %6901 = vst [vmem:[#allocation50_spill] sm:$0xff] %v5036_v29  ;;  %v5055_v29 = vperm.slane %v4879_v11, 1 }
 0x4f2   :  { %4007 = vset.pattern.permute.xlu1 %v4729_v31 }
 0x4f3   :  { %1310 = vperm.xlu2 %4014, %v4830_v3   ;;  %v5034_v3 = vpop.permute.xlu1 %940  ;;  %v5046_v0 = vpop.permute.xlu2 %976 }
 0x4f4   :  { %6900 = vst [vmem:[#allocation49_spill] sm:$0xff] %v5034_v3 }
 0x4f5   :  { %6903 = vst [vmem:[#allocation52_spill] sm:$0xff] %v5046_v0  ;;  %v5063_v0 = vpop.permute.xlu0 %868 }
 0x4fa   :  { %1128 = vperm.xlu1 %4007, %v4985_v4  }
 0x4fb   :  { %4017 = vset.pattern.permute.xlu2 %v4753_v46  ;;  %v5042_v60 = vpop.permute.xlu1 %958  ;;  %v5058_v3 = vpop.permute.xlu2 %1000 }
 0x4fc   :  { %6902 = vst [vmem:[#allocation51_spill] sm:$0xff] %v5042_v60 }
 0x4fd   :  { %6905 = vst [vmem:[#allocation54_spill] sm:$0xff] %v5058_v3  ;;  %v5071_v15 = vpop.permute.xlu0 %898 }
 0x4fe   :  { %6909 = vst [vmem:[#allocation58_spill] sm:$0xff] %v5071_v15 }
 0x502   :  { %4009 = vset.pattern.permute.xlu1 %v4753_v46 }
 0x503   :  { %1328 = vperm.xlu2 %4017, %v4985_v4  }
 0x505   :  { %v5080_v26 = vpop.permute.xlu0 %928 }
 0x506   :  { %6911 = vst [vmem:[#allocation60_spill] sm:$0xff] %v5080_v26 }
 0x50a   :  { %1268 = vperm.xlu1 %4009, %v4848_v62   ;;  %v5050_v62 = vpop.permute.xlu1 %964 }
 0x50b   :  { %4020 = vset.pattern.permute.xlu2 %v4727_v30  ;;  %6904 = vst [vmem:[#allocation53_spill] sm:$0xff] %v5050_v62 }
 0x50d   :  { %v5089_v47 = vpop.permute.xlu0 %741 }
 0x50e   :  { %6913 = vst [vmem:[#allocation62_spill] sm:$0xff] %v5089_v47 }
 0x512   :  { %4012 = vset.pattern.permute.xlu1 %v4758_v37  ;;  %v5061_v60 = vpop.permute.xlu1 %982 }
 0x513   :  { %1147 = vperm.xlu2 %4020, %v4929_v39   ;;  %6906 = vst [vmem:[#allocation55_spill] sm:$0xff] %v5061_v60  ;;  %v444_v60 = vadd.f32 %v4869_v7, %v4739_v35 }
 0x51a   :  { %1286 = vperm.xlu1 %4012, %v4818_v2   ;;  %v5066_v2 = vpop.permute.xlu2 %1018  ;;  %v5069_v62 = vpop.permute.xlu1 %988 }
 0x51b   :  { %4021 = vset.pattern.permute.xlu2 %v4729_v31  ;;  %6907 = vst [vmem:[#allocation56_spill] sm:$0xff] %v5066_v2  ;;  %v5083_v2 = vperm.slane %v4879_v11, 3 }
 0x51c   :  { %6908 = vst [vmem:[#allocation57_spill] sm:$0xff] %v5069_v62 }
 0x522   :  { %1298 = vperm.xlu1 %4012, %v4919_v28   ;;  %v451_v28 = vpop.permute.xlu2 %450  ;;  %v5075_v3 = vpop.permute.xlu1 %1006 }
 0x523   :  { %1154 = vperm.xlu2 %4021, %v5055_v29   ;;  %6910 = vst [vmem:[#allocation59_spill] sm:$0xff] %v5075_v3  ;;  %v456_v18 = vsel %vm281_vm15, %v444_v60, %v451_v28  ;;  %v5093_v28 = vpop.permute.xlu0 %773  ;;  %v447_v3 = vadd.f32 %v4869_v7, %v4879_v11 }
 0x524   :  { %v460_v62 = vmin.f32 %v456_v18, 20.0  ;;  %6914 = vst [vmem:[#allocation63_spill] sm:$0xff] %v5093_v28  ;;  %vm458_vm12 = vcmp.gt.f32.partialorder %v456_v18, 20.0 }
 0x526   :  { %v462_v50 = vmul.f32 1.442695, %v460_v62 }
 0x528   :  { %4165 = vpow2.f32 %v462_v50 }
 0x52a   :  { %4015 = vset.pattern.permute.xlu1 %v4753_v46  ;;  %v5097_v32 = vpop.permute.xlu2 %1050 }
 0x52b   :  { %4024 = vset.pattern.permute.xlu2 %v4727_v30  ;;  %v5104_v50 = vpop.permute.xlu0 %806 }
 0x52c   :  { %6915 = vst [vmem:[#allocation64_spill] sm:$0xff] %v5104_v50 }
 0x52e   :  { %v4166_v35 = vpop.eup %4165 }
 0x52f   :  { %v466_v62 = vadd.f32 1.0, %v4166_v35 }
 0x531   :  { %4167 = vlog2.f32 %v466_v62 }
 0x532   :  { %1316 = vperm.xlu1 %4015, %v4860_v1   ;;  %v5087_v1 = vpop.permute.xlu1 %1012 }
 0x533   :  { %1173 = vperm.xlu2 %4024, %v4884_v13   ;;  %6912 = vst [vmem:[#allocation61_spill] sm:$0xff] %v5087_v1  ;;  %v5108_v1 = vpop.permute.xlu2 %1063  ;;  %v5112_v28 = vpop.permute.xlu0 %838 }
 0x534   :  { %6916 = vst [vmem:[#allocation65_spill] sm:$0xff] %v5112_v28  ;;  %v5128_v28 = vsel %vm281_vm15, %v4632_v42, %v4656_v59 }
 0x537   :  { %v4168_v7 = vpop.eup %4167 }
 0x53a   :  { %4018 = vset.pattern.permute.xlu1 %v4758_v37  ;;  %v1038_v60 = vpop.permute.xlu1 %1037 }
 0x53b   :  { %1186 = vperm.xlu2 %4024, %v5083_v2   ;;  %v5116_v35 = vpop.permute.xlu2 %1082  ;;  %v5123_v8 = vpop.permute.xlu0 %970 }
 0x53c   :  { %6917 = vst [vmem:[#allocation66_spill] sm:$0xff] %v5123_v8 }
 0x542   :  { %1334 = vperm.xlu1 %4018, %v4985_v4   ;;  %v5102_v4 = vpop.permute.xlu1 %1056 }
 0x543   :  { %1199 = vperm.xlu2 %4024, %v4894_v19   ;;  %v5140_v26 = vpop.permute.xlu2 %1095  ;;  %v5144_v34 = vpop.permute.xlu0 %994 }
 0x544   :  { %6918 = vst [vmem:[#allocation67_spill] sm:$0xff] %v5144_v34  ;;  %v1432_v34 = vsel %vm281_vm15, %v4875_v10, %v1038_v60 }
 0x54a   :  { %4019 = vset.pattern.permute.xlu1 %v4729_v31  ;;  %v5110_v11 = vpop.permute.xlu1 %1069 }
 0x54b   :  { %452 = vrot.lane.b32.xlu1 %v447_v3, %s4406_s22  ;;  %4027 = vset.pattern.permute.xlu2 %v4729_v31  ;;  %v469_v3 = vmul.f32 0.6931472, %v4168_v7 }
 0x54d   :  { %v5118_v62 = vsel %vm458_vm12, %v456_v18, %v469_v3  ;;  %v5135_v18 = vsel %vm281_vm15, %v4639_v54, %v4706_v36 }
 0x54e   :  { %v502_v47 = vperm.slane %v5118_v62, 0  ;;  %v488_v3 = vrot.slane %v5118_v62, 1  ;;  %v489_v54 = vrot.slane %v5118_v62, 2 }
 0x550   :  { %v535_v7 = vmul.f32 %v502_v47, %v5128_v28  ;;  %v534_v8 = vmul.f32 %v502_v47, %v5135_v18  ;;  %v503_v42 = vperm.slane %v488_v3, 0  ;;  %v5152_v47 = vmul.f32 %v5118_v62, %v4715_v9  ;;  %v1044_v9 = vpop.permute.xlu0 %1043 }
 0x552   :  { %v5120_v50 = vpop.permute.xlu1 %1089  ;;  %v568_v41 = vmul.f32 1.442695, %v535_v7  ;;  %v566_v59 = vmul.f32 1.442695, %v534_v8  ;;  %v536_v36 = vmul.f32 %v503_v42, %v5135_v18  ;;  %v537_v8 = vmul.f32 %v503_v42, %v5128_v28 }
 0x553   :  { %1141 = vperm.xlu1 %4019, %v4929_v39   ;;  %1219 = vperm.xlu2 %4027, %v4975_v63   ;;  %v504_v7 = vperm.slane %v489_v54, 0 }
 0x554   :  { %4169 = vpow2.f32 %v568_v41  ;;  %v570_v3 = vmul.f32 1.442695, %v536_v36  ;;  %v1512_v41 = vperm.slane %v5152_v47, 0  ;;  %v572_v21 = vmul.f32 1.442695, %v537_v8 }
 0x555   :  { %4171 = vpow2.f32 %v566_v59  ;;  %v490_v59 = vrot.slane %v5118_v62, 3  ;;  %v539_v54 = vmul.f32 %v504_v7, %v5128_v28  ;;  %v1498_v36 = vrot.slane %v5152_v47, 1 }
 0x556   :  { %v1544_v42 = vmul.f32 %v1512_v41, %v1432_v34  ;;  %v538_v10 = vmul.f32 %v504_v7, %v5135_v18  ;;  %4173 = vpow2.f32 %v570_v3  ;;  %v1433_v8 = vsel %vm281_vm15, %v5038_v12, %v1044_v9 }
 0x557   :  { %4175 = vpow2.f32 %v572_v21  ;;  %v505_v52 = vperm.slane %v490_v59, 0  ;;  %v1545_v15 = vmul.f32 %v1512_v41, %v1433_v8  ;;  %v1435_v34 = vsel %vm281_vm15, %v4887_v16, %v5102_v4 }
 0x558   :  { %v576_v40 = vmul.f32 1.442695, %v539_v54  ;;  %v1513_v51 = vperm.slane %v1498_v36, 0  ;;  %v574_v7 = vmul.f32 1.442695, %v538_v10  ;;  %v491_v12 = vrot.slane %v5118_v62, 4 }
 0x559   :  { %v541_v9 = vmul.f32 %v505_v52, %v5128_v28  ;;  %v1434_v4 = vsel %vm281_vm15, %v4864_v6, %v5097_v32  ;;  %v1437_v8 = vsel %vm281_vm15, %v4899_v20, %v5110_v11  ;;  %v5215_v11 = vsel %vm281_vm15, %v4736_v33, %v4648_v56 }
 0x55a   :  { %v5142_v19 = vpop.permute.xlu1 %1102  ;;  %v4170_v53 = vpop.eup %4169  ;;  %v1547_v41 = vmul.f32 %v1513_v51, %v1435_v34  ;;  %4177 = vpow2.f32 %v576_v40  ;;  %v1546_v54 = vmul.f32 %v1513_v51, %v1434_v4  ;;  %v506_v10 = vperm.slane %v491_v12, 0 }
 0x55b   :  { %4022 = vset.pattern.permute.xlu1 %v4727_v30  ;;  %4030 = vset.pattern.permute.xlu2 %v4758_v37  ;;  %v4172_v61 = vpop.eup %4171  ;;  %v1577_v60 = vmul.f32 0.0, %v4170_v53  ;;  %4179 = vpow2.f32 %v574_v7  ;;  %v1813_v33 = vsub.f32 0.0, %v5215_v11 }
 0x55c   :  { %v1576_v58 = vmul.f32 0.0, %v4172_v61  ;;  %v4174_v21 = vpop.eup %4173  ;;  %v5183_v61 = vpop.permute.xlu0 %1076  ;;  %v543_v51 = vmul.f32 %v506_v10, %v5128_v28 }
 0x55d   :  { %v5177_v3 = vadd.f32 %v1577_v60, %v1545_v15  ;;  %v4176_v16 = vpop.eup %4175  ;;  %v580_v60 = vmul.f32 1.442695, %v541_v9 }
 0x55e   :  { %v5172_v49 = vadd.f32 %v1576_v58, %v1544_v42  ;;  %v1499_v58 = vrot.slane %v5152_v47, 2  ;;  %v540_v42 = vmul.f32 %v505_v52, %v5135_v18  ;;  %v492_v52 = vrot.slane %v5118_v62, 5 }
 0x55f   :  { %v1590_v59 = vmul.f32 %v4176_v16, %v5177_v3  ;;  %4181 = vpow2.f32 %v580_v60 }
 0x560   :  { %v1589_v15 = vmul.f32 %v4174_v21, %v5172_v49  ;;  %v1514_v34 = vperm.slane %v1499_v58, 0  ;;  %v578_v6 = vmul.f32 1.442695, %v540_v42  ;;  %v4178_v16 = vpop.eup %4177  ;;  %v1436_v58 = vsel %vm281_vm15, %v4881_v14, %v5108_v1 }
 0x561   :  { %v5199_v40 = vadd.f32 %v1590_v59, %v1547_v41  ;;  %v4180_v12 = vpop.eup %4179  ;;  %v542_v59 = vmul.f32 %v506_v10, %v5135_v18  ;;  %v1439_v14 = vsel %vm281_vm15, %v4891_v17, %v5116_v35  ;;  %v493_v10 = vrot.slane %v5118_v62, 6 }
 0x562   :  { %v5201_v21 = vadd.f32 %v1589_v15, %v1546_v54  ;;  %v1549_v32 = vmul.f32 %v1514_v34, %v1437_v8  ;;  %v1500_v15 = vrot.slane %v5152_v47, 3  ;;  %4183 = vpow2.f32 %v578_v6 }
 0x563   :  { %1160 = vperm.xlu1 %4022, %v5055_v29   ;;  %1346 = vperm.xlu2 %4030, %v4929_v39   ;;  %v5154_v39 = vpop.permute.xlu2 %1115  ;;  %v1603_v20 = vmul.f32 %v4178_v16, %v5199_v40  ;;  %v1548_v42 = vmul.f32 %v1514_v34, %v1436_v58  ;;  %v584_v54 = vmul.f32 1.442695, %v543_v51  ;;  %v507_v8 = vperm.slane %v492_v52, 0 }
 0x564   :  { %v5207_v9 = vpop.permute.xlu0 %1108  ;;  %v1602_v41 = vmul.f32 %v4180_v12, %v5201_v21  ;;  %v1515_v16 = vperm.slane %v1500_v15, 0  ;;  %v582_v12 = vmul.f32 1.442695, %v542_v59  ;;  %v1815_v17 = vmul.f32 1.442695, %v1813_v33 }
 0x565   :  { %v5222_v4 = vadd.f32 %v1603_v20, %v1549_v32  ;;  %v4182_v56 = vpop.eup %4181  ;;  %4185 = vpow2.f32 %v584_v54  ;;  %v545_v6 = vmul.f32 %v507_v8, %v5128_v28  ;;  %v544_v58 = vmul.f32 %v507_v8, %v5135_v18 }
 0x566   :  { %v5231_v1 = vadd.f32 %v1602_v41, %v1548_v42  ;;  %v1551_v20 = vmul.f32 %v1515_v16, %v1439_v14  ;;  %v1501_v35 = vrot.slane %v5152_v47, 4  ;;  %v1438_v15 = vsel %vm281_vm15, %v5044_v55, %v5183_v61 }
 0x567   :  { %v1616_v32 = vmul.f32 %v4182_v56, %v5222_v4  ;;  %4187 = vpow2.f32 %v582_v12  ;;  %v508_v42 = vperm.slane %v493_v10, 0  ;;  %v1550_v54 = vmul.f32 %v1515_v16, %v1438_v15 }
 0x568   :  { %v4184_v51 = vpop.eup %4183  ;;  %v588_v8 = vmul.f32 1.442695, %v545_v6  ;;  %v1440_v33 = vsel %vm281_vm15, %v4906_v23, %v5120_v50  ;;  %v586_v14 = vmul.f32 1.442695, %v544_v58  ;;  %4189 = vpow2.f32 %v1815_v17 }
 0x569   :  { %v1615_v41 = vmul.f32 %v4184_v51, %v5231_v1  ;;  %v5246_v59 = vadd.f32 %v1616_v32, %v1551_v20  ;;  %v1516_v51 = vperm.slane %v1501_v35, 0  ;;  %v1441_v55 = vsel %vm281_vm15, %v4901_v22, %v5140_v26 }
 0x56a   :  { %v546_v16 = vmul.f32 %v508_v42, %v5135_v18  ;;  %v1502_v6 = vrot.slane %v5152_v47, 5  ;;  %v547_v23 = vmul.f32 %v508_v42, %v5128_v28  ;;  %4191 = vpow2.f32 %v588_v8 }
 0x56b   :  { %4025 = vset.pattern.permute.xlu1 %v4729_v31  ;;  %1358 = vperm.xlu2 %4030, %v5055_v29   ;;  %v5159_v31 = vpop.permute.xlu1 %1121  ;;  %v5170_v5 = vpop.permute.xlu2 %1244  ;;  %v5256_v61 = vadd.f32 %v1615_v41, %v1550_v54  ;;  %v1552_v10 = vmul.f32 %v1516_v51, %v1440_v33  ;;  %v1553_v58 = vmul.f32 %v1516_v51, %v1441_v55  ;;  %4193 = vpow2.f32 %v586_v14 }
 0x56c   :  { %v1257_v52 = vpop.permute.xlu0 %1256  ;;  %v590_v22 = vmul.f32 1.442695, %v546_v16  ;;  %v1442_v17 = vsel %vm281_vm15, %v4916_v27, %v5142_v19  ;;  %v1517_v42 = vperm.slane %v1502_v6, 0  ;;  %v592_v54 = vmul.f32 1.442695, %v547_v23 }
 0x56d   :  { %v1503_v8 = vrot.slane %v5152_v47, 6  ;;  %v1443_v19 = vsel %vm281_vm15, %v5052_v57, %v5207_v9  ;;  %v1466_v27 = vsel %vm281_vm15, %v4941_v43, %v1257_v52  ;;  %v1445_v43 = vsel %vm281_vm15, %v4926_v38, %v5159_v31  ;;  %v6919_v9 = vld [vmem:[#allocation27_spill] sm:$0xff]  ;;  %v6921_v38 = vld [vmem:[#allocation26_spill] sm:$0xff] }
 0x56e   :  { %v1554_v14 = vmul.f32 %v1517_v42, %v1442_v17  ;;  %4195 = vpow2.f32 %v590_v22  ;;  %v1555_v23 = vmul.f32 %v1517_v42, %v1443_v19  ;;  %v6924_v17 = vld [vmem:[#allocation30_spill] sm:$0xff] }
 0x56f   :  { %4197 = vpow2.f32 %v592_v54  ;;  %v1518_v6 = vperm.slane %v1503_v8, 0 }
 0x571   :  { %v1557_v42 = vmul.f32 %v1518_v6, %v1445_v43 }
 0x573   :  { %1180 = vperm.xlu1 %4025, %v5083_v2   ;;  %4032 = vset.pattern.permute.xlu2 %v4753_v46  ;;  %v5179_v53 = vpop.permute.xlu1 %1250  ;;  %v5194_v36 = vpop.permute.xlu2 %1262 }
 0x574   :  { %v1275_v20 = vpop.permute.xlu0 %1274 }
 0x575   :  { %v1469_v16 = vsel %vm281_vm15, %v4951_v48, %v1275_v20  ;;  %v6920_v20 = vld [vmem:[#allocation24_spill] sm:$0xff] }
 0x576   :  { %v1464_v31 = vsel %vm281_vm15, %v6920_v20, %v5170_v5  ;;  %v1607_v19 = vmul.f32 %v5222_v4, %v1469_v16 }
 0x57b   :  { %1206 = vperm.xlu1 %4025, %v4911_v25   ;;  %1364 = vperm.xlu2 %4032, %v4884_v13   ;;  %v5203_v7 = vpop.permute.xlu1 %1128  ;;  %v5225_v60 = vpop.permute.xlu2 %1134 }
 0x583   :  { %4028 = vset.pattern.permute.xlu1 %v4727_v30  ;;  %4035 = vset.pattern.permute.xlu2 %v4727_v30  ;;  %v5235_v34 = vpop.permute.xlu1 %1268  ;;  %v5248_v56 = vpop.permute.xlu2 %1280 }
 0x584   :  { %v4186_v30 = vpop.eup %4185  ;;  %v1468_v48 = vsel %vm281_vm15, %v5063_v0, %v5235_v34  ;;  %v6922_v34 = vld [vmem:[#allocation58_spill] sm:$0xff] }
 0x585   :  { %v1629_v32 = vmul.f32 %v4186_v30, %v5246_v59  ;;  %v4188_v50 = vpop.eup %4187  ;;  %v494_v30 = vrot.slane %v5118_v62, 7  ;;  %v1606_v5 = vmul.f32 %v5231_v1, %v1468_v48 }
 0x586   :  { %v1628_v26 = vmul.f32 %v4188_v50, %v5256_v61  ;;  %v4190_v41 = vpop.eup %4189 }
 0x587   :  { %v1631_v35 = vadd.f32 %v1629_v32, %v1553_v58  ;;  %v4192_v33 = vpop.eup %4191  ;;  %v509_v55 = vperm.slane %v494_v30, 0  ;;  %v5270_v50 = vadd.f32 1.0, %v4190_v41  ;;  %v1465_v58 = vsel %vm281_vm15, %v4943_v44, %v5179_v53 }
 0x588   :  { %v1630_v15 = vadd.f32 %v1628_v26, %v1552_v10  ;;  %v1305_v10 = vpop.permute.xlu0 %1304  ;;  %v1444_v44 = vsel %vm281_vm15, %v4908_v24, %v5154_v39  ;;  %v1467_v30 = vsel %vm281_vm15, %v6921_v38, %v5194_v36  ;;  %v1581_v0 = vmul.f32 %v5177_v3, %v1465_v58  ;;  %v6923_v39 = vld [vmem:[#allocation28_spill] sm:$0xff] }
 0x589   :  { %v1642_v62 = vmul.f32 %v4192_v33, %v1631_v35  ;;  %v549_v52 = vmul.f32 %v509_v55, %v5128_v28  ;;  %v1594_v8 = vmul.f32 %v5199_v40, %v1467_v30  ;;  %v1580_v3 = vmul.f32 %v5172_v49, %v1464_v31  ;;  %v6925_v40 = vld [vmem:[#allocation33_spill] sm:$0xff] }
 0x58a   :  { %v1608_v48 = vadd.f32 %v1607_v19, %v1606_v5  ;;  %4199 = vrcp.f32 %v5270_v50  ;;  %v6928_v31 = vld [vmem:[#allocation29_spill] sm:$0xff]  ;;  %v1504_v30 = vrot.slane %v5152_v47, 7  ;;  %v6930_v47 = vld [vmem:[#allocation22_spill] sm:$0xff]  ;;  %vm1826_vm4 = vweird.f32 %v5270_v50 }
 0x58b   :  { %1225 = vperm.xlu1 %4028, %v4975_v63   ;;  %1238 = vperm.xlu2 %4035, %v4946_v45   ;;  %v1293_v51 = vpop.permute.xlu2 %1292  ;;  %v4194_v63 = vpop.eup %4193  ;;  %v1644_v53 = vadd.f32 %v1642_v62, %v1555_v23  ;;  %v1582_v1 = vadd.f32 %v1581_v0, %v1580_v3  ;;  %v1474_v38 = vsel %vm281_vm15, %v6928_v31, %v1305_v10 }
 0x58c   :  { %v1287_v12 = vpop.permute.xlu1 %1286  ;;  %v1641_v32 = vmul.f32 %v4194_v63, %v1630_v15  ;;  %v548_v63 = vmul.f32 %v509_v55, %v5135_v18  ;;  %v4196_v24 = vpop.eup %4195  ;;  %v1472_v41 = vsel %vm281_vm15, %v6924_v17, %v1293_v51  ;;  %v1556_v55 = vmul.f32 %v1518_v6, %v1444_v44  ;;  %v6927_v44 = vld [vmem:[#allocation35_spill] sm:$0xff] }
 0x58d   :  { %v4198_v54 = vpop.eup %4197  ;;  %v1632_v23 = vmul.f32 %v1630_v15, %v1472_v41  ;;  %v6926_v15 = vld [vmem:[#allocation31_spill] sm:$0xff]  ;;  %v596_v6 = vmul.f32 1.442695, %v549_v52  ;;  %v1609_v0 = vrot.slane %v1608_v48, 4 }
 0x58e   :  { %v1643_v57 = vadd.f32 %v1641_v32, %v1554_v14  ;;  %v1655_v62 = vmul.f32 %v4198_v54, %v1644_v53  ;;  %v1593_v32 = vmul.f32 %v5201_v21, %v1466_v27  ;;  %v1868_v21 = vld [vmem:[%s6805_s10 + $0x38] sm:$0xff] }
 0x58f   :  { %1885 = vmatpush.msrb.mxu3 %v1868_v21  ;;  %v1610_v10 = vadd.f32 %v1609_v0, %v1608_v48  ;;  %v1867_v21 = vld [vmem:[%s6805_s10 + $0x30] sm:$0xff] }
 0x590   :  { %v1654_v36 = vmul.f32 %v4196_v24, %v1643_v57  ;;  %v1323_v58 = vpop.permute.xlu0 %1322  ;;  %v1595_v49 = vadd.f32 %v1594_v8, %v1593_v32  ;;  %v1645_v24 = vmul.f32 %v1643_v57, %v1474_v38  ;;  %v1519_v57 = vperm.slane %v1504_v30, 0 }
 0x591   :  { %1886 = vmatpush.msrb.mxu3 %v1867_v21 }
 0x592   :  { %v1656_v4 = vadd.f32 %v1654_v36, %v1556_v55 }
 0x593   :  { %4031 = vset.pattern.permute.xlu1 %v4753_v46  ;;  %4037 = vset.pattern.permute.xlu2 %v4758_v37  ;;  %v1311_v33 = vpop.permute.xlu2 %1310 }
 0x594   :  { %v1299_v26 = vpop.permute.xlu1 %1298  ;;  %v1475_v43 = vsel %vm281_vm15, %v6925_v40, %v1311_v33 }
 0x595   :  { %v1473_v22 = vsel %vm281_vm15, %v6922_v34, %v1299_v26  ;;  %v1657_v26 = vadd.f32 %v1655_v62, %v1557_v42  ;;  %v5333_v42 = vpop.eup %4199 }
 0x596   :  { %vm1827_vm13 = vweird.f32 %v5333_v42 }
 0x597   :  { %vm5396_vm5 = vmor %vm1826_vm4, %vm1827_vm13 }
 0x59b   :  { %1352 = vperm.xlu1 %4031, %v5055_v29   ;;  %1382 = vperm.xlu2 %4037, %v5083_v2   ;;  %v1471_v29 = vsel %vm281_vm15, %v6919_v9, %v1287_v12  ;;  %v1470_v12 = vsel %vm281_vm15, %v6923_v39, %v5248_v56  ;;  %v1633_v56 = vmul.f32 %v1631_v35, %v1473_v22  ;;  %v1596_v22 = vrot.slane %v1595_v49, 4 }
 0x59c   :  { %v1620_v14 = vmul.f32 %v5246_v59, %v1471_v29  ;;  %v1619_v51 = vmul.f32 %v5256_v61, %v1470_v12  ;;  %v594_v59 = vmul.f32 1.442695, %v548_v63  ;;  %v1477_v9 = vsel %vm281_vm15, %v6927_v44, %v1323_v58  ;;  %v6932_v44 = vld [vmem:[#allocation60_spill] sm:$0xff] }
 0x59d   :  { %v1634_v61 = vadd.f32 %v1633_v56, %v1632_v23  ;;  %v1646_v29 = vmul.f32 %v1644_v53, %v1475_v43  ;;  %v1583_v63 = vrot.slane %v1582_v1, 4  ;;  %v1659_v34 = vmul.f32 %v1657_v26, %v1477_v9  ;;  %v6929_v53 = vld [vmem:[#allocation23_spill] sm:$0xff] }
 0x59e   :  { %v1621_v35 = vadd.f32 %v1620_v14, %v1619_v51  ;;  %4201 = vpow2.f32 %v594_v59  ;;  %v1446_v5 = vsel %vm281_vm15, %v6929_v53, %v5203_v7  ;;  %v1597_v54 = vadd.f32 %v1596_v22, %v1595_v49  ;;  %v6931_v7 = vld [vmem:[#allocation25_spill] sm:$0xff]  ;;  %v1865_v22 = vld [vmem:[%s6805_s10 + $0x20] sm:$0xff] }
 0x59f   :  { %v1635_v12 = vrot.slane %v1634_v61, 4  ;;  %4203 = vpow2.f32 %v596_v6  ;;  %v1647_v17 = vadd.f32 %v1646_v29, %v1645_v24  ;;  %v1584_v41 = vadd.f32 %v1583_v63, %v1582_v1  ;;  %v1866_v6 = vld [vmem:[%s6805_s10 + $0x28] sm:$0xff] }
 0x5a0   :  { %v1622_v39 = vrot.slane %v1621_v35, 4  ;;  %v1558_v62 = vmul.f32 %v1519_v57, %v1446_v5  ;;  %v1822_v56 = vmul.f32 %v5333_v42, %v5270_v50  ;;  %v1447_v32 = vsel %vm281_vm15, %v6931_v7, %v5225_v60  ;;  %1887 = vmatpush.msrb.mxu3 %v1866_v6  ;;  %v1862_v7 = vld [vmem:[%s6805_s10 + $0x8] sm:$0xff] }
 0x5a1   :  { %v1636_v36 = vadd.f32 %v1635_v12, %v1634_v61  ;;  %v1648_v14 = vrot.slane %v1647_v17, 4  ;;  %v1585_v55 = vrot.slane %v1584_v41, 2  ;;  %v1598_v51 = vrot.slane %v1597_v54, 2 }
 0x5a2   :  { %v1623_v8 = vadd.f32 %v1622_v39, %v1621_v35  ;;  %v1559_v48 = vmul.f32 %v1519_v57, %v1447_v32  ;;  %v1329_v35 = vpop.permute.xlu2 %1328  ;;  %v1823_v60 = vsub.f32 1.0, %v1822_v56  ;;  %1888 = vmatpush.msrb.mxu3 %v1865_v22 }
 0x5a3   :  { %4033 = vset.pattern.permute.xlu1 %v4758_v37  ;;  %4038 = vset.pattern.permute.xlu2 %v4753_v46  ;;  %v1637_v40 = vrot.slane %v1636_v36, 2  ;;  %v1649_v49 = vadd.f32 %v1648_v14, %v1647_v17  ;;  %v1586_v59 = vadd.f32 %v1585_v55, %v1584_v41  ;;  %v1478_v9 = vsel %vm281_vm15, %v6932_v44, %v1329_v35  ;;  %v1864_v17 = vld [vmem:[%s6805_s10 + $0x18] sm:$0xff] }
 0x5a4   :  { %v1317_v16 = vpop.permute.xlu1 %1316  ;;  %v4202_v3 = vpop.eup %4201  ;;  %v1624_v1 = vrot.slane %v1623_v8, 2  ;;  %v1824_v41 = vmul.f32 %v5333_v42, %v1823_v60  ;;  %1889 = vmatpush.msrb.mxu3 %v1864_v17  ;;  %v1832_v55 = vand.u32 2147483648, %v5270_v50  ;;  %v6937_v44 = vld [vmem:[#allocation15_spill] sm:$0xff] }
 0x5a5   :  { %v1476_v27 = vsel %vm281_vm15, %v6926_v15, %v1317_v16  ;;  %v4204_v19 = vpop.eup %4203  ;;  %v1667_v23 = vmul.f32 %v4202_v3, %v1656_v4  ;;  %v1638_v29 = vadd.f32 %v1637_v40, %v1636_v36  ;;  %v1650_v38 = vrot.slane %v1649_v49, 2  ;;  %v4351_v36 = vld [vmem:[%s6807_s12] sm:$0x1] }
 0x5a6   :  { %v1658_v20 = vmul.f32 %v1656_v4, %v1476_v27  ;;  %v1668_v58 = vmul.f32 %v4204_v19, %v1657_v26  ;;  %v1599_v4 = vadd.f32 %v1598_v51, %v1597_v54  ;;  %v1625_v26 = vadd.f32 %v1624_v1, %v1623_v8  ;;  %v1863_v8 = vld [vmem:[%s6805_s10 + $0x10] sm:$0xff]  ;;  %v1861_v1 = vld [vmem:[%s6805_s10] sm:$0xff] }
 0x5a7   :  { %v5345_v16 = vadd.f32 %v1667_v23, %v1558_v62  ;;  %v1587_v30 = vrot.slane %v1586_v59, 1  ;;  %v1639_v53 = vrot.slane %v1638_v29, 1  ;;  %1890 = vmatpush.msrb.mxu3 %v1863_v8  ;;  %v1825_v32 = vadd.f32 %v5333_v42, %v1824_v41 }
 0x5a8   :  { %v1660_v52 = vadd.f32 %v1659_v34, %v1658_v20  ;;  %v5352_v27 = vadd.f32 %v1668_v58, %v1559_v48  ;;  %v6933_v20 = vld [vmem:[#allocation34_spill] sm:$0xff]  ;;  %v1600_v39 = vrot.slane %v1599_v4, 1  ;;  %v1626_v12 = vrot.slane %v1625_v26, 1 }
 0x5a9   :  { %v1671_v0 = vmul.f32 %v5345_v16, %v1478_v9  ;;  %v1588_v54 = vadd.f32 %v1587_v30, %v1586_v59  ;;  %1891 = vmatpush.msrb.mxu3 %v1862_v7  ;;  %v1830_v58 = vand.u32 2147483647, %v5270_v50  ;;  %v1829_v35 = vsel %vm5396_vm5, %v5333_v42, %v1825_v32  ;;  %v6939_v30 = vld [vmem:[#allocation32_spill] sm:$0xff] }
 0x5aa   :  { %v1661_v33 = vrot.slane %v1660_v52, 4  ;;  %v1601_v62 = vadd.f32 %v1600_v39, %v1599_v4  ;;  %v1627_v19 = vadd.f32 %v1626_v12, %v1625_v26  ;;  %v1833_v50 = vor.u32 1.1754944e-38, %v1832_v55  ;;  %v1148_v12 = vpop.permute.xlu2 %1147 }
 0x5ab   :  { %1370 = vperm.xlu1 %4033, %v4884_v13   ;;  %1388 = vperm.xlu2 %4038, %v6930_v47   ;;  %v1611_v13 = vrot.slane %v1610_v10, 2  ;;  %vm1831_vm8 = vcmp.eq.f32.partialorder %v1830_v58, 8.507059e+37 }
 0x5ac   :  { %v1662_v43 = vadd.f32 %v1661_v33, %v1660_v52  ;;  %v6934_v33 = vld [vmem:[#allocation19_spill] sm:$0xff]  ;;  %1892 = vmatpush.msrb.mxu3 %v1861_v1  ;;  %v1834_v26 = vsel %vm1831_vm8, %v1833_v50, %v1829_v35 }
 0x5ad   :  { %v1612_v61 = vadd.f32 %v1611_v13, %v1610_v10  ;;  %v1651_v10 = vadd.f32 %v1650_v38, %v1649_v49  ;;  %v5378_v3 = vsel %vm281_vm15, %v4351_v36, %v6934_v33  ;;  %v1640_v13 = vadd.f32 %v1639_v53, %v1638_v29  ;;  %v6938_v38 = vld [vmem:[#allocation21_spill] sm:$0xff] }
 0x5ae   :  { %v1663_v63 = vrot.slane %v1662_v43, 2 }
 0x5af   :  { %v1613_v24 = vrot.slane %v1612_v61, 1  ;;  %v1652_v23 = vrot.slane %v1651_v10, 1 }
 0x5b0   :  { %v1664_v5 = vadd.f32 %v1663_v63, %v1662_v43  ;;  %v1808_v43 = vperm.slane %v5378_v3, 0  ;;  %v1851_v63 = vmul.f32 %v1834_v26, %v5215_v11  ;;  %v4352_v11 = vld [vmem:[%s6804_s9] ss:$0 sm:$0xff] }
 0x5b1   :  { %v1614_v14 = vadd.f32 %v1613_v24, %v1612_v61  ;;  %v1653_v60 = vadd.f32 %v1652_v23, %v1651_v10 }
 0x5b2   :  { %v1665_v51 = vrot.slane %v1664_v5, 1  ;;  %v1809_v9 = vmul.f32 %v1808_v43, %v6937_v44  ;;  %v1155_v17 = vpop.permute.xlu2 %1154 }
 0x5b3   :  { %4036 = vset.pattern.permute.xlu1 %v4753_v46  ;;  %4041 = vset.pattern.permute.xlu2 %v4758_v37 }
 0x5b4   :  { %v1335_v15 = vpop.permute.xlu1 %1334  ;;  %v1666_v21 = vadd.f32 %v1665_v51, %v1664_v5 }
 0x5b5   :  { %v1479_v31 = vsel %vm281_vm15, %v6933_v20, %v1335_v15 }
 0x5b6   :  { %v1672_v34 = vmul.f32 %v5352_v27, %v1479_v31 }
 0x5b8   :  { %v1673_v52 = vadd.f32 %v1672_v34, %v1671_v0  ;;  %v6940_v0 = vld [vmem:[#allocation18_spill] sm:$0xff] }
 0x5ba   :  { %v1674_v57 = vrot.slane %v1673_v52, 4  ;;  %v5430_v5 = vpop.permute.xlu2 %1173 }
 0x5bb   :  { %1376 = vperm.xlu1 %4036, %v5083_v2   ;;  %1406 = vperm.xlu2 %4041, %v4911_v25   ;;  %v1784_v2 = vsel %vm334_vm3, %v1588_v54, %v1601_v62 }
 0x5bc   :  { %v1675_v56 = vadd.f32 %v1674_v57, %v1673_v52  ;;  %v1785_v40 = vsel %vm322_vm2, %v1784_v2, %v1614_v14 }
 0x5bd   :  { %v1786_v49 = vsel %vm310_vm0, %v1785_v40, %v1627_v19  ;;  %v453_v34 = vpop.permute.xlu1 %452 }
 0x5be   :  { %v1676_v25 = vrot.slane %v1675_v56, 2  ;;  %v1788_v61 = vsel %vm1787_vm14, %v1786_v49, %v1640_v13 }
 0x5bf   :  { %v1790_v6 = vsel %vm1789_vm6, %v1788_v61, %v1653_v60  ;;  %v6943_v60 = vld [vmem:[#allocation62_spill] sm:$0xff] }
 0x5c0   :  { %v1677_v59 = vadd.f32 %v1676_v25, %v1675_v56  ;;  %v1792_v42 = vsel %vm1791_vm7, %v1790_v6, %v1666_v21  ;;  %v6942_v25 = vld [vmem:[#allocation16_spill] sm:$0xff] }
 0x5c2   :  { %v1678_v4 = vrot.slane %v1677_v59, 1  ;;  %v5433_v54 = vpop.permute.xlu2 %1186 }
 0x5c3   :  { %4039 = vset.pattern.permute.xlu1 %v4758_v37  ;;  %4044 = vset.pattern.permute.xlu2 %v4753_v46 }
 0x5c4   :  { %v1679_v15 = vadd.f32 %v1678_v4, %v1677_v59 }
 0x5c5   :  { %v1142_v8 = vpop.permute.xlu1 %1141 }
 0x5c6   :  { %v1794_v29 = vsel %vm1793_vm9, %v1792_v42, %v1679_v15  ;;  %v1448_v4 = vsel %vm281_vm15, %v6943_v60, %v1142_v8 }
 0x5c7   :  { %v1811_v20 = vadd.f32 %v1809_v9, %v1794_v29  ;;  %v1168_v9 = vpop.permute.xlu0 %1167 }
 0x5c9   :  { %v1853_v31 = vmul.f32 %v1851_v63, %v1811_v20  ;;  %v6944_v63 = vld [vmem:[#allocation36_spill] sm:$0xff] }
 0x5ca   :  { %v5438_v14 = vpop.permute.xlu2 %1199 }
 0x5cb   :  { %1394 = vperm.xlu1 %4039, %v6930_v47   ;;  %1024 = vperm.xlu2 %4044, %v6938_v38   ;;  %v6941_v47 = vld [vmem:[#allocation20_spill] sm:$0xff] }
 0x5cc   :  { %1857 = vrot.lane.b32.xlu0 %v1853_v31, %s4406_s22  ;;  %3897 = vmatmul.msk.f32.vlgmr.msrb.gmra.mxu3 %vm281_vm15, %v1853_v31  ;;  %v445_v22 = vadd.f32 %v4352_v11, %v6941_v47 }
 0x5ce   :  { %v457_v24 = vsel %vm281_vm15, %v445_v22, %v453_v34 }
 0x5cf   :  { %v461_v39 = vmin.f32 %v457_v24, 20.0  ;;  %vm459_vm10 = vcmp.gt.f32.partialorder %v457_v24, 20.0 }
 0x5d1   :  { %v464_v52 = vmul.f32 1.442695, %v461_v39 }
 0x5d2   :  { %v5443_v32 = vpop.permute.xlu2 %1219 }
 0x5d3   :  { %4042 = vset.pattern.permute.xlu1 %v4753_v46  ;;  %1424 = vperm.xlu2 %4044, %v4946_v45   ;;  %4205 = vpow2.f32 %v464_v52  ;;  %v6945_v52 = vld [vmem:[#allocation37_spill] sm:$0xff] }
 0x5d5   :  { %v1161_v55 = vpop.permute.xlu1 %1160 }
 0x5d9   :  { %v4206_v41 = vpop.eup %4205 }
 0x5da   :  { %v467_v53 = vadd.f32 1.0, %v4206_v41  ;;  %v5454_v59 = vpop.permute.xlu2 %1346 }
 0x5db   :  { %1412 = vperm.xlu1 %4042, %v6939_v30   ;;  %4046 = vset.pattern.permute.xlu2 %v6940_v0 }
 0x5dc   :  { %4207 = vlog2.f32 %v467_v53 }
 0x5e2   :  { %v4208_v10 = vpop.eup %4207  ;;  %v5474_v39 = vpop.permute.xlu2 %1358 }
 0x5e3   :  { %4045 = vset.pattern.permute.xlu1 %v4758_v37  ;;  %v471_v57 = vmul.f32 0.6931472, %v4208_v10 }
 0x5e5   :  { %v5435_v36 = vsel %vm459_vm10, %v457_v24, %v471_v57  ;;  %v5445_v51 = vpop.permute.xlu1 %1180 }
 0x5e6   :  { %v510_v33 = vperm.slane %v5435_v36, 0  ;;  %v495_v62 = vrot.slane %v5435_v36, 1  ;;  %v496_v2 = vrot.slane %v5435_v36, 2  ;;  %v5451_v1 = vmul.f32 %v5435_v36, %v6942_v25 }
 0x5e7   :  { %v497_v15 = vrot.slane %v5435_v36, 3  ;;  %v498_v41 = vrot.slane %v5435_v36, 4  ;;  %v499_v60 = vrot.slane %v5435_v36, 5 }
 0x5e8   :  { %v551_v19 = vmul.f32 %v510_v33, %v5128_v28  ;;  %v511_v7 = vperm.slane %v495_v62, 0  ;;  %v512_v49 = vperm.slane %v496_v2, 0  ;;  %v1520_v35 = vperm.slane %v5451_v1, 0  ;;  %v6946_v62 = vld [vmem:[#allocation38_spill] sm:$0xff] }
 0x5e9   :  { %v1505_v44 = vrot.slane %v5451_v1, 1  ;;  %v513_v34 = vperm.slane %v497_v15, 0 }
 0x5ea   :  { %v600_v13 = vmul.f32 1.442695, %v551_v19  ;;  %v552_v23 = vmul.f32 %v511_v7, %v5135_v18  ;;  %v553_v58 = vmul.f32 %v511_v7, %v5128_v28  ;;  %v554_v26 = vmul.f32 %v512_v49, %v5135_v18  ;;  %v1194_v7 = vpop.permute.xlu0 %1193 }
 0x5eb   :  { %1030 = vperm.xlu1 %4045, %v6938_v38   ;;  %v1560_v42 = vmul.f32 %v1520_v35, %v1448_v4  ;;  %v555_v31 = vmul.f32 %v512_v49, %v5128_v28  ;;  %v1521_v11 = vperm.slane %v1505_v44, 0  ;;  %v556_v53 = vmul.f32 %v513_v34, %v5135_v18  ;;  %v5491_v49 = vpop.permute.xlu2 %1364  ;;  %v6949_v44 = vld [vmem:[#allocation14_spill] sm:$0xff] }
 0x5ec   :  { %v602_v48 = vmul.f32 1.442695, %v552_v23  ;;  %v604_v50 = vmul.f32 1.442695, %v553_v58  ;;  %v606_v30 = vmul.f32 1.442695, %v554_v26  ;;  %v1451_v19 = vsel %vm281_vm15, %v6946_v62, %v1161_v55 }
 0x5ed   :  { %v5462_v6 = vpop.permute.xlu1 %1206  ;;  %v514_v23 = vperm.slane %v498_v41, 0  ;;  %v610_v2 = vmul.f32 1.442695, %v556_v53 }
 0x5f3   :  { %1430 = vperm.xlu1 %4045, %v4946_v45   ;;  %v550_v45 = vmul.f32 %v510_v33, %v5135_v18  ;;  %v1506_v33 = vrot.slane %v5451_v1, 2 }
 0x5f5   :  { %v598_v56 = vmul.f32 1.442695, %v550_v45  ;;  %v1522_v58 = vperm.slane %v1506_v33, 0 }
 0x5f7   :  { %4209 = vpow2.f32 %v598_v56 }
 0x5f8   :  { %4211 = vpow2.f32 %v600_v13  ;;  %v1563_v13 = vmul.f32 %v1521_v11, %v1451_v19 }
 0x5f9   :  { %4213 = vpow2.f32 %v602_v48 }
 0x5fa   :  { %4215 = vpow2.f32 %v604_v50  ;;  %v558_v50 = vmul.f32 %v514_v23, %v5135_v18 }
 0x5fb   :  { %4048 = vset.pattern.permute.xlu1 %v6940_v0  ;;  %4217 = vpow2.f32 %v606_v30  ;;  %v559_v30 = vmul.f32 %v514_v23, %v5128_v28  ;;  %v1508_v23 = vrot.slane %v5451_v1, 4 }
 0x5fd   :  { %v4210_v40 = vpop.eup %4209  ;;  %v5480_v10 = vpop.permute.xlu1 %1225  ;;  %v616_v33 = vmul.f32 1.442695, %v559_v30 }
 0x5fe   :  { %v4212_v21 = vpop.eup %4211  ;;  %v1680_v61 = vmul.f32 %v4210_v40, %v5345_v16  ;;  %v1449_v16 = vsel %vm281_vm15, %v6944_v63, %v1148_v12  ;;  %v1450_v12 = vsel %vm281_vm15, %v6945_v52, %v1155_v17  ;;  %v557_v17 = vmul.f32 %v513_v34, %v5128_v28  ;;  %v6950_v63 = vld [vmem:[#allocation63_spill] sm:$0xff]  ;;  %v5513_v34 = vpop.permute.xlu0 %1212 }
 0x5ff   :  { %v1681_v29 = vmul.f32 %v4212_v21, %v5352_v27  ;;  %v1561_v38 = vmul.f32 %v1520_v35, %v1449_v16  ;;  %v4214_v47 = vpop.eup %4213  ;;  %v608_v27 = vmul.f32 1.442695, %v555_v31  ;;  %v1562_v8 = vmul.f32 %v1521_v11, %v1450_v12  ;;  %v6951_v12 = vld [vmem:[#allocation40_spill] sm:$0xff] }
 0x600   :  { %v5468_v20 = vadd.f32 %v1680_v61, %v1560_v42  ;;  %v4216_v57 = vpop.eup %4215  ;;  %v612_v21 = vmul.f32 1.442695, %v557_v17  ;;  %v6947_v61 = vld [vmem:[#allocation39_spill] sm:$0xff]  ;;  %v6948_v42 = vld [vmem:[#allocation13_spill] sm:$0xff]  ;;  %v1453_v16 = vsel %vm281_vm15, %v6950_v63, %v5430_v5  ;;  %v614_v11 = vmul.f32 1.442695, %v558_v50 }
 0x601   :  { %v5471_v22 = vadd.f32 %v1681_v29, %v1561_v38  ;;  %4219 = vpow2.f32 %v608_v27  ;;  %v4218_v40 = vpop.eup %4217  ;;  %v1452_v55 = vsel %vm281_vm15, %v6947_v61, %v1168_v9  ;;  %v5503_v29 = vsel %vm281_vm15, %v6949_v44, %v6948_v42 }
 0x602   :  { %v1693_v24 = vmul.f32 %v4214_v47, %v5468_v20  ;;  %4221 = vpow2.f32 %v610_v2  ;;  %v1564_v15 = vmul.f32 %v1522_v58, %v1452_v55  ;;  %v1507_v38 = vrot.slane %v5451_v1, 3 }
 0x603   :  { %v1694_v45 = vmul.f32 %v4216_v57, %v5471_v22  ;;  %4223 = vpow2.f32 %v612_v21  ;;  %v515_v47 = vperm.slane %v499_v60, 0  ;;  %v1814_v52 = vsub.f32 0.0, %v5503_v29 }
 0x604   :  { %v5486_v56 = vadd.f32 %v1693_v24, %v1562_v8  ;;  %v1565_v24 = vmul.f32 %v1522_v58, %v1453_v16  ;;  %v1454_v5 = vsel %vm281_vm15, %v6951_v12, %v5445_v51  ;;  %v1523_v53 = vperm.slane %v1507_v38, 0  ;;  %v5522_v8 = vpop.permute.xlu2 %1238  ;;  %v6952_v58 = vld [vmem:[#allocation41_spill] sm:$0xff] }
 0x605   :  { %v5489_v48 = vadd.f32 %v1694_v45, %v1563_v13  ;;  %4225 = vpow2.f32 %v614_v11  ;;  %v500_v45 = vrot.slane %v5435_v36, 6  ;;  %v560_v62 = vmul.f32 %v515_v47, %v5135_v18 }
 0x606   :  { %v1706_v35 = vmul.f32 %v4218_v40, %v5486_v56  ;;  %v1566_v13 = vmul.f32 %v1523_v53, %v1454_v5  ;;  %v1817_v51 = vmul.f32 1.442695, %v1814_v52  ;;  %v1455_v40 = vsel %vm281_vm15, %v6952_v58, %v5433_v54  ;;  %v1341_v61 = vpop.permute.xlu0 %1340 }
 0x607   :  { %v4220_v26 = vpop.eup %4219  ;;  %4227 = vpow2.f32 %v616_v33  ;;  %v561_v21 = vmul.f32 %v515_v47, %v5128_v28  ;;  %v516_v55 = vperm.slane %v500_v45, 0  ;;  %v618_v50 = vmul.f32 1.442695, %v560_v62 }
 0x608   :  { %v1707_v9 = vmul.f32 %v4220_v26, %v5489_v48  ;;  %v5509_v31 = vadd.f32 %v1706_v35, %v1564_v15  ;;  %v4222_v27 = vpop.eup %4221  ;;  %v1567_v60 = vmul.f32 %v1523_v53, %v1455_v40  ;;  %v1524_v26 = vperm.slane %v1508_v23, 0 }
 0x609   :  { %v4224_v17 = vpop.eup %4223  ;;  %4229 = vpow2.f32 %v1817_v51  ;;  %v620_v16 = vmul.f32 1.442695, %v561_v21  ;;  %v562_v38 = vmul.f32 %v516_v55, %v5135_v18  ;;  %v1509_v12 = vrot.slane %v5451_v1, 5 }
 0x60a   :  { %v5519_v41 = vadd.f32 %v1707_v9, %v1565_v24  ;;  %v1719_v57 = vmul.f32 %v4222_v27, %v5509_v31  ;;  %v6953_v9 = vld [vmem:[#allocation42_spill] sm:$0xff]  ;;  %4231 = vpow2.f32 %v618_v50  ;;  %v6954_v24 = vld [vmem:[#allocation43_spill] sm:$0xff]  ;;  %v563_v53 = vmul.f32 %v516_v55, %v5128_v28 }
 0x60b   :  { %v4226_v15 = vpop.eup %4225  ;;  %v1456_v54 = vsel %vm281_vm15, %v6953_v9, %v1194_v7  ;;  %v1457_v27 = vsel %vm281_vm15, %v6954_v24, %v5438_v14  ;;  %4233 = vpow2.f32 %v620_v16  ;;  %v1525_v23 = vperm.slane %v1509_v12, 0  ;;  %v6958_v9 = vld [vmem:[#allocation45_spill] sm:$0xff]  ;;  %v6960_v24 = vld [vmem:[#allocation51_spill] sm:$0xff] }
 0x60c   :  { %v1720_v2 = vmul.f32 %v4224_v17, %v5519_v41  ;;  %v5533_v35 = vadd.f32 %v1719_v57, %v1566_v13  ;;  %v1383_v63 = vpop.permute.xlu2 %1382  ;;  %v1568_v47 = vmul.f32 %v1524_v26, %v1456_v54  ;;  %v622_v57 = vmul.f32 1.442695, %v562_v38  ;;  %v6955_v17 = vld [vmem:[#allocation64_spill] sm:$0xff] }
 0x60d   :  { %v5498_v4 = vpop.permute.xlu1 %1352  ;;  %v4228_v11 = vpop.eup %4227  ;;  %v1569_v33 = vmul.f32 %v1524_v26, %v1457_v27  ;;  %v1458_v13 = vsel %vm281_vm15, %v6955_v17, %v5462_v6  ;;  %v501_v26 = vrot.slane %v5435_v36, 7  ;;  %v1460_v54 = vsel %vm281_vm15, %v6958_v9, %v5443_v32  ;;  %v6962_v32 = vld [vmem:[#allocation50_spill] sm:$0xff] }
 0x60e   :  { %v5536_v42 = vadd.f32 %v1720_v2, %v1567_v60  ;;  %v1732_v44 = vmul.f32 %v4226_v15, %v5533_v35  ;;  %v5550_v7 = vpop.permute.xlu0 %1232  ;;  %v624_v2 = vmul.f32 1.442695, %v563_v53  ;;  %4235 = vpow2.f32 %v622_v57  ;;  %v6956_v15 = vld [vmem:[#allocation44_spill] sm:$0xff] }
 0x60f   :  { %v4230_v45 = vpop.eup %4229  ;;  %v1570_v50 = vmul.f32 %v1525_v23, %v1458_v13  ;;  %v1510_v60 = vrot.slane %v5451_v1, 6  ;;  %v1459_v6 = vsel %vm281_vm15, %v6956_v15, %v5513_v34  ;;  %v1483_v36 = vsel %vm281_vm15, %v6960_v24, %v5474_v39  ;;  %v6964_v39 = vld [vmem:[#allocation66_spill] sm:$0xff] }
 0x610   :  { %v1733_v52 = vmul.f32 %v4228_v11, %v5536_v42  ;;  %v5547_v5 = vadd.f32 %v1732_v44, %v1568_v47  ;;  %v4232_v62 = vpop.eup %4231  ;;  %v5556_v55 = vadd.f32 1.0, %v4230_v45  ;;  %v6957_v44 = vld [vmem:[#allocation49_spill] sm:$0xff]  ;;  %v6959_v11 = vld [vmem:[#allocation48_spill] sm:$0xff]  ;;  %4237 = vpow2.f32 %v624_v2 }
 0x611   :  { %v4234_v21 = vpop.eup %4233  ;;  %v1480_v16 = vsel %vm281_vm15, %v6957_v44, %v1341_v61  ;;  %v1481_v47 = vsel %vm281_vm15, %v6959_v11, %v5454_v59  ;;  %v6961_v61 = vld [vmem:[#allocation53_spill] sm:$0xff]  ;;  %v1571_v53 = vmul.f32 %v1525_v23, %v1459_v6  ;;  %v1482_v57 = vsel %vm281_vm15, %v6962_v32, %v5498_v4  ;;  %v6963_v59 = vld [vmem:[#allocation46_spill] sm:$0xff]  ;;  %v6965_v23 = vld [vmem:[#allocation52_spill] sm:$0xff] }
 0x612   :  { %v1735_v14 = vadd.f32 %v1733_v52, %v1569_v33  ;;  %v1745_v51 = vmul.f32 %v4232_v62, %v5547_v5  ;;  %v1685_v34 = vmul.f32 %v5471_v22, %v1481_v47  ;;  %v1484_v12 = vsel %vm281_vm15, %v6961_v61, %v5491_v49 }
 0x613   :  { %v1461_v33 = vsel %vm281_vm15, %v6963_v59, %v5480_v10  ;;  %v1526_v45 = vperm.slane %v1510_v60, 0  ;;  %v517_v17 = vperm.slane %v501_v26, 0  ;;  %v1684_v13 = vmul.f32 %v5468_v20, %v1480_v16  ;;  %v6966_v60 = vld [vmem:[#allocation67_spill] sm:$0xff]  ;;  %v6968_v16 = vld [vmem:[#allocation8_spill] sm:$0xff] }
 0x614   :  { %v1389_v58 = vpop.permute.xlu2 %1388  ;;  %v1746_v38 = vmul.f32 %v4234_v21, %v1735_v14  ;;  %v1747_v27 = vadd.f32 %v1745_v51, %v1570_v50  ;;  %v4236_v22 = vpop.eup %4235  ;;  %v1698_v49 = vmul.f32 %v5489_v48, %v1483_v36  ;;  %v1710_v4 = vmul.f32 %v5509_v31, %v1484_v12  ;;  %v6967_v26 = vld [vmem:[#allocation55_spill] sm:$0xff] }
 0x615   :  { %v1697_v10 = vmul.f32 %v5486_v56, %v1482_v57  ;;  %v1487_v6 = vsel %vm281_vm15, %v6967_v26, %v1383_v63  ;;  %v1573_v20 = vmul.f32 %v1526_v45, %v1461_v33  ;;  %v1572_v31 = vmul.f32 %v1526_v45, %v1460_v54 }
 0x616   :  { %v1401_v52 = vpop.permute.xlu0 %1400  ;;  %v1748_v51 = vadd.f32 %v1746_v38, %v1571_v53  ;;  %v1758_v21 = vmul.f32 %v4236_v22, %v1747_v27  ;;  %v6970_v38 = vld [vmem:[#allocation57_spill] sm:$0xff]  ;;  %v1724_v36 = vmul.f32 %v5536_v42, %v1487_v6  ;;  %v1686_v59 = vadd.f32 %v1685_v34, %v1684_v13 }
 0x617   :  { %v1488_v56 = vsel %vm281_vm15, %v6970_v38, %v1389_v58  ;;  %v1699_v61 = vadd.f32 %v1698_v49, %v1697_v10  ;;  %v6971_v53 = vld [vmem:[#allocation61_spill] sm:$0xff]  ;;  %4239 = vrcp.f32 %v5556_v55  ;;  %vm1841_vm12 = vweird.f32 %v5556_v55 }
 0x618   :  { %v1760_v12 = vadd.f32 %v1758_v21, %v1572_v31 }
 0x619   :  { %v1700_v22 = vrot.slane %v1699_v61, 4 }
 0x61c   :  { %v1407_v50 = vpop.permute.xlu2 %1406 }
 0x61d   :  { %v5526_v19 = vpop.permute.xlu1 %1370 }
 0x61e   :  { %v1485_v62 = vsel %vm281_vm15, %v6964_v39, %v5526_v19  ;;  %v1419_v58 = vpop.permute.xlu0 %1418 }
 0x61f   :  { %v1711_v44 = vmul.f32 %v5519_v41, %v1485_v62  ;;  %v565_v41 = vmul.f32 %v517_v17, %v5128_v28  ;;  %v6973_v62 = vld [vmem:[#allocation56_spill] sm:$0xff] }
 0x621   :  { %v1712_v57 = vadd.f32 %v1711_v44, %v1710_v4  ;;  %v628_v42 = vmul.f32 1.442695, %v565_v41  ;;  %v1687_v4 = vrot.slane %v1686_v59, 4 }
 0x623   :  { %v1713_v21 = vrot.slane %v1712_v57, 4  ;;  %v1688_v6 = vadd.f32 %v1687_v4, %v1686_v59 }
 0x62d   :  { %v1377_v30 = vpop.permute.xlu1 %1376 }
 0x62e   :  { %v1486_v2 = vsel %vm281_vm15, %v6965_v23, %v1377_v30  ;;  %v4238_v30 = vpop.eup %4237  ;;  %v1025_v23 = vpop.permute.xlu2 %1024 }
 0x62f   :  { %v1723_v11 = vmul.f32 %v5533_v35, %v1486_v2  ;;  %v1759_v47 = vmul.f32 %v4238_v30, %v1748_v51  ;;  %v1736_v35 = vmul.f32 %v5547_v5, %v1488_v56  ;;  %v6974_v2 = vld [vmem:[#allocation54_spill] sm:$0xff] }
 0x630   :  { %v1490_v5 = vsel %vm281_vm15, %v6974_v2, %v1401_v52 }
 0x631   :  { %v1761_v32 = vadd.f32 %v1759_v47, %v1573_v20  ;;  %v1725_v33 = vadd.f32 %v1724_v36, %v1723_v11  ;;  %v1749_v34 = vmul.f32 %v1747_v27, %v1490_v5  ;;  %v6975_v11 = vld [vmem:[#allocation65_spill] sm:$0xff]  ;;  %v1689_v47 = vrot.slane %v1688_v6, 2 }
 0x633   :  { %v1726_v13 = vrot.slane %v1725_v33, 4 }
 0x635   :  { %v1727_v20 = vadd.f32 %v1726_v13, %v1725_v33 }
 0x63d   :  { %v1395_v40 = vpop.permute.xlu1 %1394 }
 0x63e   :  { %v1489_v15 = vsel %vm281_vm15, %v6966_v60, %v1395_v40  ;;  %v564_v40 = vmul.f32 %v517_v17, %v5135_v18  ;;  %v6972_v18 = vld [vmem:[#allocation59_spill] sm:$0xff]  ;;  %v1493_v17 = vsel %vm281_vm15, %v6973_v62, %v1419_v58 }
 0x63f   :  { %v1737_v24 = vmul.f32 %v1735_v14, %v1489_v15  ;;  %v1491_v14 = vsel %vm281_vm15, %v6972_v18, %v1407_v50  ;;  %v1763_v10 = vmul.f32 %v1761_v32, %v1493_v17  ;;  %v1511_v15 = vrot.slane %v5451_v1, 7 }
 0x640   :  { %v626_v45 = vmul.f32 1.442695, %v564_v40  ;;  %v1750_v49 = vmul.f32 %v1748_v51, %v1491_v14  ;;  %v1714_v51 = vadd.f32 %v1713_v21, %v1712_v57  ;;  %v1463_v40 = vsel %vm281_vm15, %v6975_v11, %v5522_v8 }
 0x641   :  { %v1738_v28 = vadd.f32 %v1737_v24, %v1736_v35  ;;  %v1527_v31 = vperm.slane %v1511_v15, 0  ;;  %v1728_v24 = vrot.slane %v1727_v20, 2 }
 0x642   :  { %4241 = vpow2.f32 %v626_v45  ;;  %v1751_v26 = vadd.f32 %v1750_v49, %v1749_v34  ;;  %v1715_v1 = vrot.slane %v1714_v51, 2  ;;  %v1690_v45 = vadd.f32 %v1689_v47, %v1688_v6 }
 0x643   :  { %v1739_v50 = vrot.slane %v1738_v28, 4  ;;  %4243 = vpow2.f32 %v628_v42  ;;  %v1575_v18 = vmul.f32 %v1527_v31, %v1463_v40 }
 0x644   :  { %v1752_v38 = vrot.slane %v1751_v26, 4  ;;  %v1716_v8 = vadd.f32 %v1715_v1, %v1714_v51 }
 0x645   :  { %v1740_v52 = vadd.f32 %v1739_v50, %v1738_v28  ;;  %v1729_v28 = vadd.f32 %v1728_v24, %v1727_v20 }
 0x646   :  { %v1753_v57 = vadd.f32 %v1752_v38, %v1751_v26  ;;  %v1717_v21 = vrot.slane %v1716_v8, 1 }
 0x647   :  { %v1741_v58 = vrot.slane %v1740_v52, 2  ;;  %v1730_v4 = vrot.slane %v1729_v28, 1 }
 0x648   :  { %v1754_v49 = vrot.slane %v1753_v57, 2  ;;  %v1718_v26 = vadd.f32 %v1717_v21, %v1716_v8  ;;  %v3904_v21 = vld [vmem:[%s6800_s5 + $0x38] sm:$0xff] }
 0x649   :  { %v1742_v62 = vadd.f32 %v1741_v58, %v1740_v52  ;;  %v1731_v6 = vadd.f32 %v1730_v4, %v1729_v28  ;;  %2035 = vmatpush.msrb.mxu1 %v3904_v21 }
 0x64a   :  { %v1755_v15 = vadd.f32 %v1754_v49, %v1753_v57  ;;  %v6982_v49 = vld [vmem:[#allocation11_spill] sm:$0xff] }
 0x64b   :  { %v1743_v13 = vrot.slane %v1742_v62, 1 }
 0x64d   :  { %v1413_v48 = vpop.permute.xlu1 %1412  ;;  %v1744_v52 = vadd.f32 %v1743_v13, %v1742_v62 }
 0x64e   :  { %v1492_v54 = vsel %vm281_vm15, %v6971_v53, %v1413_v48  ;;  %v5620_v48 = vpop.eup %4239  ;;  %v6976_v53 = vld [vmem:[#allocation47_spill] sm:$0xff] }
 0x64f   :  { %v1894_v19 = vpop.f32.mrf.mxu3  ;;  %v1762_v39 = vmul.f32 %v1760_v12, %v1492_v54  ;;  %v4242_v30 = vpop.eup %4241  ;;  %v1462_v54 = vsel %vm281_vm15, %v6976_v53, %v5550_v7  ;;  %vm1842_vm11 = vweird.f32 %v5620_v48 }
 0x650   :  { %v5599_v9 = vadd.f32 %v1894_v19, %v6968_v16  ;;  %v1701_v19 = vadd.f32 %v1700_v22, %v1699_v61  ;;  %v4244_v56 = vpop.eup %4243  ;;  %v1771_v41 = vmul.f32 %v4242_v30, %v1760_v12  ;;  %v1837_v61 = vmul.f32 %v5620_v48, %v5556_v55  ;;  %vm1843_vm13 = vmor %vm1841_vm12, %vm1842_vm11 }
 0x651   :  { %v1764_v60 = vadd.f32 %v1763_v10, %v1762_v39  ;;  %v1772_v36 = vmul.f32 %v4244_v56, %v1761_v32  ;;  %v1574_v59 = vmul.f32 %v1527_v31, %v1462_v54  ;;  %v1691_v10 = vrot.slane %v1690_v45, 1 }
 0x652   :  { %6969 = vst [vmem:[#allocation27_spill] sm:$0xff] %v5599_v9  ;;  %v1908_v63 = vsel %vm122_vm1, %v5599_v9, 0.0  ;;  %v1702_v27 = vrot.slane %v1701_v19, 2  ;;  %v1838_v42 = vsub.f32 1.0, %v1837_v61  ;;  %v1847_v30 = vand.u32 2147483648, %v5556_v55 }
 0x653   :  { %1909 = vadd.xlane.f32.xlu1 %v1908_v63  ;;  %v1765_v16 = vrot.slane %v1764_v60, 4  ;;  %v1425_v63 = vpop.permute.xlu2 %1424  ;;  %v1773_v12 = vadd.f32 %v1771_v41, %v1574_v59  ;;  %v1774_v39 = vadd.f32 %v1772_v36, %v1575_v18  ;;  %v1692_v51 = vadd.f32 %v1691_v10, %v1690_v45  ;;  %v1858_v59 = vpop.permute.xlu0 %1857  ;;  %v6977_v45 = vld [vmem:[#allocation12_spill] sm:$0xff]  ;;  %v3903_v10 = vld [vmem:[%s6800_s5 + $0x30] sm:$0xff] }
 0x654   :  { %v1703_v14 = vadd.f32 %v1702_v27, %v1701_v19  ;;  %v1494_v33 = vsel %vm281_vm15, %v1025_v23, %v1425_v63  ;;  %v1839_v23 = vmul.f32 %v5620_v48, %v1838_v42  ;;  %v1756_v27 = vrot.slane %v1755_v15, 1  ;;  %v6980_v42 = vld [vmem:[#allocation10_spill] sm:$0xff]  ;;  %2036 = vmatpush.msrb.mxu1 %v3903_v10 }
 0x655   :  { %v1766_v35 = vadd.f32 %v1765_v16, %v1764_v60  ;;  %v1775_v2 = vmul.f32 %v1773_v12, %v1494_v33  ;;  %v1845_v56 = vand.u32 2147483647, %v5556_v55  ;;  %v1848_v41 = vor.u32 1.1754944e-38, %v1847_v30 }
 0x656   :  { %v1704_v7 = vrot.slane %v1703_v14, 1  ;;  %v1757_v36 = vadd.f32 %v1756_v27, %v1755_v15 }
 0x657   :  { %v1767_v17 = vrot.slane %v1766_v35, 2  ;;  %vm1846_vm4 = vcmp.eq.f32.partialorder %v1845_v56, 8.507059e+37 }
 0x658   :  { %v1705_v60 = vadd.f32 %v1704_v7, %v1703_v14 }
 0x659   :  { %v1768_v50 = vadd.f32 %v1767_v17, %v1766_v35  ;;  %v1810_v35 = vmul.f32 %v1808_v43, %v6942_v25  ;;  %v6978_v25 = vld [vmem:[#allocation9_spill] sm:$0xff] }
 0x65a   :  { %v1795_v31 = vsel %vm334_vm3, %v1692_v51, %v1705_v60 }
 0x65b   :  { %v1769_v16 = vrot.slane %v1768_v50, 1  ;;  %v1796_v11 = vsel %vm322_vm2, %v1795_v31, %v1718_v26 }
 0x65c   :  { %v1797_v40 = vsel %vm310_vm0, %v1796_v11, %v1731_v6 }
 0x65d   :  { %v1031_v44 = vpop.permute.xlu1 %1030  ;;  %v1798_v24 = vsel %vm1787_vm14, %v1797_v40, %v1744_v52  ;;  %v1770_v63 = vadd.f32 %v1769_v16, %v1768_v50  ;;  %v3901_v50 = vld [vmem:[%s6800_s5 + $0x20] sm:$0xff] }
 0x65e   :  { %v1799_v58 = vsel %vm1789_vm6, %v1798_v24, %v1757_v36  ;;  %v5702_v40 = vld [vmem:[%s6798_s3 + $0x1] ss:$0 sm:$0xff] }
 0x65f   :  { %v1800_v55 = vsel %vm1791_vm7, %v1799_v58, %v1770_v63  ;;  %v5707_v24 = vld [vmem:[%s6799_s4 + $0x1] ss:$0 sm:$0xff] }
 0x665   :  { %v1431_v32 = vpop.permute.xlu1 %1430 }
 0x666   :  { %v1495_v22 = vsel %vm281_vm15, %v1031_v44, %v1431_v32  ;;  %v1840_v44 = vadd.f32 %v5620_v48, %v1839_v23  ;;  %v3902_v23 = vld [vmem:[%s6800_s5 + $0x28] sm:$0xff] }
 0x667   :  { %v1776_v5 = vmul.f32 %v1774_v39, %v1495_v22  ;;  %2037 = vmatpush.msrb.mxu1 %v3902_v23 }
 0x668   :  { %v1844_v47 = vsel %vm1843_vm13, %v5620_v48, %v1840_v44 }
 0x669   :  { %v1777_v34 = vadd.f32 %v1776_v5, %v1775_v2  ;;  %v1849_v53 = vsel %vm1846_vm4, %v1848_v41, %v1844_v47  ;;  %2038 = vmatpush.msrb.mxu1 %v3901_v50 }
 0x66a   :  { %v1852_v48 = vmul.f32 %v1849_v53, %v5503_v29 }
 0x66b   :  { %v1778_v19 = vrot.slane %v1777_v34, 4 }
 0x66d   :  { %v1779_v20 = vadd.f32 %v1778_v19, %v1777_v34 }
 0x66f   :  { %v1780_v38 = vrot.slane %v1779_v20, 2 }
 0x671   :  { %v1781_v1 = vadd.f32 %v1780_v38, %v1779_v20 }
 0x673   :  { %v1782_v61 = vrot.slane %v1781_v1, 1 }
 0x675   :  { %v1783_v54 = vadd.f32 %v1782_v61, %v1781_v1 }
 0x677   :  { %v1801_v18 = vsel %vm1793_vm9, %v1800_v55, %v1783_v54  ;;  %v5722_v55 = vld [vmem:[%s6802_s7 + $0x1] sm:$0x1] }
 0x678   :  { %v1812_v14 = vadd.f32 %v1810_v35, %v1801_v18 }
 0x67a   :  { %v1854_v57 = vmul.f32 %v1852_v48, %v1812_v14  ;;  %v5730_v48 = vld [vmem:[%s6806_s11 + $0x10] sm:$0xff] }
 0x67c   :  { %1859 = vrot.lane.b32.xlu2 %v1854_v57, %s4406_s22  ;;  %3898 = vmatmul.msk.f32.gmra.mxu3 %vm281_vm15, %v1854_v57 }
 0x684   :  { %3899 = vmatmul.msk.f32.gmra.mxu3 %vm281_vm15, %v1858_v59 }
 0x6c6   :  { %v1910_v33 = vpop.xlane.xlu1 %1909 }
 0x6c7   :  { %v1920_v3 = vmul.f32 %v1910_v33, %v6977_v45 }
 0x6c9   :  { %v1924_v29 = vsub.f32 %v5599_v9, %v1920_v3 }
 0x6cb   :  { %v1928_v32 = vmul.f32 %v1924_v29, %v1924_v29 }
 0x6cd   :  { %v1932_v22 = vsel %vm122_vm1, %v1928_v32, 0.0 }
 0x6d6   :  { %v1860_v8 = vpop.permute.xlu2 %1859 }
 0x6d7   :  { %3900 = vmatmul.msk.f32.gmra.mxu3 %vm281_vm15, %v1860_v8 }
 0x6ff   :  { %v1897_v43 = vpop.f32.mrf.mxu3 }
 0x700   :  { %v5656_v28 = vadd.f32 %v1897_v43, %v6978_v25 }
 0x702   :  { %6979 = vst [vmem:[#allocation24_spill] sm:$0xff] %v5656_v28  ;;  %v1911_v12 = vsel %vm122_vm1, %v5656_v28, 0.0 }
 0x703   :  { %1912 = vadd.xlane.f32.xlu0 %v1911_v12 }
 0x707   :  { %v1900_v39 = vpop.f32.mrf.mxu3 }
 0x708   :  { %v5662_v62 = vadd.f32 %v1900_v39, %v6980_v42 }
 0x70a   :  { %6981 = vst [vmem:[#allocation26_spill] sm:$0xff] %v5662_v62  ;;  %v1914_v17 = vsel %vm122_vm1, %v5662_v62, 0.0 }
 0x70b   :  { %1915 = vadd.xlane.f32.xlu2 %v1914_v17  ;;  %1933 = vadd.xlane.f32.xlu0 %v1932_v22 }
 0x75a   :  { %v1903_v7 = vpop.f32.mrf.mxu3 }
 0x75b   :  { %v5668_v2 = vadd.f32 %v1903_v7, %v6982_v49 }
 0x75d   :  { %6983 = vst [vmem:[#allocation58_spill] sm:$0xff] %v5668_v2  ;;  %v1917_v5 = vsel %vm122_vm1, %v5668_v2, 0.0 }
 0x75e   :  { %1918 = vadd.xlane.f32.xlu1 %v1917_v5 }
 0x776   :  { %v1913_v4 = vpop.xlane.xlu0 %1912 }
 0x777   :  { %v1921_v34 = vmul.f32 %v1913_v4, %v6977_v45 }
 0x779   :  { %v5683_v13 = vsub.f32 %v5656_v28, %v1921_v34 }
 0x77b   :  { %v1929_v60 = vmul.f32 %v5683_v13, %v5683_v13 }
 0x77d   :  { %v1935_v15 = vsel %vm122_vm1, %v1929_v60, 0.0  ;;  %v3909_v60 = vld [vmem:[%s6801_s6 + $0x4] sm:$0xf] }
 0x77e   :  { %v1916_v19 = vpop.xlane.xlu2 %1915  ;;  %1936 = vadd.xlane.f32.xlu2 %v1935_v15  ;;  %v1934_v26 = vpop.xlane.xlu0 %1933 }
 0x77f   :  { %v1922_v51 = vmul.f32 %v1916_v19, %v6977_v45  ;;  %v1944_v6 = vmul.f32 %v1934_v26, %v6977_v45 }
 0x781   :  { %v5694_v20 = vsub.f32 %v5662_v62, %v1922_v51  ;;  %v1948_v44 = vadd.f32 1e-05, %v1944_v6  ;;  %v5752_v51 = vld [vmem:[%s6806_s11 + $0x18] sm:$0xff]  ;;  %s3868_s11 = sshll.u32 %s6813_s18, 4  ;;  %s3869_s11 = int_to_ptr.hbm [resolvable:$true] %s3868_s11 }
 0x783   :  { %4245 = vrsqrt.f32 %v1948_v44  ;;  %v1930_v52 = vmul.f32 %v5694_v20, %v5694_v20  ;;  %vm1958_vm8 = vweird.f32 %v1948_v44 }
 0x785   :  { %v1938_v16 = vsel %vm122_vm1, %v1930_v52, 0.0 }
 0x786   :  { %1939 = vadd.xlane.f32.xlu1 %v1938_v16 }
 0x789   :  { %v4246_v30 = vpop.eup %4245 }
 0x78a   :  { %v1953_v31 = vmul.f32 %v4246_v30, %v1948_v44  ;;  %vm1959_vm5 = vweird.f32 %v4246_v30 }
 0x78b   :  { %vm1960_vm10 = vmor %vm1958_vm8, %vm1959_vm5 }
 0x78c   :  { %v1954_v27 = vmul.f32 %v4246_v30, %v1953_v31 }
 0x78e   :  { %v1955_v38 = vmul.f32 0.5, %v1954_v27 }
 0x790   :  { %v1956_v56 = vsub.f32 1.5, %v1955_v38 }
 0x792   :  { %v1957_v11 = vmul.f32 %v4246_v30, %v1956_v56 }
 0x794   :  { %v1961_v1 = vsel %vm1960_vm10, %v4246_v30, %v1957_v11 }
 0x795   :  { %v1992_v47 = vmul.f32 %v1961_v1, %v1924_v29 }
 0x797   :  { %v1997_v63 = vmul.f32 %v5702_v40, %v1992_v47 }
 0x799   :  { %v2002_v41 = vadd.f32 %v5707_v24, %v1997_v63 }
 0x79b   :  { %3905 = vmatmul.msk.f32.vlgmr.msrb.gmra.mxu1 %vm122_vm1, %v2002_v41 }
 0x79f   :  { %2075 = vrot.lane.b32.xlu1 %v3909_v60, %s4406_s22 }
 0x7a7   :  { %2258 = vrot.lane.b32.xlu1 %v5752_v51, %s4406_s22 }
 0x7d1   :  { %v1919_v36 = vpop.xlane.xlu1 %1918 }
 0x7d2   :  { %v1923_v61 = vmul.f32 %v1919_v36, %v6977_v45 }
 0x7d4   :  { %v5714_v53 = vsub.f32 %v5668_v2, %v1923_v61 }
 0x7d6   :  { %v1931_v54 = vmul.f32 %v5714_v53, %v5714_v53 }
 0x7d8   :  { %v1941_v58 = vsel %vm122_vm1, %v1931_v54, 0.0 }
 0x7d9   :  { %1942 = vadd.xlane.f32.xlu0 %v1941_v58 }
 0x7ed   :  { %2081 = vrot.lane.b32.xlu0 %v5722_v55, %s4406_s22 }
 0x7f1   :  { %v1937_v35 = vpop.xlane.xlu2 %1936 }
 0x7f2   :  { %v1945_v18 = vmul.f32 %v1937_v35, %v6977_v45 }
 0x7f4   :  { %v1949_v14 = vadd.f32 1e-05, %v1945_v18 }
 0x7f5   :  { %2256 = vrot.lane.b32.xlu0 %v5730_v48, %s4406_s22 }
 0x7f6   :  { %4247 = vrsqrt.f32 %v1949_v14  ;;  %vm1968_vm12 = vweird.f32 %v1949_v14 }
 0x7f9   :  { %v1940_v57 = vpop.xlane.xlu1 %1939 }
 0x7fa   :  { %v1946_v59 = vmul.f32 %v1940_v57, %v6977_v45 }
 0x7fc   :  { %v4248_v8 = vpop.eup %4247  ;;  %v1950_v33 = vadd.f32 1e-05, %v1946_v59 }
 0x7fd   :  { %v1963_v3 = vmul.f32 %v4248_v8, %v1949_v14  ;;  %vm1969_vm11 = vweird.f32 %v4248_v8 }
 0x7fe   :  { %4249 = vrsqrt.f32 %v1950_v33  ;;  %vm1970_vm13 = vmor %vm1968_vm12, %vm1969_vm11  ;;  %vm1978_vm5 = vweird.f32 %v1950_v33 }
 0x7ff   :  { %v1964_v43 = vmul.f32 %v4248_v8, %v1963_v3 }
 0x801   :  { %v1965_v25 = vmul.f32 0.5, %v1964_v43 }
 0x803   :  { %v1966_v29 = vsub.f32 1.5, %v1965_v25 }
 0x804   :  { %v4250_v12 = vpop.eup %4249 }
 0x805   :  { %v1967_v32 = vmul.f32 %v4248_v8, %v1966_v29  ;;  %v1973_v39 = vmul.f32 %v4250_v12, %v1950_v33  ;;  %vm1979_vm4 = vweird.f32 %v4250_v12 }
 0x806   :  { %vm1980_vm8 = vmor %vm1978_vm5, %vm1979_vm4 }
 0x807   :  { %v1974_v42 = vmul.f32 %v4250_v12, %v1973_v39  ;;  %v1971_v17 = vsel %vm1970_vm13, %v4248_v8, %v1967_v32 }
 0x808   :  { %v1993_v22 = vmul.f32 %v1971_v17, %v5683_v13 }
 0x809   :  { %v1975_v7 = vmul.f32 0.5, %v1974_v42 }
 0x80a   :  { %v1998_v49 = vmul.f32 %v5702_v40, %v1993_v22 }
 0x80b   :  { %v1976_v5 = vsub.f32 1.5, %v1975_v7  ;;  %v3916_v7 = vld [vmem:[%s6803_s8 + $0x70] sm:$0xff] }
 0x80c   :  { %v2003_v21 = vadd.f32 %v5707_v24, %v1998_v49  ;;  %v3915_v49 = vld [vmem:[%s6803_s8 + $0x68] sm:$0xff] }
 0x80d   :  { %v1977_v10 = vmul.f32 %v4250_v12, %v1976_v5 }
 0x80e   :  { %3906 = vmatmul.msk.f32.gmra.mxu1 %vm122_vm1, %v2003_v21  ;;  %v3914_v21 = vld [vmem:[%s6803_s8 + $0x60] sm:$0xff] }
 0x80f   :  { %v1981_v4 = vsel %vm1980_vm8, %v4250_v12, %v1977_v10  ;;  %v3913_v10 = vld [vmem:[%s6803_s8 + $0x58] sm:$0xff] }
 0x810   :  { %v1994_v34 = vmul.f32 %v1981_v4, %v5694_v20  ;;  %v3912_v4 = vld [vmem:[%s6803_s8 + $0x50] sm:$0xff] }
 0x812   :  { %v1999_v23 = vmul.f32 %v5702_v40, %v1994_v34  ;;  %v3911_v34 = vld [vmem:[%s6803_s8 + $0x48] sm:$0xff] }
 0x814   :  { %v2004_v50 = vadd.f32 %v5707_v24, %v1999_v23 }
 0x816   :  { %3907 = vmatmul.msk.f32.gmra.mxu1 %vm122_vm1, %v2004_v50 }
 0x818   :  { %v2040_v13 = vpop.f32.mrf.mxu1 }
 0x819   :  { %2064 = vrot.lane.b32.xlu0 %v2040_v13, %s4406_s22 }
 0x84c   :  { %v1943_v15 = vpop.xlane.xlu0 %1942 }
 0x84d   :  { %v1947_v19 = vmul.f32 %v1943_v15, %v6977_v45 }
 0x84f   :  { %v1951_v26 = vadd.f32 1e-05, %v1947_v19 }
 0x851   :  { %4251 = vrsqrt.f32 %v1951_v26  ;;  %vm1988_vm11 = vweird.f32 %v1951_v26 }
 0x857   :  { %v4252_v6 = vpop.eup %4251 }
 0x858   :  { %v1983_v20 = vmul.f32 %v4252_v6, %v1951_v26  ;;  %vm1989_vm10 = vweird.f32 %v4252_v6 }
 0x859   :  { %vm1990_vm12 = vmor %vm1988_vm11, %vm1989_vm10 }
 0x85a   :  { %v1984_v44 = vmul.f32 %v4252_v6, %v1983_v20 }
 0x85c   :  { %v1985_v52 = vmul.f32 0.5, %v1984_v44 }
 0x85e   :  { %v1986_v16 = vsub.f32 1.5, %v1985_v52 }
 0x85f   :  { %v2082_v63 = vpop.permute.xlu0 %2081 }
 0x860   :  { %v1987_v30 = vmul.f32 %v4252_v6, %v1986_v16  ;;  %v5777_v41 = vsel %vm281_vm15, %v5722_v55, %v2082_v63 }
 0x861   :  { %v2085_v14 = vperm.slane %v5777_v41, 0 }
 0x862   :  { %v1991_v31 = vsel %vm1990_vm12, %v4252_v6, %v1987_v30 }
 0x863   :  { %v1995_v27 = vmul.f32 %v1991_v31, %v5714_v53 }
 0x865   :  { %v2000_v38 = vmul.f32 %v5702_v40, %v1995_v27  ;;  %v3917_v40 = vld [vmem:[%s6803_s8 + $0x78] sm:$0xff] }
 0x866   :  { %2198 = vmatpush.msrb.mxu0 %v3917_v40 }
 0x867   :  { %v2005_v56 = vadd.f32 %v5707_v24, %v2000_v38  ;;  %v2076_v24 = vpop.permute.xlu1 %2075 }
 0x868   :  { %v5780_v36 = vsel %vm281_vm15, %v3909_v60, %v2076_v24  ;;  %2199 = vmatpush.msrb.mxu0 %v3916_v7 }
 0x869   :  { %3908 = vmatmul.msk.f32.gmra.mxu1 %vm122_vm1, %v2005_v56  ;;  %v2095_v53 = vperm.slane %v5780_v36, 0  ;;  %v2106_v55 = vperm.slane %v5780_v36, 1  ;;  %v2117_v8 = vperm.slane %v5780_v36, 2  ;;  %v2122_v43 = vperm.slane %v5780_v36, 3 }
 0x86a   :  { %2200 = vmatpush.msrb.mxu0 %v3915_v49 }
 0x86c   :  { %2201 = vmatpush.msrb.mxu0 %v3914_v21 }
 0x86e   :  { %2202 = vmatpush.msrb.mxu0 %v3913_v10 }
 0x870   :  { %2203 = vmatpush.msrb.mxu0 %v3912_v4  ;;  %v6988_v4 = vld [vmem:[#allocation17_spill] sm:$0xff] }
 0x872   :  { %2204 = vmatpush.msrb.mxu0 %v3911_v34 }
 0x88b   :  { %v5760_v11 = vpop.f32.mrf.mxu1 }
 0x88c   :  { %2066 = vrot.lane.b32.xlu1 %v5760_v11, %s4406_s22 }
 0x893   :  { %v5764_v1 = vpop.f32.mrf.mxu1 }
 0x894   :  { %6984 = vst [vmem:[#allocation28_spill] sm:$0xff] %v5764_v1  ;;  %2054 = vrot.lane.b32.xlu2 %v5764_v1, %s4406_s22 }
 0x8e6   :  { %v5768_v47 = vpop.f32.mrf.mxu1 }
 0x8e7   :  { %6985 = vst [vmem:[#allocation30_spill] sm:$0xff] %v5768_v47  ;;  %2056 = vrot.lane.b32.xlu2 %v5768_v47, %s4406_s22 }
 0x8ee   :  { %v2055_v61 = vpop.permute.xlu2 %2054 }
 0x8ef   :  { %v5784_v54 = vsel %vm281_vm15, %v2040_v13, %v2055_v61  ;;  %v3910_v13 = vld [vmem:[%s6803_s8 + $0x40] sm:$0xff] }
 0x8f0   :  { %v2089_v58 = vrot.slane %v5784_v54, 5  ;;  %v2100_v35 = vrot.slane %v5784_v54, 6  ;;  %v2111_v18 = vrot.slane %v5784_v54, 7  ;;  %v2123_v42 = vmul.f32 %v2122_v43, %v5784_v54  ;;  %2205 = vmatpush.msrb.mxu0 %v3910_v13 }
 0x8f2   :  { %v2094_v57 = vsel %vm310_vm0, 0.0, %v2089_v58  ;;  %v2105_v59 = vsel %vm322_vm2, 0.0, %v2100_v35  ;;  %v2116_v3 = vsel %vm334_vm3, 0.0, %v2111_v18 }
 0x8f3   :  { %v2096_v33 = vmul.f32 %v2095_v53, %v2094_v57  ;;  %v2107_v29 = vmul.f32 %v2106_v55, %v2105_v59  ;;  %v2118_v32 = vmul.f32 %v2117_v8, %v2116_v3 }
 0x8f5   :  { %v2098_v25 = vadd.f32 %v2096_v33, %v2085_v14 }
 0x8f7   :  { %v2109_v12 = vadd.f32 %v2107_v29, %v2098_v25 }
 0x8f9   :  { %v2120_v39 = vadd.f32 %v2118_v32, %v2109_v12 }
 0x8fb   :  { %v2125_v17 = vadd.f32 %v2123_v42, %v2120_v39 }
 0x8fd   :  { %v2127_v22 = vsub.f32 0.0, %v2125_v17 }
 0x8ff   :  { %v2129_v5 = vmul.f32 1.442695, %v2127_v22 }
 0x901   :  { %4253 = vpow2.f32 %v2129_v5 }
 0x907   :  { %v4254_v23 = vpop.eup %4253 }
 0x908   :  { %v2133_v50 = vadd.f32 1.0, %v4254_v23 }
 0x90a   :  { %4255 = vrcp.f32 %v2133_v50  ;;  %v2146_v26 = vand.u32 2147483648, %v2133_v50  ;;  %v2144_v20 = vand.u32 2147483647, %v2133_v50  ;;  %vm2140_vm4 = vweird.f32 %v2133_v50 }
 0x90c   :  { %v2147_v52 = vor.u32 1.1754944e-38, %v2146_v26  ;;  %vm2145_vm8 = vcmp.eq.f32.partialorder %v2144_v20, 8.507059e+37 }
 0x910   :  { %v4256_v60 = vpop.eup %4255 }
 0x911   :  { %v2136_v15 = vmul.f32 %v4256_v60, %v2133_v50  ;;  %vm2141_vm13 = vweird.f32 %v4256_v60 }
 0x912   :  { %vm2142_vm5 = vmor %vm2140_vm4, %vm2141_vm13 }
 0x913   :  { %v2137_v19 = vsub.f32 1.0, %v2136_v15 }
 0x915   :  { %v2138_v6 = vmul.f32 %v4256_v60, %v2137_v19 }
 0x917   :  { %v2139_v44 = vadd.f32 %v4256_v60, %v2138_v6 }
 0x919   :  { %v2143_v16 = vsel %vm2142_vm5, %v4256_v60, %v2139_v44  ;;  %v5856_v60 = vpop.permute.xlu0 %2256 }
 0x91a   :  { %v2148_v30 = vsel %vm2145_vm8, %v2147_v52, %v2143_v16 }
 0x91b   :  { %v5820_v31 = vmul.f32 %v2148_v30, %v2125_v17 }
 0x91d   :  { %6986 = vst [vmem:[#allocation33_spill] sm:$0xff] %v5820_v31  ;;  %2169 = vrot.lane.b32.xlu2 %v5820_v31, %s4406_s22  ;;  %3918 = vmatmul.msk.f32.vlgmr.msrb.gmra.mxu0 %vm281_vm15, %v5820_v31 }
 0x921   :  { %v5861_v19 = vpop.permute.xlu0 %2064 }
 0x922   :  { %6989 = vst [vmem:[#allocation35_spill] sm:$0xff] %v5861_v19 }
 0x941   :  { %v2057_v27 = vpop.permute.xlu2 %2056 }
 0x942   :  { %v2061_v38 = vsel %vm281_vm15, %v5760_v11, %v2057_v27 }
 0x943   :  { %v2090_v56 = vrot.slane %v2061_v38, 5  ;;  %v2101_v40 = vrot.slane %v2061_v38, 6  ;;  %v2112_v24 = vrot.slane %v2061_v38, 7  ;;  %v2124_v29 = vmul.f32 %v2122_v43, %v2061_v38 }
 0x945   :  { %v2091_v63 = vsel %vm310_vm0, %v2089_v58, %v2090_v56  ;;  %v2102_v41 = vsel %vm322_vm2, %v2100_v35, %v2101_v40  ;;  %v2113_v54 = vsel %vm334_vm3, %v2111_v18, %v2112_v24  ;;  %v5902_v56 = vpop.permute.xlu1 %2258 }
 0x946   :  { %v2097_v61 = vmul.f32 %v2095_v53, %v2091_v63  ;;  %v2108_v59 = vmul.f32 %v2106_v55, %v2102_v41  ;;  %v2119_v3 = vmul.f32 %v2117_v8, %v2113_v54 }
 0x948   :  { %v2099_v57 = vadd.f32 %v2097_v61, %v2085_v14 }
 0x94a   :  { %v2110_v33 = vadd.f32 %v2108_v59, %v2099_v57 }
 0x94c   :  { %v2121_v25 = vadd.f32 %v2119_v3, %v2110_v33 }
 0x94d   :  { %v5909_v24 = vpop.permute.xlu1 %2066 }
 0x94e   :  { %v2126_v12 = vadd.f32 %v2124_v29, %v2121_v25  ;;  %6992 = vst [vmem:[#allocation22_spill] sm:$0xff] %v5909_v24 }
 0x950   :  { %v2128_v11 = vsub.f32 0.0, %v2126_v12 }
 0x952   :  { %v2131_v32 = vmul.f32 1.442695, %v2128_v11 }
 0x954   :  { %4257 = vpow2.f32 %v2131_v32 }
 0x95a   :  { %v4258_v39 = vpop.eup %4257 }
 0x95b   :  { %v2134_v42 = vadd.f32 1.0, %v4258_v39 }
 0x95d   :  { %4259 = vrcp.f32 %v2134_v42  ;;  %v2161_v36 = vand.u32 2147483648, %v2134_v42  ;;  %v2159_v18 = vand.u32 2147483647, %v2134_v42  ;;  %vm2155_vm11 = vweird.f32 %v2134_v42 }
 0x95f   :  { %v2162_v55 = vor.u32 1.1754944e-38, %v2161_v36  ;;  %vm2160_vm13 = vcmp.eq.f32.partialorder %v2159_v18, 8.507059e+37 }
 0x963   :  { %v4260_v58 = vpop.eup %4259 }
 0x964   :  { %v2151_v35 = vmul.f32 %v4260_v58, %v2134_v42  ;;  %vm2156_vm10 = vweird.f32 %v4260_v58 }
 0x965   :  { %vm2157_vm12 = vmor %vm2155_vm11, %vm2156_vm10 }
 0x966   :  { %v2152_v17 = vsub.f32 1.0, %v2151_v35 }
 0x968   :  { %v2153_v53 = vmul.f32 %v4260_v58, %v2152_v17 }
 0x96a   :  { %v2154_v14 = vadd.f32 %v4260_v58, %v2153_v53 }
 0x96c   :  { %v2158_v8 = vsel %vm2157_vm12, %v4260_v58, %v2154_v14 }
 0x96d   :  { %v2163_v43 = vsel %vm2160_vm13, %v2162_v55, %v2158_v8 }
 0x96e   :  { %v5833_v22 = vmul.f32 %v2163_v43, %v2126_v12 }
 0x970   :  { %6987 = vst [vmem:[#allocation31_spill] sm:$0xff] %v5833_v22  ;;  %2171 = vrot.lane.b32.xlu0 %v5833_v22, %s4406_s22  ;;  %3919 = vmatmul.msk.f32.gmra.mxu0 %vm281_vm15, %v5833_v22 }
 0x977   :  { %v2170_v7 = vpop.permute.xlu2 %2169 }
 0x978   :  { %3920 = vmatmul.msk.f32.gmra.mxu0 %vm281_vm15, %v2170_v7 }
 0x99a   :  { %v5840_v49 = vpop.f32.mrf.mxu0 }
 0x99b   :  { %v2423_v5 = vperm.slane %v5840_v49, 1  ;;  %v2410_v21 = vperm.slane %v5840_v49, 0  ;;  %v2436_v10 = vperm.slane %v5840_v49, 2  ;;  %v2449_v34 = vperm.slane %v5840_v49, 3 }
 0x99c   :  { %v2462_v23 = vperm.slane %v5840_v49, 4  ;;  %v2475_v50 = vperm.slane %v5840_v49, 5  ;;  %v2488_v13 = vperm.slane %v5840_v49, 6  ;;  %v2501_v15 = vperm.slane %v5840_v49, 7 }
 0x99d   :  { %2428 = vperm.xlu1 %4048, %v2423_v5   ;;  %2421 = vperm.xlu0 %4047, %v2410_v21  }
 0x99e   :  { %2415 = vperm.xlu2 %4046, %v2410_v21  }
 0x9a5   :  { %2441 = vperm.xlu1 %4048, %v2436_v10   ;;  %4050 = vset.pattern.permute.xlu0 %v6940_v0 }
 0x9a6   :  { %4049 = vset.pattern.permute.xlu2 %v6988_v4 }
 0x9ad   :  { %4051 = vset.pattern.permute.xlu1 %v6988_v4  ;;  %2454 = vperm.xlu0 %4050, %v2449_v34  }
 0x9ae   :  { %2434 = vperm.xlu2 %4049, %v2423_v5  }
 0x9b5   :  { %2460 = vperm.xlu1 %4051, %v2449_v34   ;;  %4053 = vset.pattern.permute.xlu0 %v6988_v4 }
 0x9b6   :  { %2447 = vperm.xlu2 %4049, %v2436_v10  }
 0x9bd   :  { %2473 = vperm.xlu1 %4051, %v2462_v23   ;;  %2486 = vperm.xlu0 %4053, %v2475_v50  }
 0x9be   :  { %4052 = vset.pattern.permute.xlu2 %v6940_v0 }
 0x9c5   :  { %4054 = vset.pattern.permute.xlu1 %v6940_v0  ;;  %4058 = vset.pattern.permute.xlu0 %v4753_v46 }
 0x9c6   :  { %2467 = vperm.xlu2 %4052, %v2462_v23  }
 0x9cd   :  { %2493 = vperm.xlu1 %4054, %v2488_v13   ;;  %2646 = vperm.xlu0 %4058, %v2436_v10  }
 0x9ce   :  { %2480 = vperm.xlu2 %4052, %v2475_v50  }
 0x9d5   :  { %2506 = vperm.xlu1 %4054, %v2501_v15   ;;  %4061 = vset.pattern.permute.xlu0 %v4758_v37 }
 0x9d6   :  { %4055 = vset.pattern.permute.xlu2 %v6988_v4 }
 0x9dd   :  { %4056 = vset.pattern.permute.xlu1 %v4753_v46  ;;  %2688 = vperm.xlu0 %4061, %v2475_v50  }
 0x9de   :  { %2499 = vperm.xlu2 %4055, %v2488_v13  }
 0x9e2   :  { %v2172_v26 = vpop.permute.xlu0 %2171 }
 0x9e3   :  { %3921 = vmatmul.msk.f32.gmra.mxu0 %vm281_vm15, %v2172_v26 }
 0x9e5   :  { %2622 = vperm.xlu1 %4056, %v2410_v21   ;;  %4062 = vset.pattern.permute.xlu0 %v4753_v46 }
 0x9e6   :  { %2512 = vperm.xlu2 %4055, %v2501_v15  }
 0x9ed   :  { %2634 = vperm.xlu1 %4056, %v2423_v5   ;;  %2694 = vperm.xlu0 %4062, %v2488_v13   ;;  %v5871_v6 = vpop.f32.mrf.mxu0 }
 0x9ee   :  { %4057 = vset.pattern.permute.xlu2 %v4758_v37  ;;  %6990 = vst [vmem:[#allocation29_spill] sm:$0xff] %v5871_v6  ;;  %v2514_v20 = vperm.slane %v5871_v6, 0  ;;  %v5876_v44 = vperm.slane %v5871_v6, 2  ;;  %v2527_v52 = vperm.slane %v5871_v6, 1  ;;  %v5883_v16 = vperm.slane %v5871_v6, 5 }
 0x9ef   :  { %v2553_v30 = vperm.slane %v5871_v6, 3  ;;  %v5891_v27 = vperm.slane %v5871_v6, 7  ;;  %v5896_v38 = vperm.slane %v5871_v6, 4  ;;  %v5912_v63 = vperm.slane %v5871_v6, 6 }
 0x9f1   :  { %6991 = vst [vmem:[#allocation23_spill] sm:$0xff] %v5891_v27 }
 0x9f5   :  { %4059 = vset.pattern.permute.xlu1 %v4758_v37  ;;  %4063 = vset.pattern.permute.xlu0 %v4758_v37  ;;  %v5907_v40 = vpop.f32.mrf.mxu0 }
 0x9f6   :  { %2628 = vperm.xlu2 %4057, %v2410_v21   ;;  %v5915_v41 = vperm.slane %v5907_v40, 0  ;;  %v5930_v59 = vperm.slane %v5907_v40, 2  ;;  %v5943_v29 = vperm.slane %v5907_v40, 5  ;;  %v5957_v39 = vperm.slane %v5907_v40, 7 }
 0x9f7   :  { %v5986_v55 = vperm.slane %v5907_v40, 3  ;;  %v6066_v28 = vperm.slane %v5907_v40, 4 }
 0x9f8   :  { %v5925_v54 = vpop.permute.xlu2 %2415 }
 0x9fd   :  { %2652 = vperm.xlu1 %4059, %v2436_v10   ;;  %2712 = vperm.xlu0 %4063, %v2501_v15  }
 0x9fe   :  { %2640 = vperm.xlu2 %4057, %v2423_v5  }
 0xa05   :  { %2664 = vperm.xlu1 %4059, %v2449_v34   ;;  %4064 = vset.pattern.permute.xlu0 %v6940_v0 }
 0xa06   :  { %4060 = vset.pattern.permute.xlu2 %v4753_v46 }
 0xa08   :  { %v5934_v33 = vpop.permute.xlu2 %2434 }
 0xa0d   :  { %2676 = vperm.xlu1 %4059, %v2462_v23   ;;  %2519 = vperm.xlu0 %4064, %v2514_v20  }
 0xa0e   :  { %2658 = vperm.xlu2 %4060, %v2449_v34  }
 0xa0f   :  { %v5920_v61 = vpop.permute.xlu1 %2428  ;;  %v6081_v19 = vpop.permute.xlu0 %2421 }
 0xa10   :  { %v5940_v25 = vpop.permute.xlu2 %2447 }
 0xa15   :  { %2700 = vperm.xlu1 %4059, %v2488_v13   ;;  %4067 = vset.pattern.permute.xlu0 %v6988_v4 }
 0xa16   :  { %2670 = vperm.xlu2 %4060, %v2462_v23  }
 0xa17   :  { %v5927_v57 = vpop.permute.xlu1 %2441 }
 0xa1d   :  { %4065 = vset.pattern.permute.xlu1 %v6988_v4  ;;  %2551 = vperm.xlu0 %4067, %v5876_v44  }
 0xa1e   :  { %2682 = vperm.xlu2 %4060, %v2475_v50   ;;  %v6020_v50 = vld [vmem:[%s6804_s9 + $0x1] ss:$0 sm:$0xff] }
 0xa1f   :  { %v2223_v26 = vadd.f32 %v6020_v50, %v5907_v40 }
 0xa20   :  { %v5949_v11 = vpop.permute.xlu2 %2467 }
 0xa25   :  { %2525 = vperm.xlu1 %4065, %v2514_v20   ;;  %4070 = vset.pattern.permute.xlu0 %v6940_v0 }
 0xa26   :  { %2706 = vperm.xlu2 %4060, %v2501_v15  }
 0xa27   :  { %v5936_v3 = vpop.permute.xlu1 %2460 }
 0xa28   :  { %v5959_v42 = vpop.permute.xlu2 %2480 }
 0xa2d   :  { %2538 = vperm.xlu1 %4065, %v2527_v52   ;;  %2584 = vperm.xlu0 %4070, %v5883_v16  }
 0xa2e   :  { %4066 = vset.pattern.permute.xlu2 %v6940_v0 }
 0xa2f   :  { %v5945_v12 = vpop.permute.xlu1 %2473 }
 0xa35   :  { %4068 = vset.pattern.permute.xlu1 %v6940_v0  ;;  %4073 = vset.pattern.permute.xlu0 %v6988_v4 }
 0xa36   :  { %2532 = vperm.xlu2 %4066, %v2527_v52  }
 0xa38   :  { %v5966_v35 = vpop.permute.xlu2 %2499 }
 0xa3d   :  { %2558 = vperm.xlu1 %4068, %v2553_v30   ;;  %2616 = vperm.xlu0 %4073, %v5891_v27  }
 0xa3e   :  { %2545 = vperm.xlu2 %4066, %v5876_v44  }
 0xa3f   :  { %v5951_v32 = vpop.permute.xlu1 %2493 }
 0xa40   :  { %v5974_v36 = vpop.permute.xlu2 %2512 }
 0xa45   :  { %2571 = vperm.xlu1 %4068, %v5896_v38   ;;  %4074 = vset.pattern.permute.xlu0 %v4753_v46 }
 0xa46   :  { %4069 = vset.pattern.permute.xlu2 %v6988_v4 }
 0xa47   :  { %v5964_v58 = vpop.permute.xlu1 %2506 }
 0xa4d   :  { %4071 = vset.pattern.permute.xlu1 %v6988_v4  ;;  %2718 = vperm.xlu0 %4074, %v2514_v20  }
 0xa4e   :  { %2564 = vperm.xlu2 %4069, %v2553_v30  }
 0xa50   :  { %v5980_v18 = vpop.permute.xlu2 %2628 }
 0xa55   :  { %2590 = vperm.xlu1 %4071, %v5883_v16   ;;  %4087 = vset.pattern.permute.xlu0 %v6940_v0 }
 0xa56   :  { %2577 = vperm.xlu2 %4069, %v5896_v38  }
 0xa57   :  { %v5970_v17 = vpop.permute.xlu1 %2622 }
 0xa58   :  { %v5991_v8 = vpop.permute.xlu2 %2640 }
 0xa5d   :  { %2603 = vperm.xlu1 %4071, %v5912_v63   ;;  %2815 = vperm.xlu0 %4087, %v5915_v41  }
 0xa5e   :  { %4072 = vset.pattern.permute.xlu2 %v6940_v0 }
 0xa5f   :  { %v5976_v53 = vpop.permute.xlu1 %2634 }
 0xa60   :  { %v5998_v7 = vpop.f32.mrf.mxu0 }
 0xa61   :  { %v6003_v21 = vperm.slane %v5998_v7, 2  ;;  %v6023_v13 = vperm.slane %v5998_v7, 4  ;;  %v6074_v24 = vperm.slane %v5998_v7, 7 }
 0xa63   :  { %6996 = vst [vmem:[#allocation19_spill] sm:$0xff] %v6023_v13 }
 0xa64   :  { %7008 = vst [vmem:[#allocation13_spill] sm:$0xff] %v6074_v24 }
 0xa65   :  { %4075 = vset.pattern.permute.xlu1 %v4758_v37  ;;  %4090 = vset.pattern.permute.xlu0 %v6988_v4 }
 0xa66   :  { %2597 = vperm.xlu2 %4072, %v5912_v63  }
 0xa68   :  { %v6000_v5 = vpop.permute.xlu2 %2658 }
 0xa6d   :  { %2724 = vperm.xlu1 %4075, %v2514_v20   ;;  %2847 = vperm.xlu0 %4090, %v5930_v59  }
 0xa6e   :  { %2610 = vperm.xlu2 %4072, %v5891_v27  }
 0xa6f   :  { %v5983_v14 = vpop.permute.xlu1 %2652 }
 0xa70   :  { %6993 = vst [vmem:[#allocation25_spill] sm:$0xff] %v5983_v14  ;;  %v6010_v34 = vpop.permute.xlu2 %2670 }
 0xa75   :  { %2736 = vperm.xlu1 %4075, %v2527_v52   ;;  %4093 = vset.pattern.permute.xlu0 %v6940_v0 }
 0xa76   :  { %4076 = vset.pattern.permute.xlu2 %v4753_v46 }
 0xa77   :  { %v5993_v43 = vpop.permute.xlu1 %2664 }
 0xa78   :  { %v6025_v15 = vpop.permute.xlu2 %2682 }
 0xa79   :  { %6997 = vst [vmem:[#allocation15_spill] sm:$0xff] %v6025_v15 }
 0xa7d   :  { %4077 = vset.pattern.permute.xlu1 %v4753_v46  ;;  %2880 = vperm.xlu0 %4093, %v5943_v29  }
 0xa7e   :  { %2730 = vperm.xlu2 %4076, %v2527_v52  }
 0xa7f   :  { %v6005_v10 = vpop.permute.xlu1 %2676 }
 0xa80   :  { %6994 = vst [vmem:[#allocation60_spill] sm:$0xff] %v6005_v10 }
 0xa85   :  { %2742 = vperm.xlu1 %4077, %v5876_v44   ;;  %4096 = vset.pattern.permute.xlu0 %v6988_v4 }
 0xa86   :  { %4078 = vset.pattern.permute.xlu2 %v4758_v37 }
 0xa87   :  { %v6015_v23 = vpop.permute.xlu1 %2700 }
 0xa88   :  { %6995 = vst [vmem:[#allocation34_spill] sm:$0xff] %v6015_v23 }
 0xa8d   :  { %4080 = vset.pattern.permute.xlu1 %v4758_v37  ;;  %2912 = vperm.xlu0 %4096, %v5957_v39  }
 0xa8e   :  { %2748 = vperm.xlu2 %4078, %v5876_v44   ;;  %v6036_v44 = vpop.permute.xlu2 %2706 }
 0xa8f   :  { %6999 = vst [vmem:[#allocation32_spill] sm:$0xff] %v6036_v44 }
 0xa95   :  { %2760 = vperm.xlu1 %4080, %v2553_v30   ;;  %4099 = vset.pattern.permute.xlu0 %v4753_v46 }
 0xa96   :  { %4079 = vset.pattern.permute.xlu2 %v4753_v46 }
 0xa97   :  { %v6033_v20 = vpop.permute.xlu1 %2525 }
 0xa98   :  { %6998 = vst [vmem:[#allocation21_spill] sm:$0xff] %v6033_v20 }
 0xa9d   :  { %4081 = vset.pattern.permute.xlu1 %v4753_v46  ;;  %3046 = vperm.xlu0 %4099, %v5930_v59  }
 0xa9e   :  { %2754 = vperm.xlu2 %4079, %v2553_v30   ;;  %v2823_v30 = vperm.slane %v5907_v40, 1 }
 0xa9f   :  { %v6040_v52 = vpop.permute.xlu1 %2538 }
 0xaa0   :  { %7000 = vst [vmem:[#allocation18_spill] sm:$0xff] %v6040_v52 }
 0xaa5   :  { %2766 = vperm.xlu1 %4081, %v5896_v38   ;;  %4102 = vset.pattern.permute.xlu0 %v4758_v37 }
 0xaa6   :  { %4082 = vset.pattern.permute.xlu2 %v4758_v37 }
 0xaad   :  { %4084 = vset.pattern.permute.xlu1 %v4758_v37  ;;  %3064 = vperm.xlu0 %4102, %v5986_v55  }
 0xaae   :  { %2772 = vperm.xlu2 %4082, %v5896_v38   ;;  %v6047_v38 = vpop.permute.xlu2 %2532 }
 0xaaf   :  { %7001 = vst [vmem:[#allocation20_spill] sm:$0xff] %v6047_v38 }
 0xab5   :  { %2784 = vperm.xlu1 %4084, %v5883_v16   ;;  %4111 = vset.pattern.permute.xlu0 %v6940_v0 }
 0xab6   :  { %4083 = vset.pattern.permute.xlu2 %v4753_v46 }
 0xabd   :  { %4085 = vset.pattern.permute.xlu1 %v4753_v46  ;;  %2945 = vperm.xlu0 %4111, %v6003_v21  }
 0xabe   :  { %2778 = vperm.xlu2 %4083, %v5883_v16   ;;  %v6043_v16 = vperm.slane %v5998_v7, 0 }
 0xac5   :  { %2790 = vperm.xlu1 %4085, %v5912_v63   ;;  %4114 = vset.pattern.permute.xlu0 %v6988_v4 }
 0xac6   :  { %4086 = vset.pattern.permute.xlu2 %v4758_v37 }
 0xacd   :  { %4088 = vset.pattern.permute.xlu1 %v6988_v4  ;;  %2977 = vperm.xlu0 %4114, %v6023_v13  }
 0xace   :  { %2796 = vperm.xlu2 %4086, %v5912_v63   ;;  %2227 = vrot.lane.b32.xlu1 %v2223_v26, %s4406_s22  ;;  %v6049_v63 = vpop.permute.xlu1 %2558  ;;  %v6054_v26 = vpop.permute.xlu2 %2545 }
 0xacf   :  { %7002 = vst [vmem:[#allocation16_spill] sm:$0xff] %v6049_v63 }
 0xad0   :  { %7003 = vst [vmem:[#allocation62_spill] sm:$0xff] %v6054_v26  ;;  %v6114_v26 = vperm.slane %v5998_v7, 5 }
 0xad5   :  { %4118 = vset.pattern.permute.xlu0 %v4758_v37 }
 0xad6   :  { %4089 = vset.pattern.permute.xlu2 %v6940_v0  ;;  %2821 = vperm.xlu1 %4088, %v5915_v41   ;;  %v6056_v2 = vpop.permute.xlu1 %2571  ;;  %v6061_v45 = vpop.permute.xlu2 %2564 }
 0xad7   :  { %7004 = vst [vmem:[#allocation36_spill] sm:$0xff] %v6056_v2 }
 0xad8   :  { %7005 = vst [vmem:[#allocation37_spill] sm:$0xff] %v6061_v45  ;;  %v6095_v45 = vperm.slane %v5907_v40, 6 }
 0xadd   :  { %3124 = vperm.xlu0 %4118, %v6043_v16  }
 0xade   :  { %2828 = vperm.xlu2 %4089, %v2823_v30   ;;  %2834 = vperm.xlu1 %4088, %v2823_v30   ;;  %v6063_v62 = vpop.permute.xlu1 %2590  ;;  %v6071_v9 = vpop.permute.xlu2 %2577 }
 0xadf   :  { %7006 = vst [vmem:[#allocation38_spill] sm:$0xff] %v6063_v62 }
 0xae0   :  { %7007 = vst [vmem:[#allocation39_spill] sm:$0xff] %v6071_v9  ;;  %v6090_v9 = vpop.permute.xlu0 %2454 }
 0xae5   :  { %4121 = vset.pattern.permute.xlu0 %v4753_v46 }
 0xae6   :  { %2841 = vperm.xlu2 %4089, %v5930_v59   ;;  %4091 = vset.pattern.permute.xlu1 %v6940_v0  ;;  %v6076_v47 = vpop.permute.xlu1 %2603  ;;  %v6083_v1 = vpop.permute.xlu2 %2597 }
 0xae7   :  { %7009 = vst [vmem:[#allocation14_spill] sm:$0xff] %v6076_v47 }
 0xae8   :  { %7010 = vst [vmem:[#allocation63_spill] sm:$0xff] %v6083_v1  ;;  %v6102_v1 = vpop.permute.xlu0 %2486 }
 0xaed   :  { %3142 = vperm.xlu0 %4121, %v6003_v21  }
 0xaee   :  { %4092 = vset.pattern.permute.xlu2 %v6988_v4  ;;  %2854 = vperm.xlu1 %4091, %v5986_v55   ;;  %v6085_v62 = vpop.permute.xlu1 %2724  ;;  %v6092_v47 = vpop.permute.xlu2 %2610 }
 0xaef   :  { %7011 = vst [vmem:[#allocation40_spill] sm:$0xff] %v6085_v62 }
 0xaf0   :  { %7012 = vst [vmem:[#allocation41_spill] sm:$0xff] %v6092_v47  ;;  %v6111_v47 = vpop.permute.xlu0 %2646 }
 0xaf1   :  { %7016 = vst [vmem:[#allocation44_spill] sm:$0xff] %v6111_v47 }
 0xaf5   :  { %4124 = vset.pattern.permute.xlu0 %v6988_v4 }
 0xaf6   :  { %2860 = vperm.xlu2 %4092, %v5986_v55   ;;  %2867 = vperm.xlu1 %4091, %v6066_v28   ;;  %v6100_v62 = vpop.permute.xlu1 %2736  ;;  %v6104_v2 = vpop.permute.xlu2 %2730 }
 0xaf7   :  { %7013 = vst [vmem:[#allocation42_spill] sm:$0xff] %v6100_v62 }
 0xaf8   :  { %7014 = vst [vmem:[#allocation43_spill] sm:$0xff] %v6104_v2  ;;  %v6123_v2 = vpop.permute.xlu0 %2688 }
 0xaf9   :  { %7019 = vst [vmem:[#allocation48_spill] sm:$0xff] %v6123_v2 }
 0xafd   :  { %3016 = vperm.xlu0 %4124, %v6074_v24  }
 0xafe   :  { %2873 = vperm.xlu2 %4092, %v6066_v28   ;;  %4094 = vset.pattern.permute.xlu1 %v6988_v4  ;;  %v6109_v40 = vpop.permute.xlu1 %2742  ;;  %v6116_v38 = vpop.permute.xlu2 %2748 }
 0xaff   :  { %7015 = vst [vmem:[#allocation64_spill] sm:$0xff] %v6109_v40 }
 0xb00   :  { %7017 = vst [vmem:[#allocation49_spill] sm:$0xff] %v6116_v38  ;;  %v6131_v38 = vpop.permute.xlu0 %2694 }
 0xb01   :  { %7022 = vst [vmem:[#allocation50_spill] sm:$0xff] %v6131_v38 }
 0xb05   :  { %4127 = vset.pattern.permute.xlu0 %v4753_v46 }
 0xb06   :  { %4095 = vset.pattern.permute.xlu2 %v6940_v0  ;;  %2886 = vperm.xlu1 %4094, %v5943_v29   ;;  %v6125_v63 = vpop.permute.xlu2 %2754 }
 0xb07   :  { %v6121_v62 = vpop.permute.xlu1 %2760  ;;  %7020 = vst [vmem:[#allocation51_spill] sm:$0xff] %v6125_v63 }
 0xb08   :  { %7018 = vst [vmem:[#allocation45_spill] sm:$0xff] %v6121_v62  ;;  %v6139_v22 = vpop.permute.xlu0 %2712 }
 0xb09   :  { %7025 = vst [vmem:[#allocation52_spill] sm:$0xff] %v6139_v22 }
 0xb0d   :  { %3166 = vperm.xlu0 %4127, %v6023_v13  }
 0xb0e   :  { %2893 = vperm.xlu2 %4095, %v6095_v45   ;;  %2899 = vperm.xlu1 %4094, %v6095_v45   ;;  %v6133_v52 = vpop.permute.xlu2 %2772 }
 0xb0f   :  { %7023 = vst [vmem:[#allocation46_spill] sm:$0xff] %v6133_v52 }
 0xb10   :  { %v6148_v52 = vpop.permute.xlu0 %2519 }
 0xb11   :  { %7028 = vst [vmem:[#allocation8_spill] sm:$0xff] %v6148_v52 }
 0xb15   :  { %4130 = vset.pattern.permute.xlu0 %v4758_v37 }
 0xb16   :  { %2906 = vperm.xlu2 %4095, %v5957_v39   ;;  %4097 = vset.pattern.permute.xlu1 %v4753_v46 }
 0xb17   :  { %v6129_v40 = vpop.permute.xlu1 %2766 }
 0xb18   :  { %7021 = vst [vmem:[#allocation53_spill] sm:$0xff] %v6129_v40  ;;  %v6141_v63 = vpop.permute.xlu2 %2778 }
 0xb19   :  { %7026 = vst [vmem:[#allocation67_spill] sm:$0xff] %v6141_v63 }
 0xb1d   :  { %3184 = vperm.xlu0 %4130, %v6114_v26  }
 0xb1e   :  { %4098 = vset.pattern.permute.xlu2 %v4758_v37  ;;  %3022 = vperm.xlu1 %4097, %v5915_v41  }
 0xb25   :  { %4131 = vset.pattern.permute.xlu0 %v4753_v46 }
 0xb26   :  { %3028 = vperm.xlu2 %4098, %v5915_v41   ;;  %3034 = vperm.xlu1 %4097, %v2823_v30  }
 0xb27   :  { %v6137_v62 = vpop.permute.xlu1 %2784 }
 0xb28   :  { %7024 = vst [vmem:[#allocation66_spill] sm:$0xff] %v6137_v62  ;;  %v6150_v40 = vpop.permute.xlu2 %2796 }
 0xb29   :  { %7029 = vst [vmem:[#allocation57_spill] sm:$0xff] %v6150_v40 }
 0xb2d   :  { %2802 = vperm.xlu0 %4131, %v5891_v27   ;;  %v6157_v27 = vpop.permute.xlu0 %2551 }
 0xb2e   :  { %3040 = vperm.xlu2 %4098, %v2823_v30   ;;  %4100 = vset.pattern.permute.xlu1 %v4758_v37  ;;  %v2221_v30 = vadd.f32 %v6020_v50, %v5840_v49  ;;  %7030 = vst [vmem:[#allocation61_spill] sm:$0xff] %v6157_v27 }
 0xb35   :  { %4136 = vset.pattern.permute.xlu0 %v4758_v37 }
 0xb36   :  { %4101 = vset.pattern.permute.xlu2 %v4753_v46  ;;  %3052 = vperm.xlu1 %4100, %v5930_v59  }
 0xb37   :  { %v6146_v41 = vpop.permute.xlu1 %2790 }
 0xb38   :  { %7027 = vst [vmem:[#allocation55_spill] sm:$0xff] %v6146_v41  ;;  %v2829_v59 = vpop.permute.xlu2 %2828  ;;  %v6161_v41 = vpop.permute.xlu0 %2584 }
 0xb39   :  { %7031 = vst [vmem:[#allocation59_spill] sm:$0xff] %v6161_v41 }
 0xb3e   :  { %3058 = vperm.xlu2 %4101, %v5986_v55   ;;  %3076 = vperm.xlu1 %4100, %v6066_v28  }
 0xb40   :  { %v2228_v63 = vpop.permute.xlu1 %2227  ;;  %v6163_v52 = vpop.permute.xlu2 %2841 }
 0xb41   :  { %v2233_v62 = vsel %vm281_vm15, %v2221_v30, %v2228_v63  ;;  %v6167_v63 = vpop.permute.xlu0 %2616 }
 0xb42   :  { %v2237_v20 = vmin.f32 %v2233_v62, 20.0  ;;  %7032 = vst [vmem:[#allocation56_spill] sm:$0xff] %v6167_v63  ;;  %vm2235_vm4 = vcmp.gt.f32.partialorder %v2233_v62, 20.0 }
 0xb44   :  { %v2239_v24 = vmul.f32 1.442695, %v2237_v20 }
 0xb46   :  { %4261 = vpow2.f32 %v2239_v24  ;;  %3070 = vperm.xlu2 %4101, %v6066_v28   ;;  %4103 = vset.pattern.permute.xlu1 %v4753_v46 }
 0xb48   :  { %v2822_v49 = vpop.permute.xlu1 %2821 }
 0xb49   :  { %v3211_v22 = vsel %vm281_vm15, %v6081_v19, %v2822_v49 }
 0xb4c   :  { %v4262_v55 = vpop.eup %4261 }
 0xb4d   :  { %v2243_v40 = vadd.f32 1.0, %v4262_v55 }
 0xb4e   :  { %4104 = vset.pattern.permute.xlu2 %v4758_v37  ;;  %3082 = vperm.xlu1 %4103, %v5943_v29  }
 0xb4f   :  { %4263 = vlog2.f32 %v2243_v40 }
 0xb50   :  { %v2861_v30 = vpop.permute.xlu2 %2860  ;;  %v2835_v55 = vpop.permute.xlu1 %2834 }
 0xb51   :  { %v3217_v10 = vsel %vm281_vm15, %v5936_v3, %v2861_v30 }
 0xb55   :  { %v4264_v20 = vpop.eup %4263 }
 0xb56   :  { %v2246_v24 = vmul.f32 0.6931472, %v4264_v20  ;;  %3088 = vperm.xlu2 %4104, %v5943_v29   ;;  %4106 = vset.pattern.permute.xlu1 %v4758_v37  ;;  %v6183_v29 = vsel %vm281_vm15, %v5752_v51, %v5902_v56  ;;  %v6185_v20 = vpop.permute.xlu0 %2718 }
 0xb57   :  { %7033 = vst [vmem:[#allocation54_spill] sm:$0xff] %v6185_v20 }
 0xb58   :  { %v6171_v28 = vsel %vm2235_vm4, %v2233_v62, %v2246_v24  ;;  %v3212_v62 = vsel %vm281_vm15, %v5920_v61, %v2829_v59  ;;  %v2874_v3 = vpop.permute.xlu2 %2873 }
 0xb59   :  { %v6175_v41 = vmul.f32 %v6171_v28, %v5820_v31  ;;  %v2280_v27 = vperm.slane %v6171_v28, 0  ;;  %v2266_v40 = vrot.slane %v6171_v28, 1  ;;  %v2267_v63 = vrot.slane %v6171_v28, 2 }
 0xb5a   :  { %v2268_v24 = vrot.slane %v6171_v28, 3  ;;  %v2269_v19 = vrot.slane %v6171_v28, 4  ;;  %v3219_v47 = vsel %vm281_vm15, %v5945_v12, %v2874_v3 }
 0xb5b   :  { %v2313_v31 = vmul.f32 %v2280_v27, %v6183_v29  ;;  %v6850_v44 = vperm.slane %v6175_v41, 0  ;;  %v3278_v6 = vrot.slane %v6175_v41, 3  ;;  %v2281_v23 = vperm.slane %v2266_v40, 0 }
 0xb5c   :  { %v2282_v15 = vperm.slane %v2267_v63, 0  ;;  %v3276_v51 = vrot.slane %v6175_v41, 1  ;;  %v6196_v56 = vperm.slane %v2268_v24, 0  ;;  %v3213_v40 = vsel %vm281_vm15, %v5934_v33, %v2835_v55 }
 0xb5d   :  { %v2346_v20 = vmul.f32 1.442695, %v2313_v31  ;;  %v3323_v61 = vmul.f32 %v6850_v44, %v3211_v22  ;;  %v3293_v59 = vperm.slane %v3278_v6, 0  ;;  %v2315_v38 = vmul.f32 %v2281_v23, %v6183_v29 }
 0xb5e   :  { %v3291_v2 = vperm.slane %v3276_v51, 0  ;;  %4105 = vset.pattern.permute.xlu2 %v4753_v46  ;;  %3100 = vperm.xlu1 %4106, %v6095_v45   ;;  %v2317_v22 = vmul.f32 %v2282_v15, %v6183_v29  ;;  %v2319_v30 = vmul.f32 %v6196_v56, %v6183_v29  ;;  %v3279_v55 = vrot.slane %v6175_v41, 4  ;;  %v2816_v24 = vpop.permute.xlu0 %2815 }
 0xb5f   :  { %4265 = vpow2.f32 %v2346_v20  ;;  %v6208_v31 = vmul.f32 %v3293_v59, %v3217_v10  ;;  %v2350_v6 = vmul.f32 1.442695, %v2315_v38  ;;  %v3277_v51 = vrot.slane %v6175_v41, 2 }
 0xb60   :  { %v6211_v49 = vmul.f32 %v3291_v2, %v3212_v62  ;;  %v3325_v63 = vmul.f32 %v3291_v2, %v3213_v40  ;;  %v2855_v33 = vpop.permute.xlu1 %2854  ;;  %v2284_v44 = vperm.slane %v2269_v19, 0  ;;  %v2270_v20 = vrot.slane %v6171_v28, 5 }
 0xb61   :  { %v3216_v10 = vsel %vm281_vm15, %v6090_v9, %v2855_v33  ;;  %4267 = vpow2.f32 %v2350_v6  ;;  %v2354_v38 = vmul.f32 1.442695, %v2317_v22  ;;  %v3294_v62 = vperm.slane %v3279_v55, 0 }
 0xb62   :  { %v6220_v2 = vmul.f32 %v3293_v59, %v3216_v10  ;;  %v6225_v40 = vsel %vm281_vm15, %v5730_v48, %v5856_v60  ;;  %v2358_v14 = vmul.f32 1.442695, %v2319_v30  ;;  %v3281_v19 = vrot.slane %v6175_v41, 6 }
 0xb63   :  { %v6230_v9 = vmul.f32 %v3294_v62, %v3219_v47  ;;  %v2271_v6 = vrot.slane %v6171_v28, 6  ;;  %v2312_v22 = vmul.f32 %v2280_v27, %v6225_v40  ;;  %v3214_v59 = vsel %vm281_vm15, %v5927_v57, %v6163_v52 }
 0xb64   :  { %v3292_v48 = vperm.slane %v3277_v51, 0  ;;  %v2321_v60 = vmul.f32 %v2284_v44, %v6183_v29  ;;  %4269 = vpow2.f32 %v2354_v38  ;;  %v2285_v12 = vperm.slane %v2270_v20, 0 }
 0xb65   :  { %v4266_v13 = vpop.eup %4265  ;;  %v2314_v47 = vmul.f32 %v2281_v23, %v6225_v40  ;;  %v2344_v3 = vmul.f32 1.442695, %v2312_v22  ;;  %4271 = vpow2.f32 %v2358_v14  ;;  %v6243_v55 = vperm.slane %v3281_v19, 0 }
 0xb66   :  { %v3355_v33 = vmul.f32 0.0, %v4266_v13  ;;  %3094 = vperm.xlu2 %4105, %v6095_v45   ;;  %4107 = vset.pattern.permute.xlu1 %v4753_v46  ;;  %v2316_v13 = vmul.f32 %v2282_v15, %v6225_v40  ;;  %v2286_v10 = vperm.slane %v2271_v6, 0  ;;  %v2848_v23 = vpop.permute.xlu0 %2847  ;;  %v2362_v20 = vmul.f32 1.442695, %v2321_v60 }
 0xb67   :  { %v4268_v52 = vpop.eup %4267  ;;  %4273 = vpow2.f32 %v2344_v3  ;;  %v3282_v15 = vrot.slane %v6175_v41, 7  ;;  %v2323_v19 = vmul.f32 %v2285_v12, %v6183_v29  ;;  %v2348_v22 = vmul.f32 1.442695, %v2314_v47 }
 0xb68   :  { %v6241_v30 = vadd.f32 %v3355_v33, %v3323_v61  ;;  %v2894_v27 = vpop.permute.xlu2 %2893  ;;  %v2868_v57 = vpop.permute.xlu1 %2867  ;;  %v3326_v6 = vmul.f32 %v3292_v48, %v3214_v59  ;;  %v2320_v33 = vmul.f32 %v2284_v44, %v6225_v40  ;;  %v2322_v60 = vmul.f32 %v2285_v12, %v6225_v40 }
 0xb69   :  { %v3222_v45 = vsel %vm281_vm15, %v5951_v32, %v2894_v27  ;;  %v3218_v51 = vsel %vm281_vm15, %v5949_v11, %v2868_v57  ;;  %v2318_v32 = vmul.f32 %v6196_v56, %v6225_v40  ;;  %v3215_v27 = vsel %vm281_vm15, %v5940_v25, %v2848_v23 }
 0xb6a   :  { %v3368_v61 = vmul.f32 %v4268_v52, %v6241_v30  ;;  %v6252_v14 = vmul.f32 %v6243_v55, %v3222_v45  ;;  %v6254_v38 = vmul.f32 %v3294_v62, %v3218_v51  ;;  %v4270_v3 = vpop.eup %4269  ;;  %v3210_v62 = vsel %vm281_vm15, %v5925_v54, %v2816_v24 }
 0xb6b   :  { %v6269_v57 = vmul.f32 %v2286_v10, %v6225_v40  ;;  %v2272_v47 = vrot.slane %v6171_v28, 7  ;;  %v4272_v56 = vpop.eup %4271  ;;  %4275 = vpow2.f32 %v2348_v22  ;;  %v2352_v44 = vmul.f32 1.442695, %v2316_v13 }
 0xb6c   :  { %v6260_v11 = vadd.f32 %v3368_v61, %v3325_v63  ;;  %v3327_v63 = vmul.f32 %v3292_v48, %v3215_v27  ;;  %4277 = vpow2.f32 %v2362_v20  ;;  %v2366_v54 = vmul.f32 1.442695, %v2323_v19 }
 0xb6d   :  { %v4274_v12 = vpop.eup %4273  ;;  %v2325_v25 = vmul.f32 %v2286_v10, %v6183_v29  ;;  %v2287_v24 = vperm.slane %v2272_v47, 0  ;;  %v6278_v28 = vperm.slane %v3282_v15, 0  ;;  %v7034_v48 = vperm.slane %v6175_v41, 0 }
 0xb6e   :  { %v3381_v59 = vmul.f32 %v4270_v3, %v6260_v11  ;;  %4108 = vset.pattern.permute.xlu2 %v4758_v37  ;;  %3106 = vperm.xlu1 %4107, %v5957_v39   ;;  %v3354_v23 = vmul.f32 0.0, %v4274_v12  ;;  %v2356_v22 = vmul.f32 1.442695, %v2318_v32  ;;  %4279 = vpow2.f32 %v2352_v44 }
 0xb6f   :  { %v3322_v51 = vmul.f32 %v7034_v48, %v3210_v62  ;;  %v2326_v13 = vmul.f32 %v2287_v24, %v6225_v40  ;;  %4281 = vpow2.f32 %v2366_v54  ;;  %v2370_v15 = vmul.f32 1.442695, %v2325_v25 }
 0xb70   :  { %v6276_v52 = vadd.f32 %v3381_v59, %v3327_v63  ;;  %v2907_v45 = vpop.permute.xlu2 %2906  ;;  %v3280_v27 = vrot.slane %v6175_v41, 5  ;;  %4283 = vpow2.f32 %v2356_v22  ;;  %v2224_v22 = vadd.f32 %v6020_v50, %v5998_v7 }
 0xb71   :  { %v3224_v61 = vsel %vm281_vm15, %v5964_v58, %v2907_v45  ;;  %v6289_v19 = vadd.f32 %v3354_v23, %v3322_v51  ;;  %v4276_v3 = vpop.eup %4275  ;;  %4285 = vpow2.f32 %v2370_v15  ;;  %v2881_v45 = vpop.permute.xlu0 %2880 }
 0xb72   :  { %v3394_v20 = vmul.f32 %v4272_v56, %v6276_v52  ;;  %v6287_v10 = vmul.f32 %v6278_v28, %v3224_v61  ;;  %v4278_v58 = vpop.eup %4277  ;;  %v2360_v56 = vmul.f32 1.442695, %v2320_v33  ;;  %v3295_v44 = vperm.slane %v3280_v27, 0 }
 0xb73   :  { %v3367_v32 = vmul.f32 %v4276_v3, %v6289_v19 }
 0xb74   :  { %v6292_v62 = vadd.f32 %v3394_v20, %v6208_v31  ;;  %v2327_v31 = vmul.f32 %v2287_v24, %v6183_v29  ;;  %v4280_v59 = vpop.eup %4279  ;;  %4287 = vpow2.f32 %v2360_v56 }
 0xb75   :  { %v6300_v63 = vadd.f32 %v3367_v32, %v6211_v49  ;;  %v4282_v54 = vpop.eup %4281  ;;  %v2364_v49 = vmul.f32 1.442695, %v2322_v60 }
 0xb76   :  { %v3407_v47 = vmul.f32 %v4278_v58, %v6292_v62  ;;  %3112 = vperm.xlu2 %4108, %v5957_v39   ;;  %4109 = vset.pattern.permute.xlu1 %v6940_v0  ;;  %v2374_v24 = vmul.f32 1.442695, %v2327_v31  ;;  %v4284_v23 = vpop.eup %4283 }
 0xb77   :  { %v3380_v25 = vmul.f32 %v4280_v59, %v6300_v63  ;;  %v4286_v61 = vpop.eup %4285  ;;  %4289 = vpow2.f32 %v2364_v49  ;;  %v2372_v59 = vmul.f32 1.442695, %v2326_v13 }
 0xb78   :  { %v6304_v41 = vadd.f32 %v3407_v47, %v6230_v9  ;;  %v2887_v12 = vpop.permute.xlu1 %2886  ;;  %4291 = vpow2.f32 %v2374_v24 }
 0xb79   :  { %v3221_v39 = vsel %vm281_vm15, %v6102_v1, %v2887_v12  ;;  %v6310_v51 = vadd.f32 %v3380_v25, %v3326_v6  ;;  %v2368_v6 = vmul.f32 1.442695, %v6269_v57  ;;  %v2913_v56 = vpop.permute.xlu0 %2912 }
 0xb7a   :  { %v3333_v33 = vmul.f32 %v3295_v44, %v3221_v39  ;;  %v3420_v48 = vmul.f32 %v4282_v54, %v6304_v41  ;;  %v4288_v15 = vpop.eup %4287  ;;  %v3220_v54 = vsel %vm281_vm15, %v5959_v42, %v2881_v45  ;;  %v3225_v25 = vsel %vm281_vm15, %v5974_v36, %v2913_v56 }
 0xb7b   :  { %v3393_v1 = vmul.f32 %v4284_v23, %v6310_v51  ;;  %4293 = vpow2.f32 %v2368_v6 }
 0xb7c   :  { %v6312_v9 = vadd.f32 %v3420_v48, %v3333_v33  ;;  %4295 = vpow2.f32 %v2372_v59  ;;  %v6374_v59 = vperm.slane %v5998_v7, 3 }
 0xb7d   :  { %v3395_v60 = vadd.f32 %v3393_v1, %v6220_v2  ;;  %v4290_v12 = vpop.eup %4289 }
 0xb7e   :  { %4110 = vset.pattern.permute.xlu2 %v6988_v4  ;;  %2919 = vperm.xlu1 %4109, %v6043_v16   ;;  %v3433_v20 = vmul.f32 %v4286_v61, %v6312_v9 }
 0xb7f   :  { %2229 = vrot.lane.b32.xlu2 %v2224_v22, %s4406_s22  ;;  %v3406_v47 = vmul.f32 %v4288_v15, %v3395_v60 }
 0xb80   :  { %v3029_v3 = vpop.permute.xlu2 %3028  ;;  %v2900_v27 = vpop.permute.xlu1 %2899 }
 0xb81   :  { %v3243_v58 = vsel %vm281_vm15, %v5980_v18, %v3029_v3  ;;  %v3223_v32 = vsel %vm281_vm15, %v5966_v35, %v2900_v27  ;;  %v3408_v2 = vadd.f32 %v3406_v47, %v6254_v38  ;;  %v6335_v18 = vperm.slane %v5998_v7, 1  ;;  %v4292_v35 = vpop.eup %4291  ;;  %v3047_v61 = vpop.permute.xlu0 %3046 }
 0xb82   :  { %v3359_v31 = vmul.f32 %v6241_v30, %v3243_v58  ;;  %v3335_v57 = vmul.f32 %v6243_v55, %v3223_v32  ;;  %v3332_v30 = vmul.f32 %v3295_v44, %v3220_v54  ;;  %v3337_v55 = vmul.f32 %v6278_v28, %v3225_v25  ;;  %v4294_v13 = vpop.eup %4293 }
 0xb83   :  { %v3419_v33 = vmul.f32 %v4290_v12, %v3408_v2  ;;  %v4296_v24 = vpop.eup %4295 }
 0xb84   :  { %v6332_v39 = vadd.f32 %v3433_v20, %v3335_v57 }
 0xb85   :  { %v6343_v42 = vadd.f32 %v3419_v33, %v3332_v30  ;;  %v7035_v33 = vld [vmem:[#allocation19_spill] sm:$0xff] }
 0xb86   :  { %2932 = vperm.xlu1 %4109, %v6335_v18   ;;  %v3446_v38 = vmul.f32 %v4292_v35, %v6332_v39 }
 0xb87   :  { %2925 = vperm.xlu2 %4110, %v6043_v16   ;;  %v3432_v44 = vmul.f32 %v4294_v13, %v6343_v42 }
 0xb88   :  { %v3041_v45 = vpop.permute.xlu2 %3040  ;;  %v6345_v48 = vadd.f32 %v3446_v38, %v3337_v55 }
 0xb89   :  { %v3245_v36 = vsel %vm281_vm15, %v5991_v8, %v3041_v45  ;;  %v6352_v28 = vadd.f32 %v3432_v44, %v6252_v14  ;;  %v3065_v14 = vpop.permute.xlu0 %3064  ;;  %v7036_v45 = vld [vmem:[#allocation44_spill] sm:$0xff] }
 0xb8a   :  { %v3372_v49 = vmul.f32 %v6260_v11, %v3245_v36  ;;  %v3246_v36 = vsel %vm281_vm15, %v7036_v45, %v3047_v61 }
 0xb8b   :  { %v3445_v23 = vmul.f32 %v4296_v24, %v6352_v28  ;;  %v3384_v24 = vmul.f32 %v6310_v51, %v3246_v36 }
 0xb8d   :  { %v6358_v22 = vadd.f32 %v3445_v23, %v6287_v10  ;;  %v3249_v10 = vsel %vm281_vm15, %v5993_v43, %v3065_v14 }
 0xb8e   :  { %4112 = vset.pattern.permute.xlu1 %v6988_v4  ;;  %v3398_v32 = vmul.f32 %v6292_v62, %v3249_v10 }
 0xb8f   :  { %2938 = vperm.xlu2 %4110, %v6335_v18  }
 0xb90   :  { %v3023_v1 = vpop.permute.xlu1 %3022 }
 0xb91   :  { %v3242_v8 = vsel %vm281_vm15, %v5970_v17, %v3023_v1 }
 0xb92   :  { %v3358_v11 = vmul.f32 %v6289_v19, %v3242_v8 }
 0xb94   :  { %v3360_v20 = vadd.f32 %v3359_v31, %v3358_v11 }
 0xb96   :  { %v3361_v6 = vrot.slane %v3360_v20, 4  ;;  %2951 = vperm.xlu1 %4112, %v6003_v21  }
 0xb97   :  { %4113 = vset.pattern.permute.xlu2 %v6940_v0 }
 0xb98   :  { %v3362_v15 = vadd.f32 %v3361_v6, %v3360_v20  ;;  %v3059_v3 = vpop.permute.xlu2 %3058  ;;  %v3035_v27 = vpop.permute.xlu1 %3034 }
 0xb99   :  { %v3248_v58 = vsel %vm281_vm15, %v6000_v5, %v3059_v3  ;;  %v3244_v17 = vsel %vm281_vm15, %v5976_v53, %v3035_v27  ;;  %v7039_v27 = vld [vmem:[#allocation60_spill] sm:$0xff] }
 0xb9a   :  { %v3397_v19 = vmul.f32 %v3395_v60, %v3248_v58  ;;  %v3371_v47 = vmul.f32 %v6300_v63, %v3244_v17  ;;  %v3363_v56 = vrot.slane %v3362_v15, 2 }
 0xb9c   :  { %v3399_v31 = vadd.f32 %v3398_v32, %v3397_v19  ;;  %v3373_v57 = vadd.f32 %v3372_v49, %v3371_v47  ;;  %v3364_v43 = vadd.f32 %v3363_v56, %v3362_v15  ;;  %v7037_v49 = vld [vmem:[#allocation25_spill] sm:$0xff]  ;;  %v7038_v15 = vld [vmem:[#allocation48_spill] sm:$0xff]  ;;  %v6398_v32 = vperm.slane %v5998_v7, 6 }
 0xb9e   :  { %v3374_v12 = vrot.slane %v3373_v57, 4  ;;  %2964 = vperm.xlu1 %4112, %v6374_v59   ;;  %v3365_v63 = vrot.slane %v3364_v43, 1  ;;  %v3400_v25 = vrot.slane %v3399_v31, 4 }
 0xb9f   :  { %2958 = vperm.xlu2 %4113, %v6374_v59  }
 0xba0   :  { %v3375_v5 = vadd.f32 %v3374_v12, %v3373_v57  ;;  %v3071_v54 = vpop.permute.xlu2 %3070  ;;  %v3366_v55 = vadd.f32 %v3365_v63, %v3364_v43  ;;  %v3401_v44 = vadd.f32 %v3400_v25, %v3399_v31  ;;  %v7040_v63 = vld [vmem:[#allocation50_spill] sm:$0xff] }
 0xba1   :  { %v3250_v53 = vsel %vm281_vm15, %v6010_v34, %v3071_v54 }
 0xba2   :  { %v3376_v62 = vrot.slane %v3375_v5, 2  ;;  %v3410_v60 = vmul.f32 %v3408_v2, %v3250_v53  ;;  %v3402_v8 = vrot.slane %v3401_v44, 2 }
 0xba4   :  { %v3377_v35 = vadd.f32 %v3376_v62, %v3375_v5  ;;  %v3403_v6 = vadd.f32 %v3402_v8, %v3401_v44 }
 0xba6   :  { %v3378_v30 = vrot.slane %v3377_v35, 1  ;;  %2990 = vperm.xlu1 %4112, %v6114_v26   ;;  %v3404_v47 = vrot.slane %v3403_v6, 1 }
 0xba7   :  { %2971 = vperm.xlu2 %4113, %v7035_v33  }
 0xba8   :  { %v3379_v38 = vadd.f32 %v3378_v30, %v3377_v35  ;;  %v3053_v13 = vpop.permute.xlu1 %3052  ;;  %v3405_v43 = vadd.f32 %v3404_v47, %v3403_v6  ;;  %v7041_v35 = vld [vmem:[#allocation15_spill] sm:$0xff]  ;;  %v7045_v47 = vld [vmem:[#allocation32_spill] sm:$0xff] }
 0xba9   :  { %v3247_v34 = vsel %vm281_vm15, %v7037_v49, %v3053_v13 }
 0xbaa   :  { %v3562_v2 = vsel %vm334_vm3, %v3366_v55, %v3379_v38  ;;  %v3385_v23 = vmul.f32 %v6276_v52, %v3247_v34 }
 0xbac   :  { %v3386_v1 = vadd.f32 %v3385_v23, %v3384_v24 }
 0xbae   :  { %v3387_v11 = vrot.slane %v3386_v1, 4  ;;  %4115 = vset.pattern.permute.xlu1 %v6940_v0 }
 0xbaf   :  { %2984 = vperm.xlu2 %4113, %v6114_v26  }
 0xbb0   :  { %v3388_v20 = vadd.f32 %v3387_v11, %v3386_v1  ;;  %v3089_v14 = vpop.permute.xlu2 %3088  ;;  %v3077_v61 = vpop.permute.xlu1 %3076  ;;  %v7043_v1 = vld [vmem:[#allocation34_spill] sm:$0xff] }
 0xbb1   :  { %v3253_v3 = vsel %vm281_vm15, %v7038_v15, %v3089_v14  ;;  %v3251_v10 = vsel %vm281_vm15, %v7039_v27, %v3077_v61  ;;  %v7044_v15 = vld [vmem:[#allocation29_spill] sm:$0xff] }
 0xbb2   :  { %v3389_v51 = vrot.slane %v3388_v20, 2  ;;  %v3424_v52 = vmul.f32 %v6312_v9, %v3253_v3  ;;  %v3411_v58 = vmul.f32 %v6304_v41, %v3251_v10  ;;  %v2222_v3 = vadd.f32 %v6020_v50, %v7044_v15 }
 0xbb4   :  { %v3390_v17 = vadd.f32 %v3389_v51, %v3388_v20  ;;  %v3412_v19 = vadd.f32 %v3411_v58, %v3410_v60 }
 0xbb6   :  { %v3391_v56 = vrot.slane %v3390_v17, 1  ;;  %v3413_v31 = vrot.slane %v3412_v19, 4  ;;  %2997 = vperm.xlu1 %4115, %v6398_v32  }
 0xbb7   :  { %4116 = vset.pattern.permute.xlu2 %v6988_v4 }
 0xbb8   :  { %v3392_v57 = vadd.f32 %v3391_v56, %v3390_v17  ;;  %v3414_v12 = vadd.f32 %v3413_v31, %v3412_v19 }
 0xbba   :  { %v3563_v5 = vsel %vm322_vm2, %v3562_v2, %v3392_v57  ;;  %v3415_v9 = vrot.slane %v3414_v12, 2 }
 0xbbb   :  { %v3564_v41 = vsel %vm310_vm0, %v3563_v5, %v3405_v43 }
 0xbbc   :  { %v3416_v54 = vadd.f32 %v3415_v9, %v3414_v12 }
 0xbbe   :  { %v3417_v53 = vrot.slane %v3416_v54, 1  ;;  %4119 = vset.pattern.permute.xlu1 %v4753_v46 }
 0xbbf   :  { %3003 = vperm.xlu2 %4116, %v6398_v32  }
 0xbc0   :  { %v3418_v7 = vadd.f32 %v3417_v53, %v3416_v54  ;;  %v3095_v62 = vpop.permute.xlu2 %3094  ;;  %v3083_v60 = vpop.permute.xlu1 %3082  ;;  %v7046_v53 = vld [vmem:[#allocation13_spill] sm:$0xff] }
 0xbc1   :  { %v3254_v4 = vsel %vm281_vm15, %v7040_v63, %v3095_v62  ;;  %v3252_v25 = vsel %vm281_vm15, %v7041_v35, %v3083_v60  ;;  %v7047_v63 = vld [vmem:[#allocation21_spill] sm:$0xff]  ;;  %v7048_v35 = vld [vmem:[#allocation31_spill] sm:$0xff] }
 0xbc2   :  { %v3436_v30 = vmul.f32 %v6352_v28, %v3254_v4  ;;  %v3423_v55 = vmul.f32 %v6343_v42, %v3252_v25  ;;  %v3565_v38 = vsel %vm1787_vm14, %v3564_v41, %v3418_v7  ;;  %v7042_v42 = vld [vmem:[#allocation52_spill] sm:$0xff] }
 0xbc4   :  { %v3425_v13 = vadd.f32 %v3424_v52, %v3423_v55 }
 0xbc6   :  { %v3426_v45 = vrot.slane %v3425_v13, 4  ;;  %3130 = vperm.xlu1 %4119, %v6335_v18  }
 0xbc7   :  { %4117 = vset.pattern.permute.xlu2 %v4753_v46 }
 0xbc8   :  { %v3427_v36 = vadd.f32 %v3426_v45, %v3425_v13  ;;  %v7049_v13 = vld [vmem:[#allocation18_spill] sm:$0xff] }
 0xbca   :  { %v3428_v44 = vrot.slane %v3427_v36, 2 }
 0xbcc   :  { %v3429_v49 = vadd.f32 %v3428_v44, %v3427_v36  ;;  %v7050_v36 = vld [vmem:[#allocation8_spill] sm:$0xff] }
 0xbce   :  { %v3430_v34 = vrot.slane %v3429_v49, 1  ;;  %4122 = vset.pattern.permute.xlu1 %v4758_v37 }
 0xbcf   :  { %3118 = vperm.xlu2 %4117, %v6043_v16  }
 0xbd0   :  { %v3431_v2 = vadd.f32 %v3430_v34, %v3429_v49  ;;  %v3113_v28 = vpop.permute.xlu2 %3112  ;;  %v3101_v24 = vpop.permute.xlu1 %3100 }
 0xbd1   :  { %v3257_v23 = vsel %vm281_vm15, %v7042_v42, %v3113_v28  ;;  %v3255_v8 = vsel %vm281_vm15, %v7043_v1, %v3101_v24 }
 0xbd2   :  { %v3450_v11 = vmul.f32 %v6345_v48, %v3257_v23  ;;  %v3437_v20 = vmul.f32 %v6332_v39, %v3255_v8  ;;  %v3566_v14 = vsel %vm1789_vm6, %v3565_v38, %v3431_v2 }
 0xbd4   :  { %v3438_v61 = vadd.f32 %v3437_v20, %v3436_v30 }
 0xbd6   :  { %v3439_v6 = vrot.slane %v3438_v61, 4  ;;  %3148 = vperm.xlu1 %4122, %v6003_v21  }
 0xbd7   :  { %4120 = vset.pattern.permute.xlu2 %v4758_v37 }
 0xbd8   :  { %v3440_v16 = vadd.f32 %v3439_v6, %v3438_v61 }
 0xbd9   :  { %v2230_v27 = vpop.permute.xlu2 %2229 }
 0xbda   :  { %v3441_v10 = vrot.slane %v3440_v16, 2  ;;  %v2234_v51 = vsel %vm281_vm15, %v2222_v3, %v2230_v27 }
 0xbdb   :  { %v2238_v52 = vmin.f32 %v2234_v51, 20.0  ;;  %vm2236_vm5 = vcmp.gt.f32.partialorder %v2234_v51, 20.0 }
 0xbdc   :  { %v3442_v58 = vadd.f32 %v3441_v10, %v3440_v16 }
 0xbdd   :  { %v2241_v17 = vmul.f32 1.442695, %v2238_v52 }
 0xbde   :  { %v3443_v39 = vrot.slane %v3442_v58, 1  ;;  %4125 = vset.pattern.permute.xlu1 %v4753_v46 }
 0xbdf   :  { %4297 = vpow2.f32 %v2241_v17  ;;  %3136 = vperm.xlu2 %4120, %v6335_v18  }
 0xbe0   :  { %v3444_v21 = vadd.f32 %v3443_v39, %v3442_v58  ;;  %v3107_v19 = vpop.permute.xlu1 %3106 }
 0xbe1   :  { %v3256_v56 = vsel %vm281_vm15, %v7045_v47, %v3107_v19  ;;  %v2926_v5 = vpop.permute.xlu2 %2925 }
 0xbe2   :  { %v3449_v50 = vmul.f32 %v6358_v22, %v3256_v56  ;;  %v6435_v31 = vsel %vm1791_vm7, %v3566_v14, %v3444_v21  ;;  %v3227_v4 = vsel %vm281_vm15, %v7047_v63, %v2926_v5  ;;  %v2946_v5 = vpop.permute.xlu0 %2945 }
 0xbe4   :  { %v3451_v57 = vadd.f32 %v3450_v11, %v3449_v50 }
 0xbe5   :  { %v4298_v12 = vpop.eup %4297 }
 0xbe6   :  { %v2244_v43 = vadd.f32 1.0, %v4298_v12  ;;  %3154 = vperm.xlu1 %4125, %v6374_v59   ;;  %v3452_v18 = vrot.slane %v3451_v57, 4 }
 0xbe7   :  { %4123 = vset.pattern.permute.xlu2 %v6940_v0 }
 0xbe8   :  { %4299 = vlog2.f32 %v2244_v43  ;;  %v3453_v54 = vadd.f32 %v3452_v18, %v3451_v57 }
 0xbe9   :  { %v2939_v7 = vpop.permute.xlu2 %2938 }
 0xbea   :  { %v3454_v38 = vrot.slane %v3453_v54, 2  ;;  %v3229_v45 = vsel %vm281_vm15, %v7049_v13, %v2939_v7 }
 0xbec   :  { %v3455_v17 = vadd.f32 %v3454_v38, %v3453_v54  ;;  %v7052_v54 = vld [vmem:[#allocation23_spill] sm:$0xff] }
 0xbee   :  { %v4300_v9 = vpop.eup %4299  ;;  %4128 = vset.pattern.permute.xlu1 %v4758_v37  ;;  %v3456_v18 = vrot.slane %v3455_v17, 1 }
 0xbef   :  { %v2248_v41 = vmul.f32 0.6931472, %v4300_v9  ;;  %3010 = vperm.xlu2 %4123, %v7046_v53  }
 0xbf0   :  { %v2920_v62 = vpop.permute.xlu1 %2919 }
 0xbf1   :  { %v6441_v60 = vsel %vm2236_vm5, %v2234_v51, %v2248_v41  ;;  %v3226_v44 = vsel %vm281_vm15, %v7050_v36, %v2920_v62 }
 0xbf2   :  { %v6447_v0 = vmul.f32 %v6441_v60, %v7048_v35  ;;  %v2288_v25 = vperm.slane %v6441_v60, 0  ;;  %v2273_v30 = vrot.slane %v6441_v60, 1  ;;  %v2274_v55 = vrot.slane %v6441_v60, 2 }
 0xbf3   :  { %v2275_v49 = vrot.slane %v6441_v60, 3  ;;  %v2276_v8 = vrot.slane %v6441_v60, 4  ;;  %v2277_v12 = vrot.slane %v6441_v60, 5 }
 0xbf4   :  { %v2329_v34 = vmul.f32 %v2288_v25, %v6183_v29  ;;  %v3298_v2 = vperm.slane %v6447_v0, 0  ;;  %v2289_v28 = vperm.slane %v2273_v30, 0  ;;  %v3283_v24 = vrot.slane %v6447_v0, 1 }
 0xbf5   :  { %v2328_v42 = vmul.f32 %v2288_v25, %v6225_v40  ;;  %v2290_v23 = vperm.slane %v2274_v55, 0  ;;  %v2291_v1 = vperm.slane %v2275_v49, 0  ;;  %v3285_v39 = vrot.slane %v6447_v0, 3 }
 0xbf6   :  { %v2378_v11 = vmul.f32 1.442695, %v2329_v34  ;;  %v3339_v20 = vmul.f32 %v3298_v2, %v3227_v4  ;;  %v2331_v14 = vmul.f32 %v2289_v28, %v6183_v29  ;;  %v3299_v61 = vperm.slane %v3283_v24, 0  ;;  %3172 = vperm.xlu1 %4128, %v7035_v33   ;;  %v7051_v33 = vld [vmem:[#allocation16_spill] sm:$0xff] }
 0xbf7   :  { %v2376_v6 = vmul.f32 1.442695, %v2328_v42  ;;  %v3338_v16 = vmul.f32 %v3298_v2, %v3226_v44  ;;  %4126 = vset.pattern.permute.xlu2 %v4758_v37  ;;  %v2330_v15 = vmul.f32 %v2289_v28, %v6225_v40  ;;  %v2332_v3 = vmul.f32 %v2290_v23, %v6225_v40 }
 0xbf8   :  { %4301 = vpow2.f32 %v2378_v11  ;;  %v2382_v27 = vmul.f32 1.442695, %v2331_v14  ;;  %v3341_v10 = vmul.f32 %v3299_v61, %v3229_v45  ;;  %v2334_v51 = vmul.f32 %v2291_v1, %v6225_v40  ;;  %v2933_v9 = vpop.permute.xlu1 %2932  ;;  %v7053_v45 = vld [vmem:[#allocation20_spill] sm:$0xff] }
 0xbf9   :  { %4303 = vpow2.f32 %v2376_v6  ;;  %v2380_v52 = vmul.f32 1.442695, %v2330_v15  ;;  %v2959_v58 = vpop.permute.xlu2 %2958  ;;  %v2292_v19 = vperm.slane %v2276_v8, 0  ;;  %v6471_v47 = vperm.slane %v3285_v39, 0  ;;  %v2978_v6 = vpop.permute.xlu0 %2977 }
 0xbfa   :  { %v3232_v21 = vsel %vm281_vm15, %v7051_v33, %v2959_v58  ;;  %4305 = vpow2.f32 %v2382_v27  ;;  %v2333_v56 = vmul.f32 %v2290_v23, %v6183_v29  ;;  %v2384_v50 = vmul.f32 1.442695, %v2332_v3  ;;  %v7054_v27 = vld [vmem:[#allocation62_spill] sm:$0xff] }
 0xbfb   :  { %4307 = vpow2.f32 %v2380_v52  ;;  %v2336_v57 = vmul.f32 %v2292_v19, %v6225_v40  ;;  %v6477_v41 = vmul.f32 %v6471_v47, %v3232_v21  ;;  %v2335_v4 = vmul.f32 %v2291_v1, %v6183_v29 }
 0xbfc   :  { %v2386_v7 = vmul.f32 1.442695, %v2333_v56  ;;  %v2278_v25 = vrot.slane %v6441_v60, 6  ;;  %v2388_v55 = vmul.f32 1.442695, %v2334_v51  ;;  %v3284_v38 = vrot.slane %v6447_v0, 2 }
 0xbfd   :  { %v3228_v36 = vsel %vm281_vm15, %v7053_v45, %v2933_v9  ;;  %v2293_v44 = vperm.slane %v2277_v12, 0  ;;  %v3457_v49 = vadd.f32 %v3456_v18, %v3455_v17  ;;  %v2390_v28 = vmul.f32 1.442695, %v2335_v4 }
 0xbfe   :  { %v4302_v43 = vpop.eup %4301  ;;  %2808 = vperm.xlu1 %4128, %v7052_v54   ;;  %4309 = vpow2.f32 %v2386_v7  ;;  %v3300_v42 = vperm.slane %v3284_v38, 0  ;;  %v2392_v8 = vmul.f32 1.442695, %v2336_v57  ;;  %v2279_v15 = vrot.slane %v6441_v60, 7 }
 0xbff   :  { %v4304_v62 = vpop.eup %4303  ;;  %v3459_v63 = vmul.f32 %v4302_v43, %v6345_v48  ;;  %3160 = vperm.xlu2 %4126, %v6374_v59   ;;  %4311 = vpow2.f32 %v2384_v50  ;;  %v2338_v11 = vmul.f32 %v2293_v44, %v6225_v40  ;;  %v2337_v52 = vmul.f32 %v2292_v19, %v6183_v29 }
 0xc00   :  { %v3458_v30 = vmul.f32 %v4304_v62, %v6358_v22  ;;  %v4306_v48 = vpop.eup %4305  ;;  %v3340_v22 = vmul.f32 %v3299_v61, %v3228_v36  ;;  %4313 = vpow2.f32 %v2388_v55  ;;  %v6503_v61 = vsel %vm1793_vm9, %v6435_v31, %v3457_v49  ;;  %v7055_v31 = vld [vmem:[#allocation61_spill] sm:$0xff]  ;;  %v7056_v62 = vld [vmem:[#allocation36_spill] sm:$0xff] }
 0xc01   :  { %v6486_v13 = vadd.f32 %v3459_v63, %v3339_v20  ;;  %v4308_v34 = vpop.eup %4307  ;;  %v2972_v23 = vpop.permute.xlu2 %2971  ;;  %v2294_v20 = vperm.slane %v2278_v25, 0  ;;  %4315 = vpow2.f32 %v2390_v28  ;;  %v2295_v33 = vperm.slane %v2279_v15, 0 }
 0xc02   :  { %v6490_v59 = vadd.f32 %v3458_v30, %v3338_v16  ;;  %4317 = vpow2.f32 %v2392_v8  ;;  %v2396_v56 = vmul.f32 1.442695, %v2338_v11  ;;  %v3286_v12 = vrot.slane %v6447_v0, 4  ;;  %v6526_v25 = vpop.permute.xlu0 %3124 }
 0xc03   :  { %v3472_v2 = vmul.f32 %v4306_v48, %v6486_v13  ;;  %v2340_v60 = vmul.f32 %v2294_v20, %v6225_v40  ;;  %v2394_v19 = vmul.f32 1.442695, %v2337_v52  ;;  %v6519_v18 = vmul.f32 %v2295_v33, %v6225_v40 }
 0xc04   :  { %v3471_v24 = vmul.f32 %v4308_v34, %v6490_v59  ;;  %v4310_v14 = vpop.eup %4309  ;;  %v3234_v63 = vsel %vm281_vm15, %v7056_v62, %v2972_v23  ;;  %4319 = vpow2.f32 %v2396_v56  ;;  %v3302_v55 = vperm.slane %v3286_v12, 0  ;;  %v7060_v56 = vld [vmem:[#allocation38_spill] sm:$0xff] }
 0xc05   :  { %v6494_v1 = vadd.f32 %v3472_v2, %v3341_v10  ;;  %v4312_v3 = vpop.eup %4311  ;;  %v3230_v10 = vsel %vm281_vm15, %v7054_v27, %v2946_v5  ;;  %v2339_v5 = vmul.f32 %v2293_v44, %v6183_v29  ;;  %v2400_v4 = vmul.f32 1.442695, %v2340_v60  ;;  %v7057_v2 = vld [vmem:[#allocation59_spill] sm:$0xff] }
 0xc06   :  { %v6497_v16 = vadd.f32 %v3471_v24, %v3340_v22  ;;  %4132 = vset.pattern.permute.xlu1 %v4753_v46  ;;  %v3342_v17 = vmul.f32 %v3300_v42, %v3230_v10  ;;  %v4314_v50 = vpop.eup %4313  ;;  %v3287_v38 = vrot.slane %v6447_v0, 5  ;;  %4321 = vpow2.f32 %v2394_v19  ;;  %v7058_v22 = vld [vmem:[#allocation37_spill] sm:$0xff]  ;;  %v7059_v10 = vld [vmem:[#allocation39_spill] sm:$0xff] }
 0xc07   :  { %4129 = vset.pattern.permute.xlu2 %v4753_v46  ;;  %v3485_v51 = vmul.f32 %v4310_v14, %v6494_v1  ;;  %v4316_v7 = vpop.eup %4315  ;;  %v2398_v44 = vmul.f32 1.442695, %v2339_v5  ;;  %v2341_v48 = vmul.f32 %v2294_v20, %v6183_v29  ;;  %v3346_v49 = vmul.f32 %v3302_v55, %v3234_v63 }
 0xc08   :  { %v3484_v58 = vmul.f32 %v4312_v3, %v6497_v16  ;;  %v2952_v39 = vpop.permute.xlu1 %2951  ;;  %v4318_v36 = vpop.eup %4317  ;;  %4323 = vpow2.f32 %v2400_v4  ;;  %v3303_v23 = vperm.slane %v3287_v38, 0  ;;  %v2343_v20 = vmul.f32 %v2295_v33, %v6183_v29 }
 0xc09   :  { %v3231_v21 = vsel %vm281_vm15, %v7055_v31, %v2952_v39  ;;  %v2985_v40 = vpop.permute.xlu2 %2984  ;;  %4325 = vpow2.f32 %v2398_v44  ;;  %v2402_v11 = vmul.f32 1.442695, %v2341_v48  ;;  %v3288_v31 = vrot.slane %v6447_v0, 6 }
 0xc0a   :  { %v6514_v57 = vadd.f32 %v3484_v58, %v3342_v17  ;;  %v3343_v43 = vmul.f32 %v3300_v42, %v3231_v21  ;;  %v3236_v28 = vsel %vm281_vm15, %v7057_v2, %v2985_v40  ;;  %v4320_v8 = vpop.eup %4319  ;;  %v6550_v52 = vpop.permute.xlu0 %3142  ;;  %v2406_v29 = vmul.f32 1.442695, %v2343_v20 }
 0xc0b   :  { %v3348_v14 = vmul.f32 %v3303_v23, %v3236_v28  ;;  %4327 = vpow2.f32 %v2402_v11  ;;  %v3289_v5 = vrot.slane %v6447_v0, 7  ;;  %v3304_v62 = vperm.slane %v3288_v31, 0  ;;  %v7063_v28 = vld [vmem:[#allocation63_spill] sm:$0xff] }
 0xc0c   :  { %v3497_v9 = vmul.f32 %v4314_v50, %v6514_v57  ;;  %v6522_v54 = vadd.f32 %v3485_v51, %v3343_v43  ;;  %v4322_v27 = vpop.eup %4321  ;;  %v3235_v51 = vsel %vm281_vm15, %v7059_v10, %v2978_v6  ;;  %4329 = vpow2.f32 %v2406_v29  ;;  %v7067_v29 = vld [vmem:[#allocation42_spill] sm:$0xff] }
 0xc0d   :  { %v3347_v58 = vmul.f32 %v3302_v55, %v3235_v51  ;;  %v3305_v38 = vperm.slane %v3289_v5, 0 }
 0xc0e   :  { %v6529_v30 = vadd.f32 %v3497_v9, %v6477_v41  ;;  %3190 = vperm.xlu1 %4132, %v6398_v32   ;;  %v3498_v45 = vmul.f32 %v4316_v7, %v6522_v54  ;;  %v4324_v39 = vpop.eup %4323 }
 0xc0f   :  { %3178 = vperm.xlu2 %4129, %v6114_v26   ;;  %v4326_v21 = vpop.eup %4325 }
 0xc10   :  { %v3510_v34 = vmul.f32 %v4318_v36, %v6529_v30  ;;  %v2965_v41 = vpop.permute.xlu1 %2964  ;;  %v7062_v36 = vld [vmem:[#allocation56_spill] sm:$0xff] }
 0xc11   :  { %v3233_v24 = vsel %vm281_vm15, %v7058_v22, %v2965_v41  ;;  %v4328_v63 = vpop.eup %4327 }
 0xc12   :  { %v6541_v42 = vadd.f32 %v3510_v34, %v3346_v49  ;;  %v3345_v26 = vmul.f32 %v6471_v47, %v3233_v24  ;;  %v3017_v4 = vpop.permute.xlu0 %3016  ;;  %v4330_v0 = vpop.eup %4329  ;;  %v2404_v34 = vmul.f32 1.442695, %v6519_v18  ;;  %v7064_v24 = vld [vmem:[#allocation40_spill] sm:$0xff] }
 0xc13   :  { %v3241_v44 = vsel %vm281_vm15, %v7062_v36, %v3017_v4  ;;  %v7069_v4 = vld [vmem:[#allocation49_spill] sm:$0xff] }
 0xc14   :  { %v6545_v15 = vadd.f32 %v3498_v45, %v3345_v26  ;;  %v3523_v3 = vmul.f32 %v4320_v8, %v6541_v42  ;;  %v3353_v48 = vmul.f32 %v3305_v38, %v3241_v44  ;;  %4331 = vpow2.f32 %v2404_v34  ;;  %v7065_v8 = vld [vmem:[#allocation54_spill] sm:$0xff]  ;;  %v7070_v36 = vld [vmem:[#allocation41_spill] sm:$0xff] }
 0xc16   :  { %v3511_v17 = vmul.f32 %v4322_v27, %v6545_v15  ;;  %4135 = vset.pattern.permute.xlu1 %v4758_v37  ;;  %v6554_v47 = vadd.f32 %v3523_v3, %v3348_v14 }
 0xc17   :  { %4133 = vset.pattern.permute.xlu2 %v4758_v37  ;;  %v7061_v37 = vld [vmem:[#allocation14_spill] sm:$0xff] }
 0xc18   :  { %v2991_v60 = vpop.permute.xlu1 %2990  ;;  %v6557_v33 = vadd.f32 %v3511_v17, %v3347_v58  ;;  %v3536_v6 = vmul.f32 %v4324_v39, %v6554_v47 }
 0xc19   :  { %v3237_v50 = vsel %vm281_vm15, %v7060_v56, %v2991_v60  ;;  %v3004_v12 = vpop.permute.xlu2 %3003 }
 0xc1a   :  { %v3349_v43 = vmul.f32 %v3303_v23, %v3237_v50  ;;  %v3524_v19 = vmul.f32 %v4326_v21, %v6557_v33  ;;  %v3239_v9 = vsel %vm281_vm15, %v7061_v37, %v3004_v12  ;;  %v3259_v23 = vsel %vm281_vm15, %v7064_v24, %v6526_v25  ;;  %v6597_v25 = vld [vmem:[%s6807_s12 + $0x1] sm:$0x1] }
 0xc1b   :  { %v3351_v55 = vmul.f32 %v3304_v62, %v3239_v9  ;;  %v3463_v20 = vmul.f32 %v6486_v13, %v3259_v23  ;;  %v7066_v13 = vld [vmem:[#allocation43_spill] sm:$0xff]  ;;  %v7068_v9 = vld [vmem:[#allocation64_spill] sm:$0xff] }
 0xc1c   :  { %v6567_v7 = vadd.f32 %v3524_v19, %v3349_v43 }
 0xc1e   :  { %3208 = vperm.xlu1 %4135, %v7046_v53   ;;  %v3537_v40 = vmul.f32 %v4328_v63, %v6567_v7 }
 0xc1f   :  { %3196 = vperm.xlu2 %4133, %v6398_v32  }
 0xc20   :  { %v6572_v45 = vadd.f32 %v3537_v40, %v3351_v55 }
 0xc22   :  { %v3550_v49 = vmul.f32 %v4330_v0, %v6572_v45 }
 0xc24   :  { %v6578_v41 = vadd.f32 %v3550_v49, %v3353_v48 }
 0xc27   :  { %4134 = vset.pattern.permute.xlu2 %v4753_v46  ;;  %v4332_v46 = vpop.eup %4331 }
 0xc28   :  { %v2998_v2 = vpop.permute.xlu1 %2997 }
 0xc29   :  { %v3238_v32 = vsel %vm281_vm15, %v7063_v28, %v2998_v2  ;;  %v3119_v22 = vpop.permute.xlu2 %3118 }
 0xc2a   :  { %v3350_v26 = vmul.f32 %v3304_v62, %v3238_v32  ;;  %v3258_v11 = vsel %vm281_vm15, %v7065_v8, %v3119_v22  ;;  %v3262_v62 = vsel %vm281_vm15, %v7068_v9, %v6550_v52  ;;  %v7071_v8 = vld [vmem:[#allocation51_spill] sm:$0xff] }
 0xc2b   :  { %v3462_v18 = vmul.f32 %v6490_v59, %v3258_v11  ;;  %v3488_v40 = vmul.f32 %v6514_v57, %v3262_v62  ;;  %v7078_v9 = vld [vmem:[#allocation67_spill] sm:$0xff] }
 0xc2c   :  { %v6590_v14 = vadd.f32 %v3536_v6, %v3350_v26 }
 0xc2d   :  { %v3464_v3 = vadd.f32 %v3463_v20, %v3462_v18  ;;  %v7072_v20 = vld [vmem:[#allocation45_spill] sm:$0xff] }
 0xc2e   :  { %v3549_v27 = vmul.f32 %v4332_v46, %v6590_v14 }
 0xc2f   :  { %3202 = vperm.xlu2 %4134, %v7046_v53   ;;  %v3465_v10 = vrot.slane %v3464_v3, 4 }
 0xc31   :  { %v3466_v51 = vadd.f32 %v3465_v10, %v3464_v3 }
 0xc33   :  { %v3467_v31 = vrot.slane %v3466_v51, 2 }
 0xc35   :  { %v3468_v56 = vadd.f32 %v3467_v31, %v3466_v51  ;;  %v7074_v51 = vld [vmem:[#allocation35_spill] sm:$0xff] }
 0xc37   :  { %3578 = vrot.lane.b32.xlu2 %v6597_v25, %s4406_s22  ;;  %v3469_v43 = vrot.slane %v3468_v56, 1 }
 0xc38   :  { %v3131_v59 = vpop.permute.xlu1 %3130 }
 0xc39   :  { %v3260_v58 = vsel %vm281_vm15, %v7066_v13, %v3131_v59  ;;  %v3137_v17 = vpop.permute.xlu2 %3136  ;;  %v7073_v59 = vld [vmem:[#allocation28_spill] sm:$0xff] }
 0xc3a   :  { %v3475_v39 = vmul.f32 %v6497_v16, %v3260_v58  ;;  %v3261_v53 = vsel %vm281_vm15, %v7067_v29, %v3137_v17  ;;  %v3470_v16 = vadd.f32 %v3469_v43, %v3468_v56  ;;  %v6629_v13 = vsel %vm281_vm15, %v7074_v51, %v7073_v59  ;;  %v7076_v56 = vld [vmem:[#allocation46_spill] sm:$0xff] }
 0xc3b   :  { %v3476_v60 = vmul.f32 %v6494_v1, %v3261_v53  ;;  %v3587_v17 = vsub.f32 0.0, %v6629_v13  ;;  %v7077_v43 = vld [vmem:[#allocation66_spill] sm:$0xff] }
 0xc3d   :  { %v3477_v6 = vadd.f32 %v3476_v60, %v3475_v39  ;;  %v3589_v53 = vmul.f32 1.442695, %v3587_v17 }
 0xc3f   :  { %v3478_v21 = vrot.slane %v3477_v6, 4  ;;  %4333 = vpow2.f32 %v3589_v53 }
 0xc41   :  { %v3479_v50 = vadd.f32 %v3478_v21, %v3477_v6  ;;  %v7075_v6 = vld [vmem:[#allocation53_spill] sm:$0xff] }
 0xc43   :  { %v3480_v12 = vrot.slane %v3479_v50, 2 }
 0xc45   :  { %v3481_v19 = vadd.f32 %v3480_v12, %v3479_v50 }
 0xc47   :  { %v3482_v5 = vrot.slane %v3481_v19, 1 }
 0xc48   :  { %v3149_v37 = vpop.permute.xlu1 %3148 }
 0xc49   :  { %v3483_v63 = vadd.f32 %v3482_v5, %v3481_v19  ;;  %v3263_v55 = vsel %vm281_vm15, %v7069_v4, %v3149_v37  ;;  %v3011_v1 = vpop.permute.xlu2 %3010 }
 0xc4a   :  { %v3489_v0 = vmul.f32 %v6522_v54, %v3263_v55  ;;  %v3240_v44 = vsel %vm281_vm15, %v7070_v36, %v3011_v1  ;;  %v7079_v55 = vld [vmem:[#allocation30_spill] sm:$0xff] }
 0xc4b   :  { %v3569_v48 = vsel %vm334_vm3, %v3470_v16, %v3483_v63  ;;  %v3352_v49 = vmul.f32 %v3305_v38, %v3240_v44  ;;  %v7080_v1 = vld [vmem:[#allocation22_spill] sm:$0xff] }
 0xc4c   :  { %v3490_v34 = vadd.f32 %v3489_v0, %v3488_v40  ;;  %v6648_v40 = vsel %vm281_vm15, %v7080_v1, %v7079_v55 }
 0xc4d   :  { %v6617_v2 = vadd.f32 %v3549_v27, %v3352_v49  ;;  %v3167_v27 = vpop.permute.xlu0 %3166  ;;  %v3931_v49 = vld [vmem:[%s6805_s10 + $0x78] sm:$0xff] }
 0xc4e   :  { %v3491_v52 = vrot.slane %v3490_v34, 4  ;;  %3660 = vmatpush.msrb.mxu2 %v3931_v49 }
 0xc50   :  { %v3492_v28 = vadd.f32 %v3491_v52, %v3490_v34 }
 0xc52   :  { %v3493_v32 = vrot.slane %v3492_v28, 2 }
 0xc54   :  { %v3494_v22 = vadd.f32 %v3493_v32, %v3492_v28  ;;  %v3929_v28 = vld [vmem:[%s6805_s10 + $0x68] sm:$0xff] }
 0xc56   :  { %v3495_v24 = vrot.slane %v3494_v22, 1 }
 0xc58   :  { %v3496_v23 = vadd.f32 %v3495_v24, %v3494_v22  ;;  %v3155_v26 = vpop.permute.xlu1 %3154 }
 0xc59   :  { %v3264_v57 = vsel %vm281_vm15, %v7071_v8, %v3155_v26  ;;  %v3161_v54 = vpop.permute.xlu2 %3160 }
 0xc5a   :  { %v3570_v11 = vsel %vm322_vm2, %v3569_v48, %v3496_v23  ;;  %v3501_v18 = vmul.f32 %v6529_v30, %v3264_v57  ;;  %v3265_v38 = vsel %vm281_vm15, %v7072_v20, %v3161_v54  ;;  %v3185_v30 = vpop.permute.xlu0 %3184 }
 0xc5b   :  { %v3502_v46 = vmul.f32 %v6545_v15, %v3265_v38  ;;  %v3266_v15 = vsel %vm281_vm15, %v7075_v6, %v3167_v27  ;;  %v3269_v19 = vsel %vm281_vm15, %v7077_v43, %v3185_v30  ;;  %v3924_v43 = vld [vmem:[%s6805_s10 + $0x40] sm:$0xff] }
 0xc5c   :  { %v3514_v5 = vmul.f32 %v6541_v42, %v3266_v15  ;;  %v3528_v4 = vmul.f32 %v6567_v7, %v3269_v19  ;;  %v4334_v7 = vpop.eup %4333 }
 0xc5d   :  { %v3503_v3 = vadd.f32 %v3502_v46, %v3501_v18  ;;  %v6660_v24 = vadd.f32 1.0, %v4334_v7 }
 0xc5f   :  { %v3504_v10 = vrot.slane %v3503_v3, 4  ;;  %vm3600_vm2 = vweird.f32 %v6660_v24  ;;  %v3604_v55 = vand.u32 2147483647, %v6660_v24 }
 0xc61   :  { %v3505_v58 = vadd.f32 %v3504_v10, %v3503_v3  ;;  %v7081_v10 = vld [vmem:[#allocation57_spill] sm:$0xff] }
 0xc63   :  { %v3506_v39 = vrot.slane %v3505_v58, 2 }
 0xc65   :  { %v3507_v29 = vadd.f32 %v3506_v39, %v3505_v58  ;;  %v7082_v39 = vld [vmem:[#allocation55_spill] sm:$0xff] }
 0xc67   :  { %v3508_v60 = vrot.slane %v3507_v29, 1 }
 0xc68   :  { %v3173_v31 = vpop.permute.xlu1 %3172 }
 0xc69   :  { %v3509_v21 = vadd.f32 %v3508_v60, %v3507_v29  ;;  %v3267_v50 = vsel %vm281_vm15, %v7076_v56, %v3173_v31  ;;  %v3179_v12 = vpop.permute.xlu2 %3178  ;;  %v3928_v60 = vld [vmem:[%s6805_s10 + $0x60] sm:$0xff]  ;;  %v3927_v31 = vld [vmem:[%s6805_s10 + $0x58] sm:$0xff] }
 0xc6a   :  { %v3515_v37 = vmul.f32 %v6557_v33, %v3267_v50  ;;  %v3268_v62 = vsel %vm281_vm15, %v7078_v9, %v3179_v12  ;;  %v3588_v33 = vsub.f32 0.0, %v6648_v40 }
 0xc6b   :  { %v3571_v16 = vsel %vm310_vm0, %v3570_v11, %v3509_v21  ;;  %v3527_v63 = vmul.f32 %v6554_v47, %v3268_v62  ;;  %v3930_v47 = vld [vmem:[%s6805_s10 + $0x70] sm:$0xff]  ;;  %v3606_v62 = vand.u32 2147483648, %v6660_v24 }
 0xc6c   :  { %v3516_v0 = vadd.f32 %v3515_v37, %v3514_v5  ;;  %v3591_v32 = vmul.f32 1.442695, %v3588_v33  ;;  %3661 = vmatpush.msrb.mxu2 %v3930_v47  ;;  %v3926_v21 = vld [vmem:[%s6805_s10 + $0x50] sm:$0xff] }
 0xc6d   :  { %v3529_v36 = vadd.f32 %v3528_v4, %v3527_v63  ;;  %v2803_v63 = vpop.permute.xlu0 %2802  ;;  %v3607_v33 = vor.u32 1.1754944e-38, %v3606_v62  ;;  %v7088_v62 = vld [vmem:[#allocation58_spill] sm:$0xff] }
 0xc6e   :  { %v3517_v42 = vrot.slane %v3516_v0, 4  ;;  %3662 = vmatpush.msrb.mxu2 %v3929_v28  ;;  %4335 = vpow2.f32 %v3591_v32 }
 0xc6f   :  { %v3530_v44 = vrot.slane %v3529_v36, 4  ;;  %4337 = vrcp.f32 %v6660_v24 }
 0xc70   :  { %v3518_v48 = vadd.f32 %v3517_v42, %v3516_v0  ;;  %v2809_v11 = vpop.permute.xlu1 %2808  ;;  %3663 = vmatpush.msrb.mxu2 %v3928_v60 }
 0xc71   :  { %v3531_v34 = vadd.f32 %v3530_v44, %v3529_v36 }
 0xc72   :  { %v3519_v52 = vrot.slane %v3518_v48, 2  ;;  %3664 = vmatpush.msrb.mxu2 %v3927_v31 }
 0xc73   :  { %v3532_v22 = vrot.slane %v3531_v34, 2 }
 0xc74   :  { %v3520_v23 = vadd.f32 %v3519_v52, %v3518_v48  ;;  %v4336_v3 = vpop.eup %4335  ;;  %3665 = vmatpush.msrb.mxu2 %v3926_v21 }
 0xc75   :  { %v3533_v26 = vadd.f32 %v3532_v22, %v3531_v34  ;;  %v4338_v27 = vpop.eup %4337  ;;  %v6667_v51 = vadd.f32 1.0, %v4336_v3 }
 0xc76   :  { %v3521_v8 = vrot.slane %v3520_v23, 1  ;;  %v3596_v17 = vmul.f32 %v4338_v27, %v6660_v24  ;;  %vm3601_vm0 = vweird.f32 %v4338_v27 }
 0xc77   :  { %v3534_v57 = vrot.slane %v3533_v26, 1  ;;  %4339 = vrcp.f32 %v6667_v51 }
 0xc78   :  { %v3522_v54 = vadd.f32 %v3521_v8, %v3520_v23  ;;  %v3597_v15 = vsub.f32 1.0, %v3596_v17  ;;  %v7083_v23 = vld [vmem:[#allocation33_spill] sm:$0xff] }
 0xc79   :  { %v3535_v18 = vadd.f32 %v3534_v57, %v3533_v26  ;;  %v3197_v46 = vpop.permute.xlu2 %3196 }
 0xc7a   :  { %v3572_v20 = vsel %vm1787_vm14, %v3571_v16, %v3522_v54  ;;  %v3271_v59 = vsel %vm281_vm15, %v7081_v10, %v3197_v46  ;;  %v3598_v50 = vmul.f32 %v4338_v27, %v3597_v15  ;;  %vm3602_vm14 = vmor %vm3600_vm2, %vm3601_vm0 }
 0xc7b   :  { %v3573_v38 = vsel %vm1789_vm6, %v3572_v20, %v3535_v18  ;;  %v3541_v53 = vmul.f32 %v6572_v45, %v3271_v59  ;;  %vm3605_vm6 = vcmp.eq.f32.partialorder %v3604_v55, 8.507059e+37  ;;  %v3621_v18 = vand.u32 2147483648, %v6667_v51 }
 0xc7c   :  { %v3599_v9 = vadd.f32 %v4338_v27, %v3598_v50 }
 0xc7d   :  { %v4340_v19 = vpop.eup %4339  ;;  %v3622_v46 = vor.u32 1.1754944e-38, %v3621_v18 }
 0xc7e   :  { %v3611_v16 = vmul.f32 %v4340_v19, %v6667_v51  ;;  %v3603_v42 = vsel %vm3602_vm14, %v4338_v27, %v3599_v9  ;;  %vm3616_vm8 = vweird.f32 %v4340_v19 }
 0xc7f   :  { %v3608_v32 = vsel %vm3605_vm6, %v3607_v33, %v3603_v42 }
 0xc80   :  { %v3191_v58 = vpop.permute.xlu1 %3190  ;;  %v3612_v44 = vsub.f32 1.0, %v3611_v16  ;;  %v3625_v57 = vmul.f32 %v3608_v32, %v6629_v13 }
 0xc81   :  { %v3270_v29 = vsel %vm281_vm15, %v7082_v39, %v3191_v58 }
 0xc82   :  { %v3540_v30 = vmul.f32 %v6590_v14, %v3270_v29  ;;  %v3925_v14 = vld [vmem:[%s6805_s10 + $0x48] sm:$0xff]  ;;  %v3613_v24 = vmul.f32 %v4340_v19, %v3612_v44 }
 0xc83   :  { %3666 = vmatpush.msrb.mxu2 %v3925_v14 }
 0xc84   :  { %v3542_v6 = vadd.f32 %v3541_v53, %v3540_v30  ;;  %v7084_v30 = vld [vmem:[#allocation27_spill] sm:$0xff] }
 0xc85   :  { %3667 = vmatpush.msrb.mxu2 %v3924_v43 }
 0xc86   :  { %v3543_v45 = vrot.slane %v3542_v6, 4 }
 0xc88   :  { %v3544_v56 = vadd.f32 %v3543_v45, %v3542_v6  ;;  %v7086_v45 = vld [vmem:[#allocation26_spill] sm:$0xff] }
 0xc89   :  { %v3203_v12 = vpop.permute.xlu2 %3202 }
 0xc8a   :  { %v3545_v5 = vrot.slane %v3544_v56, 2  ;;  %v3272_v1 = vsel %vm281_vm15, %v2803_v63, %v3203_v12  ;;  %v7087_v12 = vld [vmem:[#allocation12_spill] sm:$0xff] }
 0xc8b   :  { %v3553_v47 = vmul.f32 %v6617_v2, %v3272_v1 }
 0xc8c   :  { %v3546_v37 = vadd.f32 %v3545_v5, %v3544_v56 }
 0xc8e   :  { %v3547_v4 = vrot.slane %v3546_v37, 1 }
 0xc90   :  { %v3548_v0 = vadd.f32 %v3547_v4, %v3546_v37  ;;  %v3209_v36 = vpop.permute.xlu1 %3208 }
 0xc91   :  { %v3273_v48 = vsel %vm281_vm15, %v2809_v11, %v3209_v36  ;;  %v3579_v49 = vpop.permute.xlu2 %3578  ;;  %v3614_v11 = vadd.f32 %v4340_v19, %v3613_v24 }
 0xc92   :  { %v3554_v7 = vmul.f32 %v6578_v41, %v3273_v48  ;;  %v3574_v34 = vsel %vm1791_vm7, %v3573_v38, %v3548_v0  ;;  %v3581_v52 = vsel %vm281_vm15, %v6597_v25, %v3579_v49  ;;  %vm3615_vm7 = vweird.f32 %v6667_v51 }
 0xc93   :  { %v3582_v28 = vperm.slane %v3581_v52, 0  ;;  %v3619_v25 = vand.u32 2147483647, %v6667_v51  ;;  %vm3617_vm10 = vmor %vm3615_vm7, %vm3616_vm8 }
 0xc94   :  { %v3555_v22 = vadd.f32 %v3554_v7, %v3553_v47  ;;  %v3618_v13 = vsel %vm3617_vm10, %v4340_v19, %v3614_v11 }
 0xc95   :  { %v3583_v26 = vmul.f32 %v3582_v28, %v7083_v23  ;;  %vm3620_vm11 = vcmp.eq.f32.partialorder %v3619_v25, 8.507059e+37  ;;  %v3584_v10 = vmul.f32 %v3582_v28, %v7048_v35 }
 0xc96   :  { %v3556_v8 = vrot.slane %v3555_v22, 4  ;;  %v3623_v3 = vsel %vm3620_vm11, %v3622_v46, %v3618_v13  ;;  %v6750_v13 = vld [vmem:[%s6809_s14] ss:$0 sm:$0xff] }
 0xc97   :  { %v3585_v54 = vadd.f32 %v3583_v26, %v6503_v61  ;;  %v3626_v58 = vmul.f32 %v3623_v3, %v6648_v40  ;;  %v7085_v40 = vld [vmem:[#allocation24_spill] sm:$0xff] }
 0xc98   :  { %v3557_v2 = vadd.f32 %v3556_v8, %v3555_v22 }
 0xc99   :  { %v3627_v41 = vmul.f32 %v3625_v57, %v3585_v54 }
 0xc9a   :  { %v3558_v20 = vrot.slane %v3557_v2, 2 }
 0xc9b   :  { %3631 = vrot.lane.b32.xlu0 %v3627_v41, %s4406_s22  ;;  %3932 = vmatmul.msk.f32.vlgmr.msrb.gmra.mxu2 %vm281_vm15, %v3627_v41 }
 0xc9c   :  { %v3559_v38 = vadd.f32 %v3558_v20, %v3557_v2  ;;  %v6745_v20 = vld [vmem:[%s6808_s13] ss:$0 sm:$0xff] }
 0xc9e   :  { %v3560_v61 = vrot.slane %v3559_v38, 1 }
 0xca0   :  { %v3561_v27 = vadd.f32 %v3560_v61, %v3559_v38 }
 0xca2   :  { %v3575_v59 = vsel %vm1793_vm9, %v3574_v34, %v3561_v27 }
 0xca3   :  { %v3586_v17 = vadd.f32 %v3584_v10, %v3575_v59 }
 0xca5   :  { %v3628_v51 = vmul.f32 %v3626_v58, %v3586_v17 }
 0xca7   :  { %3633 = vrot.lane.b32.xlu1 %v3628_v51, %s4406_s22  ;;  %3933 = vmatmul.msk.f32.gmra.mxu2 %vm281_vm15, %v3628_v51 }
 0xd0d   :  { %v3632_v39 = vpop.permute.xlu0 %3631 }
 0xd0e   :  { %3934 = vmatmul.msk.f32.gmra.mxu2 %vm281_vm15, %v3632_v39 }
 0xd19   :  { %v3634_v29 = vpop.permute.xlu1 %3633 }
 0xd1a   :  { %3935 = vmatmul.msk.f32.gmra.mxu2 %vm281_vm15, %v3634_v29 }
 0xd1e   :  { %v3669_v53 = vpop.f32.mrf.mxu2 }
 0xd1f   :  { %v3670_v60 = vadd.f32 %v3669_v53, %v7084_v30 }
 0xd21   :  { %v3683_v35 = vsel %vm122_vm1, %v3670_v60, 0.0 }
 0xd22   :  { %3684 = vadd.xlane.f32.xlu2 %v3683_v35 }
 0xd2a   :  { %v3672_v31 = vpop.f32.mrf.mxu2 }
 0xd2b   :  { %v3673_v6 = vadd.f32 %v3672_v31, %v7085_v40 }
 0xd2d   :  { %v3686_v15 = vsel %vm122_vm1, %v3673_v6, 0.0 }
 0xd2e   :  { %3687 = vadd.xlane.f32.xlu0 %v3686_v15  ;;  %v3821_v15 = vld [vmem:[%s6810_s15 + $0x18] sm:$0xff] }
 0xd2f   :  { %3841 = vmatpush.msra.mxu3 %v3821_v15 }
 0xd91   :  { %v3675_v21 = vpop.f32.mrf.mxu2 }
 0xd92   :  { %v3676_v14 = vadd.f32 %v3675_v21, %v7086_v45  ;;  %v3820_v21 = vld [vmem:[%s6810_s15 + $0x10] sm:$0xff] }
 0xd93   :  { %3842 = vmatpush.msra.mxu3 %v3820_v21 }
 0xd94   :  { %v3689_v56 = vsel %vm122_vm1, %v3676_v14, 0.0 }
 0xd95   :  { %v3685_v50 = vpop.xlane.xlu2 %3684  ;;  %3690 = vadd.xlane.f32.xlu1 %v3689_v56 }
 0xd96   :  { %v3695_v43 = vmul.f32 %v3685_v50, %v7087_v12  ;;  %v3819_v50 = vld [vmem:[%s6810_s15 + $0x8] sm:$0xff] }
 0xd97   :  { %3843 = vmatpush.msra.mxu3 %v3819_v50 }
 0xd98   :  { %v3699_v19 = vsub.f32 %v3670_v60, %v3695_v43 }
 0xd9a   :  { %v3703_v5 = vmul.f32 %v3699_v19, %v3699_v19 }
 0xd9c   :  { %v3707_v37 = vsel %vm122_vm1, %v3703_v5, 0.0  ;;  %v3818_v5 = vld [vmem:[%s6810_s15] sm:$0xff]  ;;  %s4408_s15 = smov [#allocation4]  }
 0xd9d   :  { %3708 = vadd.xlane.f32.xlu0 %v3707_v37  ;;  %v3678_v9 = vpop.f32.mrf.mxu2  ;;  %3844 = vmatpush.msra.mxu3 %v3818_v5  ;;  %s3866_s26 = sshll.u32 %s4408_s15, 4  ;;  %s3867_s26 = int_to_ptr.vmem [resolvable:$true] %s3866_s26 }
 0xd9e   :  { %v3679_v16 = vadd.f32 %v3678_v9, %v7088_v62 }
 0xda0   :  { %v3692_v63 = vsel %vm122_vm1, %v3679_v16, 0.0 }
 0xda1   :  { %3693 = vadd.xlane.f32.xlu2 %v3692_v63  ;;  %v3688_v4 = vpop.xlane.xlu0 %3687 }
 0xda2   :  { %v3696_v55 = vmul.f32 %v3688_v4, %v7087_v12 }
 0xda4   :  { %v3700_v1 = vsub.f32 %v3673_v6, %v3696_v55 }
 0xda6   :  { %v3704_v0 = vmul.f32 %v3700_v1, %v3700_v1 }
 0xda8   :  { %v3710_v36 = vsel %vm122_vm1, %v3704_v0, 0.0 }
 0xda9   :  { %3711 = vadd.xlane.f32.xlu1 %v3710_v36 }
 0xe08   :  { %v3691_v42 = vpop.xlane.xlu1 %3690 }
 0xe09   :  { %v3697_v33 = vmul.f32 %v3691_v42, %v7087_v12 }
 0xe0b   :  { %v6729_v44 = vsub.f32 %v3676_v14, %v3697_v33  ;;  %v4407_v33 = vmov 16.0  }
 0xe0d   :  { %v3705_v48 = vmul.f32 %v6729_v44, %v6729_v44 }
 0xe0f   :  { %v3713_v49 = vsel %vm122_vm1, %v3705_v48, 0.0 }
 0xe10   :  { %3714 = vadd.xlane.f32.xlu2 %v3713_v49  ;;  %v3709_v47 = vpop.xlane.xlu0 %3708 }
 0xe11   :  { %v3719_v7 = vmul.f32 %v3709_v47, %v7087_v12 }
 0xe13   :  { %v3723_v34 = vadd.f32 1e-05, %v3719_v7 }
 0xe14   :  { %v3694_v52 = vpop.xlane.xlu2 %3693 }
 0xe15   :  { %4341 = vrsqrt.f32 %v3723_v34  ;;  %v3698_v28 = vmul.f32 %v3694_v52, %v7087_v12  ;;  %vm3733_vm9 = vweird.f32 %v3723_v34 }
 0xe17   :  { %v6736_v32 = vsub.f32 %v3679_v16, %v3698_v28 }
 0xe19   :  { %v3706_v22 = vmul.f32 %v6736_v32, %v6736_v32 }
 0xe1b   :  { %v4342_v24 = vpop.eup %4341  ;;  %v3716_v23 = vsel %vm122_vm1, %v3706_v22, 0.0 }
 0xe1c   :  { %v3728_v26 = vmul.f32 %v4342_v24, %v3723_v34  ;;  %3717 = vadd.xlane.f32.xlu0 %v3716_v23  ;;  %v3712_v8 = vpop.xlane.xlu1 %3711  ;;  %vm3734_vm15 = vweird.f32 %v4342_v24 }
 0xe1d   :  { %v3720_v57 = vmul.f32 %v3712_v8, %v7087_v12  ;;  %vm3735_vm12 = vmor %vm3733_vm9, %vm3734_vm15 }
 0xe1e   :  { %v3729_v54 = vmul.f32 %v4342_v24, %v3728_v26 }
 0xe1f   :  { %v3724_v2 = vadd.f32 1e-05, %v3720_v57 }
 0xe20   :  { %v3730_v11 = vmul.f32 0.5, %v3729_v54 }
 0xe21   :  { %4343 = vrsqrt.f32 %v3724_v2  ;;  %vm3743_vm4 = vweird.f32 %v3724_v2 }
 0xe22   :  { %v3731_v41 = vsub.f32 1.5, %v3730_v11 }
 0xe24   :  { %v3732_v18 = vmul.f32 %v4342_v24, %v3731_v41 }
 0xe26   :  { %v3736_v25 = vsel %vm3735_vm12, %v4342_v24, %v3732_v18 }
 0xe27   :  { %v4344_v38 = vpop.eup %4343  ;;  %v3767_v46 = vmul.f32 %v3736_v25, %v3699_v19 }
 0xe28   :  { %v3738_v61 = vmul.f32 %v4344_v38, %v3724_v2  ;;  %vm3744_vm13 = vweird.f32 %v4344_v38 }
 0xe29   :  { %v3774_v3 = vmul.f32 %v6745_v20, %v3767_v46  ;;  %vm3745_vm5 = vmor %vm3743_vm4, %vm3744_vm13 }
 0xe2a   :  { %v3739_v27 = vmul.f32 %v4344_v38, %v3738_v61 }
 0xe2b   :  { %v3781_v10 = vadd.f32 %v6750_v13, %v3774_v3 }
 0xe2c   :  { %v3740_v59 = vmul.f32 0.5, %v3739_v27 }
 0xe2d   :  { %3785 = vst.msk [vmem:[#allocation4] sm:$0xff] %vm122_vm1, %v3781_v10  ;;  %v3787_v30 = vsel %vm122_vm1, %v3781_v10, 0.0 }
 0xe2e   :  { %v3741_v58 = vsub.f32 1.5, %v3740_v59 }
 0xe30   :  { %v3742_v17 = vmul.f32 %v4344_v38, %v3741_v58  ;;  %v4146_v58 = vld [vmem:[%s6811_s16] ss:$0 sm:$0xff] }
 0xe32   :  { %v3746_v51 = vsel %vm3745_vm5, %v4344_v38, %v3742_v17 }
 0xe33   :  { %v3768_v39 = vmul.f32 %v3746_v51, %v3700_v1 }
 0xe35   :  { %v3775_v29 = vmul.f32 %v6745_v20, %v3768_v39 }
 0xe37   :  { %v3782_v53 = vadd.f32 %v6750_v13, %v3775_v29 }
 0xe39   :  { %3786 = vst.msk [vmem:[#allocation4 + $0x8] sm:$0xff] %vm122_vm1, %v3782_v53  ;;  %v3788_v60 = vsel %vm122_vm1, %v3782_v53, 0.0 }
 0xe3a   :  { %v3789_v35 = vadd.f32 %v3788_v60, %v3787_v30 }
 0xe3c   :  { %v3790_v47 = vrot.slane %v3789_v35, 4 }
 0xe3e   :  { %v3791_v52 = vadd.f32 %v3790_v47, %v3789_v35 }
 0xe40   :  { %v3792_v23 = vrot.slane %v3791_v52, 2 }
 0xe42   :  { %v3793_v2 = vadd.f32 %v3792_v23, %v3791_v52 }
 0xe83   :  { %v3715_v31 = vpop.xlane.xlu2 %3714 }
 0xe84   :  { %v3721_v40 = vmul.f32 %v3715_v31, %v7087_v12 }
 0xe86   :  { %v3725_v6 = vadd.f32 1e-05, %v3721_v40 }
 0xe88   :  { %4345 = vrsqrt.f32 %v3725_v6  ;;  %vm3753_vm2 = vweird.f32 %v3725_v6 }
 0xe8e   :  { %v4346_v45 = vpop.eup %4345 }
 0xe8f   :  { %v3748_v14 = vmul.f32 %v4346_v45, %v3725_v6  ;;  %v3718_v56 = vpop.xlane.xlu0 %3717  ;;  %vm3754_vm0 = vweird.f32 %v4346_v45 }
 0xe90   :  { %v3722_v43 = vmul.f32 %v3718_v56, %v7087_v12  ;;  %vm3755_vm14 = vmor %vm3753_vm2, %vm3754_vm0 }
 0xe91   :  { %v3749_v19 = vmul.f32 %v4346_v45, %v3748_v14 }
 0xe92   :  { %v3726_v37 = vadd.f32 1e-05, %v3722_v43 }
 0xe93   :  { %v3750_v9 = vmul.f32 0.5, %v3749_v19 }
 0xe94   :  { %4347 = vrsqrt.f32 %v3726_v37  ;;  %vm3763_vm8 = vweird.f32 %v3726_v37 }
 0xe95   :  { %v3751_v62 = vsub.f32 1.5, %v3750_v9  ;;  %4349 = vrcp.f32 %v4407_v33 }
 0xe97   :  { %v3752_v16 = vmul.f32 %v4346_v45, %v3751_v62 }
 0xe99   :  { %v3756_v63 = vsel %vm3755_vm14, %v4346_v45, %v3752_v16 }
 0xe9a   :  { %v4348_v4 = vpop.eup %4347  ;;  %v3769_v12 = vmul.f32 %v3756_v63, %v6729_v44 }
 0xe9b   :  { %v3758_v55 = vmul.f32 %v4348_v4, %v3726_v37  ;;  %vm3764_vm6 = vweird.f32 %v4348_v4  ;;  %v4350_v7 = vpop.eup %4349 }
 0xe9c   :  { %v3776_v1 = vmul.f32 %v6745_v20, %v3769_v12  ;;  %vm3765_vm7 = vmor %vm3763_vm8, %vm3764_vm6  ;;  %v3797_v22 = vmul.f32 16.0, %v4350_v7  ;;  %vm3801_vm10 = vweird.f32 %v4350_v7 }
 0xe9d   :  { %v3759_v0 = vmul.f32 %v4348_v4, %v3758_v55 }
 0xe9e   :  { %v3783_v36 = vadd.f32 %v6750_v13, %v3776_v1  ;;  %v3798_v57 = vsub.f32 1.0, %v3797_v22 }
 0xe9f   :  { %v3760_v42 = vmul.f32 0.5, %v3759_v0 }
 0xea0   :  { %3805 = vst.msk [vmem:[#allocation4 + $0x10] sm:$0xff] %vm122_vm1, %v3783_v36  ;;  %v3807_v26 = vsel %vm122_vm1, %v3783_v36, 0.0  ;;  %v3799_v41 = vmul.f32 %v4350_v7, %v3798_v57 }
 0xea1   :  { %v3761_v48 = vsub.f32 1.5, %v3760_v42 }
 0xea2   :  { %v3800_v38 = vadd.f32 %v4350_v7, %v3799_v41 }
 0xea3   :  { %v3762_v49 = vmul.f32 %v4348_v4, %v3761_v48 }
 0xea4   :  { %v3802_v61 = vsel %vm3801_vm10, %v4350_v7, %v3800_v38 }
 0xea5   :  { %v3766_v34 = vsel %vm3765_vm7, %v4348_v4, %v3762_v49 }
 0xea6   :  { %v3770_v44 = vmul.f32 %v3766_v34, %v6736_v32  ;;  %v3794_v32 = vrot.slane %v3793_v2, 1 }
 0xea8   :  { %v3777_v28 = vmul.f32 %v6745_v20, %v3770_v44  ;;  %v3795_v46 = vadd.f32 %v3794_v32, %v3793_v2 }
 0xeaa   :  { %v3784_v24 = vadd.f32 %v6750_v13, %v3777_v28  ;;  %v3803_v27 = vmul.f32 %v3802_v61, %v3795_v46 }
 0xeac   :  { %3806 = vst.msk [vmem:[#allocation4 + $0x18] sm:$0xff] %vm122_vm1, %v3784_v24  ;;  %v3808_v8 = vsel %vm122_vm1, %v3784_v24, 0.0 }
 0xead   :  { %v3809_v54 = vadd.f32 %v3808_v8, %v3807_v26  ;;  %3874 = dma.vmem_to_hbm [thread:$0]  %s3867_s26, 512, %s3869_s11, [#allocation5], %s4409_s28, %s4409_s28, %s4410_s30  }
 0xeaf   :  { %v3810_v11 = vrot.slane %v3809_v54, 4 }
 0xeb1   :  { %v3811_v18 = vadd.f32 %v3810_v11, %v3809_v54 }
 0xeb3   :  { %v3812_v25 = vrot.slane %v3811_v18, 2 }
 0xeb5   :  { %v3813_v20 = vadd.f32 %v3812_v25, %v3811_v18 }
 0xeb7   :  { %v3814_v13 = vrot.slane %v3813_v20, 1 }
 0xeb9   :  { %v3815_v3 = vadd.f32 %v3814_v13, %v3813_v20 }
 0xebb   :  { %v3816_v10 = vmul.f32 %v3815_v3, %v3802_v61 }
 0xebd   :  { %v3817_v59 = vsel %vm334_vm3, %v3803_v27, %v3816_v10 }
 0xebe   :  { %3936 = vmatmul.msk.f32.vlgmr.msra.gmra.mxu3 %vm122_vm1, %v3817_v59  ;;  %vm3849_vm1 = vcmask 74752  }
 0xf41   :  { %v3846_v17 = vpop.f32.mrf.mxu3 }
 0xf42   :  { %v3847_v51 = vadd.f32 %v4146_v58, %v3846_v17 }
 0xf44   :  { %3850 = vst.msk [vmem:[#allocation2] sm:$0x3] %vm3849_vm1, %v3847_v51 }
 0xf45   :  { %3861 = dma.vmem_to_hbm [thread:$0]  %s3857_s29, 32, %s3859_s21, [#allocation3]  }
 0xf46   :  { %4401 = dma.done.wait [#allocation3], 32  }
 0xf47   :  { %4402 = vsyncadd [#allocation3], 4294967264 }
 0xf48   :  { %4403 = dma.done.wait [#allocation5], 512  }
 0xf49   :  { %4404 = vsyncadd [#allocation5], 4294966784 }
 0xf4a   :  { %3883 = vsyncpa [#allocation3], 1 }
 0xf4b   :  { %3884 = vsyncpa [#allocation5], 1 }

</bundles_post_ra>
